<compile_context>
chip_gen: v7x
topology: tpu7x:2x2x1
jax: 0.10.0
libtpu: 0.0.40
codegen_flags: <defaults>
</compile_context>

<pallas_src>
import functools

import jax
import jax.numpy as jnp
from jax.experimental import pallas as pl
from jax.experimental.pallas import tpu as pltpu


# Layer widths of OverProjNetXL (projection_axis=x -> final out_features = 1).
_LAYER_DIMS = [4, 16, 64, 256, 1024, 256, 64, 16, 1]


def _round_up(x, m):
    return -(-x // m) * m


def _mlp_kernel(x_ref, *refs):
    """Fused OverProjNetXL forward on one row tile.

    refs = (w1, b1, ..., w7, b7, w8, b8, o_ref)
      w1..w7: bf16, transposed to [in, out]   (MXU operands)
      b1..b7: f32, [1, out]                   (bias add / ReLU stay f32)
      w8:     f32, [1, 16]                    (nn.Linear layout, VPU path)
      b8:     f32, [1, 1]
      o_ref:  f32, [1, bm]                    (lane-dense output block)
    """
    o_ref = refs[-1]
    wb = refs[:-1]
    n_hidden = (len(wb) - 2) // 2            # 7 (Linear + ReLU) layers

    h = x_ref[...]                           # [bm, 4] f32
    for i in range(n_hidden):                # unrolled at trace time
        w = wb[2 * i][...]                   # bf16 [in, out]
        b = wb[2 * i + 1][...]               # f32  [1, out]
        h = jnp.dot(h.astype(jnp.bfloat16), w,
                    preferred_element_type=jnp.float32) + b
        h = jnp.maximum(h, 0.0)              # ReLU on the VPU (f32)

    # Final 16 -> 1 projection on VPU + XLU lane-reduce (skip the N=1 MXU pass).
    w8 = wb[-2][...]                         # [1, 16] f32
    b8 = wb[-1][...]                         # [1, 1]  f32
    out = jnp.sum(h * w8, axis=-1)           # [bm] f32
    o_ref[...] = (out.reshape(1, -1) + b8).astype(o_ref.dtype)


def prepare_params(weights, biases):
    """One-time parameter prep, hoisted out of the forward pass.

    weights[i]: [out_i, in_i] (PyTorch nn.Linear layout), biases[i]: [out_i].
    Hidden weights -> transposed [in, out] bf16 (MXU operands); biases -> [1, out]
    f32; final 16->1 layer kept in f32 / original layout for the VPU path.
    """
    n = len(weights)
    params = []
    for i, (w, b) in enumerate(zip(weights, biases)):
        if i < n - 1:
            params.append(jnp.asarray(w).T.astype(jnp.bfloat16))               # [in, out]
            params.append(jnp.asarray(b).reshape(1, -1).astype(jnp.float32))   # [1, out]
        else:
            params.append(jnp.asarray(w).astype(jnp.float32))                  # [1, 16]
            params.append(jnp.asarray(b).reshape(1, -1).astype(jnp.float32))   # [1, 1]
    return params


@functools.partial(jax.jit, static_argnames=("block_rows", "single_buffer_weights"))
def _forward(x, params, *, block_rows=512, single_buffer_weights=True):
    n, in_f = x.shape
    assert in_f == _LAYER_DIMS[0]
    out_f = params[-1].shape[-1]
    assert out_f == 1  # projection_axis=x  (TODO(synk): 'both' -> 2 outputs not wired)

    # Row tile: multiple of 8 sublanes.  For batches big enough, make it a multiple
    # of 128 (lane-dense output blocks) and leave >=2 grid steps so v7x's two
    # TensorCores can split the "parallel" axis.  Tiny batches knowingly run as a
    # single step / single core (can't split below 8 sublanes anyway).
    n8 = _round_up(n, 8)
    if n8 <= 256:
        bm = n8
    else:
        bm = min(_round_up(block_rows, 128), _round_up(-(-n8 // 2), 128))
    n_pad = _round_up(n, bm)
    grid = (n_pad // bm,)

    x_p = jnp.pad(x, ((0, n_pad - n), (0, 0))) if n_pad != n else x
    # Padded rows produce bias-only garbage; they are sliced off below (benign).

    # Constant-index weight/bias blocks: single-buffer them when supported
    # (default double-buffering wastes ~1.2 MiB of VMEM on blocks that never change).
    wkw = dict(pipeline_mode=pl.Buffered(1)) if single_buffer_weights else {}

    in_specs = [pl.BlockSpec((bm, in_f), lambda i: (i, 0))]
    for p in params:
        in_specs.append(pl.BlockSpec(p.shape, lambda i: (0, 0), **wkw))

    # Lane-dense output: (1, n_pad) array, (1, bm) block per step -> unmasked vst.
    out_specs = pl.BlockSpec((1, bm), lambda i: (0, i))

    flops = 2 * n_pad * sum(a * b for a, b in zip(_LAYER_DIMS[:-1], _LAYER_DIMS[1:]))
    bytes_accessed = int(4 * (x_p.size + n_pad)
                         + sum(p.size * p.dtype.itemsize for p in params))

    y2d = pl.pallas_call(
        _mlp_kernel,
        out_shape=jax.ShapeDtypeStruct((1, n_pad), jnp.float32),
        grid=grid,
        in_specs=in_specs,
        out_specs=out_specs,
        compiler_params=pltpu.CompilerParams(
            dimension_semantics=("parallel",),
            # Safe for bm <= 1024 on all of v5e/v6e/v7x; re-derive (and raise on
            # v5e/v6e, re-check v7x's 64 MiB) before scaling bm further.
            vmem_limit_bytes=32 * 1024 * 1024,
        ),
        cost_estimate=pl.CostEstimate(
            flops=flops, transcendentals=0, bytes_accessed=bytes_accessed),
    )(x_p, *params)

    return y2d[0, :n].reshape(n, 1).astype(x.dtype)


def over_proj_net_xl(x, params, *, block_rows=512):
    """OverProjNetXL forward.  x: [N, 4] f32, params from prepare_params()."""
    try:
        return _forward(x, params, block_rows=block_rows, single_buffer_weights=True)
    except Exception:
        # pl.Buffered(1) (single-buffered constant blocks) unsupported on this jax
        # version -> fall back to default double-buffering (plenty of VMEM headroom).
        return _forward(x, params, block_rows=block_rows, single_buffer_weights=False)


if __name__ == "__main__":
    key = jax.random.PRNGKey(0)
    dims = _LAYER_DIMS

    keys = jax.random.split(key, 2 + 2 * (len(dims) - 1))
    weights, biases = [], []
    for li in range(len(dims) - 1):
        kw, kb = keys[2 + 2 * li], keys[3 + 2 * li]
        # init_with_normal: weights ~ N(0, 0.01); biases ~ nn.Linear default U(+-1/sqrt(in)).
        weights.append(
            0.01 * jax.random.normal(kw, (dims[li + 1], dims[li]), dtype=jnp.float32))
        bound = 1.0 / float(dims[li]) ** 0.5
        biases.append(
            jax.random.uniform(kb, (dims[li + 1],), jnp.float32, -bound, bound))

    params = prepare_params(weights, biases)   # one-time prep (hoisted out of forward)

    def reference(x):
        h = x
        for li in range(len(dims) - 1):
            h = h @ weights[li].T + biases[li]
            if li < len(dims) - 2:
                h = jnp.maximum(h, 0.0)
        return h

    # Small batch: single grid step.
    x_small = jax.random.normal(keys[0], (8, dims[0]), dtype=jnp.float32)
    y_small = jax.block_until_ready(over_proj_net_xl(x_small, params))
    assert y_small.shape == (8, 1)
    assert jnp.allclose(y_small, reference(x_small), rtol=2e-2, atol=2e-2)

    # Larger batch: multi-step grid, row padding, lane-dense multi-block output.
    x_big = jax.random.normal(keys[1], (300, dims[0]), dtype=jnp.float32)
    y_big = jax.block_until_ready(over_proj_net_xl(x_big, params))
    assert y_big.shape == (300, 1)
    assert jnp.allclose(y_big, reference(x_big), rtol=2e-2, atol=2e-2)

    print("KERNEL_OK")
</pallas_src>

<mosaic_0001>
module attributes {stable_mosaic.version = 11 : i64} {
  func.func @_mlp_kernel(%arg0: i32, %arg1: memref<8x4xf32, #tpu.memory_space<vmem>>, %arg2: memref<4x16xbf16, #tpu.memory_space<vmem>>, %arg3: memref<1x16xf32, #tpu.memory_space<vmem>>, %arg4: memref<16x64xbf16, #tpu.memory_space<vmem>>, %arg5: memref<1x64xf32, #tpu.memory_space<vmem>>, %arg6: memref<64x256xbf16, #tpu.memory_space<vmem>>, %arg7: memref<1x256xf32, #tpu.memory_space<vmem>>, %arg8: memref<256x1024xbf16, #tpu.memory_space<vmem>>, %arg9: memref<1x1024xf32, #tpu.memory_space<vmem>>, %arg10: memref<1024x256xbf16, #tpu.memory_space<vmem>>, %arg11: memref<1x256xf32, #tpu.memory_space<vmem>>, %arg12: memref<256x64xbf16, #tpu.memory_space<vmem>>, %arg13: memref<1x64xf32, #tpu.memory_space<vmem>>, %arg14: memref<64x16xbf16, #tpu.memory_space<vmem>>, %arg15: memref<1x16xf32, #tpu.memory_space<vmem>>, %arg16: memref<1x16xf32, #tpu.memory_space<vmem>>, %arg17: memref<1x1xf32, #tpu.memory_space<vmem>>, %arg18: memref<1x8xf32, #tpu.memory_space<vmem>>) attributes {dimension_semantics = [#tpu.dimension_semantics<parallel>], iteration_bounds = array<i64: 1>, scalar_prefetch = 0 : i64, scratch_operands = 0 : i64, tpu.core_type = #tpu.core_type<tc>, window_params = [{transform_indices = @transform_0, window_bounds = array<i64: 8, 4>}, {pipeline_mode = #tpu.pipeline_mode<synchronous>, transform_indices = @transform_1, window_bounds = array<i64: 4, 16>}, {pipeline_mode = #tpu.pipeline_mode<synchronous>, transform_indices = @transform_2, window_bounds = array<i64: 1, 16>}, {pipeline_mode = #tpu.pipeline_mode<synchronous>, transform_indices = @transform_3, window_bounds = array<i64: 16, 64>}, {pipeline_mode = #tpu.pipeline_mode<synchronous>, transform_indices = @transform_4, window_bounds = array<i64: 1, 64>}, {pipeline_mode = #tpu.pipeline_mode<synchronous>, transform_indices = @transform_5, window_bounds = array<i64: 64, 256>}, {pipeline_mode = #tpu.pipeline_mode<synchronous>, transform_indices = @transform_6, window_bounds = array<i64: 1, 256>}, {pipeline_mode = #tpu.pipeline_mode<synchronous>, transform_indices = @transform_7, window_bounds = array<i64: 256, 1024>}, {pipeline_mode = #tpu.pipeline_mode<synchronous>, transform_indices = @transform_8, window_bounds = array<i64: 1, 1024>}, {pipeline_mode = #tpu.pipeline_mode<synchronous>, transform_indices = @transform_9, window_bounds = array<i64: 1024, 256>}, {pipeline_mode = #tpu.pipeline_mode<synchronous>, transform_indices = @transform_10, window_bounds = array<i64: 1, 256>}, {pipeline_mode = #tpu.pipeline_mode<synchronous>, transform_indices = @transform_11, window_bounds = array<i64: 256, 64>}, {pipeline_mode = #tpu.pipeline_mode<synchronous>, transform_indices = @transform_12, window_bounds = array<i64: 1, 64>}, {pipeline_mode = #tpu.pipeline_mode<synchronous>, transform_indices = @transform_13, window_bounds = array<i64: 64, 16>}, {pipeline_mode = #tpu.pipeline_mode<synchronous>, transform_indices = @transform_14, window_bounds = array<i64: 1, 16>}, {pipeline_mode = #tpu.pipeline_mode<synchronous>, transform_indices = @transform_15, window_bounds = array<i64: 1, 16>}, {pipeline_mode = #tpu.pipeline_mode<synchronous>, transform_indices = @transform_16, window_bounds = array<i64: 1, 1>}, {transform_indices = @transform_17, window_bounds = array<i64: 1, 8>}]} {
    %c0 = arith.constant 0 : index
    %c0_0 = arith.constant 0 : index
    %0 = vector.load %arg1[%c0, %c0_0] : memref<8x4xf32, #tpu.memory_space<vmem>>, vector<8x4xf32>
    %c0_1 = arith.constant 0 : index
    %c0_2 = arith.constant 0 : index
    %1 = vector.load %arg2[%c0_1, %c0_2] : memref<4x16xbf16, #tpu.memory_space<vmem>>, vector<4x16xbf16>
    %c0_3 = arith.constant 0 : index
    %c0_4 = arith.constant 0 : index
    %2 = vector.load %arg3[%c0_3, %c0_4] : memref<1x16xf32, #tpu.memory_space<vmem>>, vector<1x16xf32>
    %3 = arith.truncf %0 : vector<8x4xf32> to vector<8x4xbf16>
    %cst = arith.constant dense<0.000000e+00> : vector<8x16xf32>
    %4 = tpu.matmul %3, %1, %cst {dimension_numbers = #tpu.dot_dimension_numbers<[1], [0], [0], [1], [0, 0, 1, 1], [], []>} : vector<8x4xbf16>, vector<4x16xbf16>, vector<8x16xf32> -> vector<8x16xf32>
    %5 = vector.broadcast %2 : vector<1x16xf32> to vector<8x16xf32>
    %6 = arith.addf %4, %5 : vector<8x16xf32>
    %cst_5 = arith.constant 0.000000e+00 : f32
    %7 = vector.broadcast %cst_5 : f32 to vector<8x16xf32>
    %8 = arith.maximumf %6, %7 : vector<8x16xf32>
    %c0_6 = arith.constant 0 : index
    %c0_7 = arith.constant 0 : index
    %9 = vector.load %arg4[%c0_6, %c0_7] : memref<16x64xbf16, #tpu.memory_space<vmem>>, vector<16x64xbf16>
    %c0_8 = arith.constant 0 : index
    %c0_9 = arith.constant 0 : index
    %10 = vector.load %arg5[%c0_8, %c0_9] : memref<1x64xf32, #tpu.memory_space<vmem>>, vector<1x64xf32>
    %11 = arith.truncf %8 : vector<8x16xf32> to vector<8x16xbf16>
    %cst_10 = arith.constant dense<0.000000e+00> : vector<8x64xf32>
    %12 = tpu.matmul %11, %9, %cst_10 {dimension_numbers = #tpu.dot_dimension_numbers<[1], [0], [0], [1], [0, 0, 1, 1], [], []>} : vector<8x16xbf16>, vector<16x64xbf16>, vector<8x64xf32> -> vector<8x64xf32>
    %13 = vector.broadcast %10 : vector<1x64xf32> to vector<8x64xf32>
    %14 = arith.addf %12, %13 : vector<8x64xf32>
    %cst_11 = arith.constant 0.000000e+00 : f32
    %15 = vector.broadcast %cst_11 : f32 to vector<8x64xf32>
    %16 = arith.maximumf %14, %15 : vector<8x64xf32>
    %c0_12 = arith.constant 0 : index
    %c0_13 = arith.constant 0 : index
    %17 = vector.load %arg6[%c0_12, %c0_13] : memref<64x256xbf16, #tpu.memory_space<vmem>>, vector<64x256xbf16>
    %c0_14 = arith.constant 0 : index
    %c0_15 = arith.constant 0 : index
    %18 = vector.load %arg7[%c0_14, %c0_15] : memref<1x256xf32, #tpu.memory_space<vmem>>, vector<1x256xf32>
    %19 = arith.truncf %16 : vector<8x64xf32> to vector<8x64xbf16>
    %cst_16 = arith.constant dense<0.000000e+00> : vector<8x256xf32>
    %20 = tpu.matmul %19, %17, %cst_16 {dimension_numbers = #tpu.dot_dimension_numbers<[1], [0], [0], [1], [0, 0, 1, 1], [], []>} : vector<8x64xbf16>, vector<64x256xbf16>, vector<8x256xf32> -> vector<8x256xf32>
    %21 = vector.broadcast %18 : vector<1x256xf32> to vector<8x256xf32>
    %22 = arith.addf %20, %21 : vector<8x256xf32>
    %cst_17 = arith.constant 0.000000e+00 : f32
    %23 = vector.broadcast %cst_17 : f32 to vector<8x256xf32>
    %24 = arith.maximumf %22, %23 : vector<8x256xf32>
    %c0_18 = arith.constant 0 : index
    %c0_19 = arith.constant 0 : index
    %25 = vector.load %arg8[%c0_18, %c0_19] : memref<256x1024xbf16, #tpu.memory_space<vmem>>, vector<256x1024xbf16>
    %c0_20 = arith.constant 0 : index
    %c0_21 = arith.constant 0 : index
    %26 = vector.load %arg9[%c0_20, %c0_21] : memref<1x1024xf32, #tpu.memory_space<vmem>>, vector<1x1024xf32>
    %27 = arith.truncf %24 : vector<8x256xf32> to vector<8x256xbf16>
    %cst_22 = arith.constant dense<0.000000e+00> : vector<8x1024xf32>
    %28 = tpu.matmul %27, %25, %cst_22 {dimension_numbers = #tpu.dot_dimension_numbers<[1], [0], [0], [1], [0, 0, 1, 1], [], []>} : vector<8x256xbf16>, vector<256x1024xbf16>, vector<8x1024xf32> -> vector<8x1024xf32>
    %29 = vector.broadcast %26 : vector<1x1024xf32> to vector<8x1024xf32>
    %30 = arith.addf %28, %29 : vector<8x1024xf32>
    %cst_23 = arith.constant 0.000000e+00 : f32
    %31 = vector.broadcast %cst_23 : f32 to vector<8x1024xf32>
    %32 = arith.maximumf %30, %31 : vector<8x1024xf32>
    %c0_24 = arith.constant 0 : index
    %c0_25 = arith.constant 0 : index
    %33 = vector.load %arg10[%c0_24, %c0_25] : memref<1024x256xbf16, #tpu.memory_space<vmem>>, vector<1024x256xbf16>
    %c0_26 = arith.constant 0 : index
    %c0_27 = arith.constant 0 : index
    %34 = vector.load %arg11[%c0_26, %c0_27] : memref<1x256xf32, #tpu.memory_space<vmem>>, vector<1x256xf32>
    %35 = arith.truncf %32 : vector<8x1024xf32> to vector<8x1024xbf16>
    %cst_28 = arith.constant dense<0.000000e+00> : vector<8x256xf32>
    %36 = tpu.matmul %35, %33, %cst_28 {dimension_numbers = #tpu.dot_dimension_numbers<[1], [0], [0], [1], [0, 0, 1, 1], [], []>} : vector<8x1024xbf16>, vector<1024x256xbf16>, vector<8x256xf32> -> vector<8x256xf32>
    %37 = vector.broadcast %34 : vector<1x256xf32> to vector<8x256xf32>
    %38 = arith.addf %36, %37 : vector<8x256xf32>
    %cst_29 = arith.constant 0.000000e+00 : f32
    %39 = vector.broadcast %cst_29 : f32 to vector<8x256xf32>
    %40 = arith.maximumf %38, %39 : vector<8x256xf32>
    %c0_30 = arith.constant 0 : index
    %c0_31 = arith.constant 0 : index
    %41 = vector.load %arg12[%c0_30, %c0_31] : memref<256x64xbf16, #tpu.memory_space<vmem>>, vector<256x64xbf16>
    %c0_32 = arith.constant 0 : index
    %c0_33 = arith.constant 0 : index
    %42 = vector.load %arg13[%c0_32, %c0_33] : memref<1x64xf32, #tpu.memory_space<vmem>>, vector<1x64xf32>
    %43 = arith.truncf %40 : vector<8x256xf32> to vector<8x256xbf16>
    %cst_34 = arith.constant dense<0.000000e+00> : vector<8x64xf32>
    %44 = tpu.matmul %43, %41, %cst_34 {dimension_numbers = #tpu.dot_dimension_numbers<[1], [0], [0], [1], [0, 0, 1, 1], [], []>} : vector<8x256xbf16>, vector<256x64xbf16>, vector<8x64xf32> -> vector<8x64xf32>
    %45 = vector.broadcast %42 : vector<1x64xf32> to vector<8x64xf32>
    %46 = arith.addf %44, %45 : vector<8x64xf32>
    %cst_35 = arith.constant 0.000000e+00 : f32
    %47 = vector.broadcast %cst_35 : f32 to vector<8x64xf32>
    %48 = arith.maximumf %46, %47 : vector<8x64xf32>
    %c0_36 = arith.constant 0 : index
    %c0_37 = arith.constant 0 : index
    %49 = vector.load %arg14[%c0_36, %c0_37] : memref<64x16xbf16, #tpu.memory_space<vmem>>, vector<64x16xbf16>
    %c0_38 = arith.constant 0 : index
    %c0_39 = arith.constant 0 : index
    %50 = vector.load %arg15[%c0_38, %c0_39] : memref<1x16xf32, #tpu.memory_space<vmem>>, vector<1x16xf32>
    %51 = arith.truncf %48 : vector<8x64xf32> to vector<8x64xbf16>
    %cst_40 = arith.constant dense<0.000000e+00> : vector<8x16xf32>
    %52 = tpu.matmul %51, %49, %cst_40 {dimension_numbers = #tpu.dot_dimension_numbers<[1], [0], [0], [1], [0, 0, 1, 1], [], []>} : vector<8x64xbf16>, vector<64x16xbf16>, vector<8x16xf32> -> vector<8x16xf32>
    %53 = vector.broadcast %50 : vector<1x16xf32> to vector<8x16xf32>
    %54 = arith.addf %52, %53 : vector<8x16xf32>
    %cst_41 = arith.constant 0.000000e+00 : f32
    %55 = vector.broadcast %cst_41 : f32 to vector<8x16xf32>
    %56 = arith.maximumf %54, %55 : vector<8x16xf32>
    %c0_42 = arith.constant 0 : index
    %c0_43 = arith.constant 0 : index
    %57 = vector.load %arg16[%c0_42, %c0_43] : memref<1x16xf32, #tpu.memory_space<vmem>>, vector<1x16xf32>
    %c0_44 = arith.constant 0 : index
    %c0_45 = arith.constant 0 : index
    %58 = vector.load %arg17[%c0_44, %c0_45] : memref<1x1xf32, #tpu.memory_space<vmem>>, vector<1x1xf32>
    %59 = vector.broadcast %57 : vector<1x16xf32> to vector<8x16xf32>
    %60 = arith.mulf %56, %59 : vector<8x16xf32>
    %cst_46 = arith.constant dense<0.000000e+00> : vector<8xf32>
    %61 = vector.multi_reduction <add>, %60, %cst_46 [1] : vector<8x16xf32> to vector<8xf32>
    %62 = vector.shape_cast %61 : vector<8xf32> to vector<1x8xf32>
    %63 = vector.broadcast %58 : vector<1x1xf32> to vector<1x8xf32>
    %64 = arith.addf %62, %63 : vector<1x8xf32>
    %c0_47 = arith.constant 0 : index
    %c0_48 = arith.constant 0 : index
    %65 = vector.load %arg18[%c0_47, %c0_48] : memref<1x8xf32, #tpu.memory_space<vmem>>, vector<1x8xf32>
    tpu.vector_store %arg18[%c0_47, %c0_48], %64 {strides = array<i32>} : memref<1x8xf32, #tpu.memory_space<vmem>>, vector<1x8xf32>,
    return
  }
  func.func @transform_0(%arg0: i32) -> (i32, i32) {
    %c0_i32 = arith.constant 0 : i32
    %c0_i32_0 = arith.constant 0 : i32
    return %arg0, %c0_i32 : i32, i32
  }
  func.func @transform_1(%arg0: i32) -> (i32, i32) {
    %c0_i32 = arith.constant 0 : i32
    %c0_i32_0 = arith.constant 0 : i32
    %c0_i32_1 = arith.constant 0 : i32
    return %c0_i32, %c0_i32_0 : i32, i32
  }
  func.func @transform_2(%arg0: i32) -> (i32, i32) {
    %c0_i32 = arith.constant 0 : i32
    %c0_i32_0 = arith.constant 0 : i32
    %c0_i32_1 = arith.constant 0 : i32
    return %c0_i32, %c0_i32_0 : i32, i32
  }
  func.func @transform_3(%arg0: i32) -> (i32, i32) {
    %c0_i32 = arith.constant 0 : i32
    %c0_i32_0 = arith.constant 0 : i32
    %c0_i32_1 = arith.constant 0 : i32
    return %c0_i32, %c0_i32_0 : i32, i32
  }
  func.func @transform_4(%arg0: i32) -> (i32, i32) {
    %c0_i32 = arith.constant 0 : i32
    %c0_i32_0 = arith.constant 0 : i32
    %c0_i32_1 = arith.constant 0 : i32
    return %c0_i32, %c0_i32_0 : i32, i32
  }
  func.func @transform_5(%arg0: i32) -> (i32, i32) {
    %c0_i32 = arith.constant 0 : i32
    %c0_i32_0 = arith.constant 0 : i32
    %c0_i32_1 = arith.constant 0 : i32
    return %c0_i32, %c0_i32_0 : i32, i32
  }
  func.func @transform_6(%arg0: i32) -> (i32, i32) {
    %c0_i32 = arith.constant 0 : i32
    %c0_i32_0 = arith.constant 0 : i32
    %c0_i32_1 = arith.constant 0 : i32
    return %c0_i32, %c0_i32_0 : i32, i32
  }
  func.func @transform_7(%arg0: i32) -> (i32, i32) {
    %c0_i32 = arith.constant 0 : i32
    %c0_i32_0 = arith.constant 0 : i32
    %c0_i32_1 = arith.constant 0 : i32
    return %c0_i32, %c0_i32_0 : i32, i32
  }
  func.func @transform_8(%arg0: i32) -> (i32, i32) {
    %c0_i32 = arith.constant 0 : i32
    %c0_i32_0 = arith.constant 0 : i32
    %c0_i32_1 = arith.constant 0 : i32
    return %c0_i32, %c0_i32_0 : i32, i32
  }
  func.func @transform_9(%arg0: i32) -> (i32, i32) {
    %c0_i32 = arith.constant 0 : i32
    %c0_i32_0 = arith.constant 0 : i32
    %c0_i32_1 = arith.constant 0 : i32
    return %c0_i32, %c0_i32_0 : i32, i32
  }
  func.func @transform_10(%arg0: i32) -> (i32, i32) {
    %c0_i32 = arith.constant 0 : i32
    %c0_i32_0 = arith.constant 0 : i32
    %c0_i32_1 = arith.constant 0 : i32
    return %c0_i32, %c0_i32_0 : i32, i32
  }
  func.func @transform_11(%arg0: i32) -> (i32, i32) {
    %c0_i32 = arith.constant 0 : i32
    %c0_i32_0 = arith.constant 0 : i32
    %c0_i32_1 = arith.constant 0 : i32
    return %c0_i32, %c0_i32_0 : i32, i32
  }
  func.func @transform_12(%arg0: i32) -> (i32, i32) {
    %c0_i32 = arith.constant 0 : i32
    %c0_i32_0 = arith.constant 0 : i32
    %c0_i32_1 = arith.constant 0 : i32
    return %c0_i32, %c0_i32_0 : i32, i32
  }
  func.func @transform_13(%arg0: i32) -> (i32, i32) {
    %c0_i32 = arith.constant 0 : i32
    %c0_i32_0 = arith.constant 0 : i32
    %c0_i32_1 = arith.constant 0 : i32
    return %c0_i32, %c0_i32_0 : i32, i32
  }
  func.func @transform_14(%arg0: i32) -> (i32, i32) {
    %c0_i32 = arith.constant 0 : i32
    %c0_i32_0 = arith.constant 0 : i32
    %c0_i32_1 = arith.constant 0 : i32
    return %c0_i32, %c0_i32_0 : i32, i32
  }
  func.func @transform_15(%arg0: i32) -> (i32, i32) {
    %c0_i32 = arith.constant 0 : i32
    %c0_i32_0 = arith.constant 0 : i32
    %c0_i32_1 = arith.constant 0 : i32
    return %c0_i32, %c0_i32_0 : i32, i32
  }
  func.func @transform_16(%arg0: i32) -> (i32, i32) {
    %c0_i32 = arith.constant 0 : i32
    %c0_i32_0 = arith.constant 0 : i32
    %c0_i32_1 = arith.constant 0 : i32
    return %c0_i32, %c0_i32_0 : i32, i32
  }
  func.func @transform_17(%arg0: i32) -> (i32, i32) {
    %c0_i32 = arith.constant 0 : i32
    %c0_i32_0 = arith.constant 0 : i32
    return %c0_i32, %arg0 : i32, i32
  }
}

module attributes {stable_mosaic.version = 11 : i64} {
  func.func @_mlp_kernel(%arg0: i32, %arg1: memref<8x4xf32, #tpu.memory_space<vmem>>, %arg2: memref<4x16xbf16, #tpu.memory_space<vmem>>, %arg3: memref<1x16xf32, #tpu.memory_space<vmem>>, %arg4: memref<16x64xbf16, #tpu.memory_space<vmem>>, %arg5: memref<1x64xf32, #tpu.memory_space<vmem>>, %arg6: memref<64x256xbf16, #tpu.memory_space<vmem>>, %arg7: memref<1x256xf32, #tpu.memory_space<vmem>>, %arg8: memref<256x1024xbf16, #tpu.memory_space<vmem>>, %arg9: memref<1x1024xf32, #tpu.memory_space<vmem>>, %arg10: memref<1024x256xbf16, #tpu.memory_space<vmem>>, %arg11: memref<1x256xf32, #tpu.memory_space<vmem>>, %arg12: memref<256x64xbf16, #tpu.memory_space<vmem>>, %arg13: memref<1x64xf32, #tpu.memory_space<vmem>>, %arg14: memref<64x16xbf16, #tpu.memory_space<vmem>>, %arg15: memref<1x16xf32, #tpu.memory_space<vmem>>, %arg16: memref<1x16xf32, #tpu.memory_space<vmem>>, %arg17: memref<1x1xf32, #tpu.memory_space<vmem>>, %arg18: memref<1x8xf32, #tpu.memory_space<vmem>>) attributes {dimension_semantics = [#tpu.dimension_semantics<parallel>], iteration_bounds = array<i64: 1>, scalar_prefetch = 0 : i64, scratch_operands = 0 : i64, tpu.core_type = #tpu.core_type<tc>, window_params = [{transform_indices = @transform_0, window_bounds = array<i64: 8, 4>}, {pipeline_mode = #tpu.pipeline_mode<synchronous>, transform_indices = @transform_1, window_bounds = array<i64: 4, 16>}, {pipeline_mode = #tpu.pipeline_mode<synchronous>, transform_indices = @transform_2, window_bounds = array<i64: 1, 16>}, {pipeline_mode = #tpu.pipeline_mode<synchronous>, transform_indices = @transform_3, window_bounds = array<i64: 16, 64>}, {pipeline_mode = #tpu.pipeline_mode<synchronous>, transform_indices = @transform_4, window_bounds = array<i64: 1, 64>}, {pipeline_mode = #tpu.pipeline_mode<synchronous>, transform_indices = @transform_5, window_bounds = array<i64: 64, 256>}, {pipeline_mode = #tpu.pipeline_mode<synchronous>, transform_indices = @transform_6, window_bounds = array<i64: 1, 256>}, {pipeline_mode = #tpu.pipeline_mode<synchronous>, transform_indices = @transform_7, window_bounds = array<i64: 256, 1024>}, {pipeline_mode = #tpu.pipeline_mode<synchronous>, transform_indices = @transform_8, window_bounds = array<i64: 1, 1024>}, {pipeline_mode = #tpu.pipeline_mode<synchronous>, transform_indices = @transform_9, window_bounds = array<i64: 1024, 256>}, {pipeline_mode = #tpu.pipeline_mode<synchronous>, transform_indices = @transform_10, window_bounds = array<i64: 1, 256>}, {pipeline_mode = #tpu.pipeline_mode<synchronous>, transform_indices = @transform_11, window_bounds = array<i64: 256, 64>}, {pipeline_mode = #tpu.pipeline_mode<synchronous>, transform_indices = @transform_12, window_bounds = array<i64: 1, 64>}, {pipeline_mode = #tpu.pipeline_mode<synchronous>, transform_indices = @transform_13, window_bounds = array<i64: 64, 16>}, {pipeline_mode = #tpu.pipeline_mode<synchronous>, transform_indices = @transform_14, window_bounds = array<i64: 1, 16>}, {pipeline_mode = #tpu.pipeline_mode<synchronous>, transform_indices = @transform_15, window_bounds = array<i64: 1, 16>}, {pipeline_mode = #tpu.pipeline_mode<synchronous>, transform_indices = @transform_16, window_bounds = array<i64: 1, 1>}, {transform_indices = @transform_17, window_bounds = array<i64: 1, 8>}]} {
    %c0 = arith.constant 0 : index
    %c0_0 = arith.constant 0 : index
    %0 = vector.load %arg1[%c0, %c0_0] : memref<8x4xf32, #tpu.memory_space<vmem>>, vector<8x4xf32>
    %c0_1 = arith.constant 0 : index
    %c0_2 = arith.constant 0 : index
    %1 = vector.load %arg2[%c0_1, %c0_2] : memref<4x16xbf16, #tpu.memory_space<vmem>>, vector<4x16xbf16>
    %c0_3 = arith.constant 0 : index
    %c0_4 = arith.constant 0 : index
    %2 = vector.load %arg3[%c0_3, %c0_4] : memref<1x16xf32, #tpu.memory_space<vmem>>, vector<1x16xf32>
    %3 = arith.truncf %0 : vector<8x4xf32> to vector<8x4xbf16>
    %cst = arith.constant dense<0.000000e+00> : vector<8x16xf32>
    %4 = tpu.matmul %3, %1, %cst {dimension_numbers = #tpu.dot_dimension_numbers<[1], [0], [0], [1], [0, 0, 1, 1], [], []>} : vector<8x4xbf16>, vector<4x16xbf16>, vector<8x16xf32> -> vector<8x16xf32>
    %5 = vector.broadcast %2 : vector<1x16xf32> to vector<8x16xf32>
    %6 = arith.addf %4, %5 : vector<8x16xf32>
    %cst_5 = arith.constant 0.000000e+00 : f32
    %7 = vector.broadcast %cst_5 : f32 to vector<8x16xf32>
    %8 = arith.maximumf %6, %7 : vector<8x16xf32>
    %c0_6 = arith.constant 0 : index
    %c0_7 = arith.constant 0 : index
    %9 = vector.load %arg4[%c0_6, %c0_7] : memref<16x64xbf16, #tpu.memory_space<vmem>>, vector<16x64xbf16>
    %c0_8 = arith.constant 0 : index
    %c0_9 = arith.constant 0 : index
    %10 = vector.load %arg5[%c0_8, %c0_9] : memref<1x64xf32, #tpu.memory_space<vmem>>, vector<1x64xf32>
    %11 = arith.truncf %8 : vector<8x16xf32> to vector<8x16xbf16>
    %cst_10 = arith.constant dense<0.000000e+00> : vector<8x64xf32>
    %12 = tpu.matmul %11, %9, %cst_10 {dimension_numbers = #tpu.dot_dimension_numbers<[1], [0], [0], [1], [0, 0, 1, 1], [], []>} : vector<8x16xbf16>, vector<16x64xbf16>, vector<8x64xf32> -> vector<8x64xf32>
    %13 = vector.broadcast %10 : vector<1x64xf32> to vector<8x64xf32>
    %14 = arith.addf %12, %13 : vector<8x64xf32>
    %cst_11 = arith.constant 0.000000e+00 : f32
    %15 = vector.broadcast %cst_11 : f32 to vector<8x64xf32>
    %16 = arith.maximumf %14, %15 : vector<8x64xf32>
    %c0_12 = arith.constant 0 : index
    %c0_13 = arith.constant 0 : index
    %17 = vector.load %arg6[%c0_12, %c0_13] : memref<64x256xbf16, #tpu.memory_space<vmem>>, vector<64x256xbf16>
    %c0_14 = arith.constant 0 : index
    %c0_15 = arith.constant 0 : index
    %18 = vector.load %arg7[%c0_14, %c0_15] : memref<1x256xf32, #tpu.memory_space<vmem>>, vector<1x256xf32>
    %19 = arith.truncf %16 : vector<8x64xf32> to vector<8x64xbf16>
    %cst_16 = arith.constant dense<0.000000e+00> : vector<8x256xf32>
    %20 = tpu.matmul %19, %17, %cst_16 {dimension_numbers = #tpu.dot_dimension_numbers<[1], [0], [0], [1], [0, 0, 1, 1], [], []>} : vector<8x64xbf16>, vector<64x256xbf16>, vector<8x256xf32> -> vector<8x256xf32>
    %21 = vector.broadcast %18 : vector<1x256xf32> to vector<8x256xf32>
    %22 = arith.addf %20, %21 : vector<8x256xf32>
    %cst_17 = arith.constant 0.000000e+00 : f32
    %23 = vector.broadcast %cst_17 : f32 to vector<8x256xf32>
    %24 = arith.maximumf %22, %23 : vector<8x256xf32>
    %c0_18 = arith.constant 0 : index
    %c0_19 = arith.constant 0 : index
    %25 = vector.load %arg8[%c0_18, %c0_19] : memref<256x1024xbf16, #tpu.memory_space<vmem>>, vector<256x1024xbf16>
    %c0_20 = arith.constant 0 : index
    %c0_21 = arith.constant 0 : index
    %26 = vector.load %arg9[%c0_20, %c0_21] : memref<1x1024xf32, #tpu.memory_space<vmem>>, vector<1x1024xf32>
    %27 = arith.truncf %24 : vector<8x256xf32> to vector<8x256xbf16>
    %cst_22 = arith.constant dense<0.000000e+00> : vector<8x1024xf32>
    %28 = tpu.matmul %27, %25, %cst_22 {dimension_numbers = #tpu.dot_dimension_numbers<[1], [0], [0], [1], [0, 0, 1, 1], [], []>} : vector<8x256xbf16>, vector<256x1024xbf16>, vector<8x1024xf32> -> vector<8x1024xf32>
    %29 = vector.broadcast %26 : vector<1x1024xf32> to vector<8x1024xf32>
    %30 = arith.addf %28, %29 : vector<8x1024xf32>
    %cst_23 = arith.constant 0.000000e+00 : f32
    %31 = vector.broadcast %cst_23 : f32 to vector<8x1024xf32>
    %32 = arith.maximumf %30, %31 : vector<8x1024xf32>
    %c0_24 = arith.constant 0 : index
    %c0_25 = arith.constant 0 : index
    %33 = vector.load %arg10[%c0_24, %c0_25] : memref<1024x256xbf16, #tpu.memory_space<vmem>>, vector<1024x256xbf16>
    %c0_26 = arith.constant 0 : index
    %c0_27 = arith.constant 0 : index
    %34 = vector.load %arg11[%c0_26, %c0_27] : memref<1x256xf32, #tpu.memory_space<vmem>>, vector<1x256xf32>
    %35 = arith.truncf %32 : vector<8x1024xf32> to vector<8x1024xbf16>
    %cst_28 = arith.constant dense<0.000000e+00> : vector<8x256xf32>
    %36 = tpu.matmul %35, %33, %cst_28 {dimension_numbers = #tpu.dot_dimension_numbers<[1], [0], [0], [1], [0, 0, 1, 1], [], []>} : vector<8x1024xbf16>, vector<1024x256xbf16>, vector<8x256xf32> -> vector<8x256xf32>
    %37 = vector.broadcast %34 : vector<1x256xf32> to vector<8x256xf32>
    %38 = arith.addf %36, %37 : vector<8x256xf32>
    %cst_29 = arith.constant 0.000000e+00 : f32
    %39 = vector.broadcast %cst_29 : f32 to vector<8x256xf32>
    %40 = arith.maximumf %38, %39 : vector<8x256xf32>
    %c0_30 = arith.constant 0 : index
    %c0_31 = arith.constant 0 : index
    %41 = vector.load %arg12[%c0_30, %c0_31] : memref<256x64xbf16, #tpu.memory_space<vmem>>, vector<256x64xbf16>
    %c0_32 = arith.constant 0 : index
    %c0_33 = arith.constant 0 : index
    %42 = vector.load %arg13[%c0_32, %c0_33] : memref<1x64xf32, #tpu.memory_space<vmem>>, vector<1x64xf32>
    %43 = arith.truncf %40 : vector<8x256xf32> to vector<8x256xbf16>
    %cst_34 = arith.constant dense<0.000000e+00> : vector<8x64xf32>
    %44 = tpu.matmul %43, %41, %cst_34 {dimension_numbers = #tpu.dot_dimension_numbers<[1], [0], [0], [1], [0, 0, 1, 1], [], []>} : vector<8x256xbf16>, vector<256x64xbf16>, vector<8x64xf32> -> vector<8x64xf32>
    %45 = vector.broadcast %42 : vector<1x64xf32> to vector<8x64xf32>
    %46 = arith.addf %44, %45 : vector<8x64xf32>
    %cst_35 = arith.constant 0.000000e+00 : f32
    %47 = vector.broadcast %cst_35 : f32 to vector<8x64xf32>
    %48 = arith.maximumf %46, %47 : vector<8x64xf32>
    %c0_36 = arith.constant 0 : index
    %c0_37 = arith.constant 0 : index
    %49 = vector.load %arg14[%c0_36, %c0_37] : memref<64x16xbf16, #tpu.memory_space<vmem>>, vector<64x16xbf16>
    %c0_38 = arith.constant 0 : index
    %c0_39 = arith.constant 0 : index
    %50 = vector.load %arg15[%c0_38, %c0_39] : memref<1x16xf32, #tpu.memory_space<vmem>>, vector<1x16xf32>
    %51 = arith.truncf %48 : vector<8x64xf32> to vector<8x64xbf16>
    %cst_40 = arith.constant dense<0.000000e+00> : vector<8x16xf32>
    %52 = tpu.matmul %51, %49, %cst_40 {dimension_numbers = #tpu.dot_dimension_numbers<[1], [0], [0], [1], [0, 0, 1, 1], [], []>} : vector<8x64xbf16>, vector<64x16xbf16>, vector<8x16xf32> -> vector<8x16xf32>
    %53 = vector.broadcast %50 : vector<1x16xf32> to vector<8x16xf32>
    %54 = arith.addf %52, %53 : vector<8x16xf32>
    %cst_41 = arith.constant 0.000000e+00 : f32
    %55 = vector.broadcast %cst_41 : f32 to vector<8x16xf32>
    %56 = arith.maximumf %54, %55 : vector<8x16xf32>
    %c0_42 = arith.constant 0 : index
    %c0_43 = arith.constant 0 : index
    %57 = vector.load %arg16[%c0_42, %c0_43] : memref<1x16xf32, #tpu.memory_space<vmem>>, vector<1x16xf32>
    %c0_44 = arith.constant 0 : index
    %c0_45 = arith.constant 0 : index
    %58 = vector.load %arg17[%c0_44, %c0_45] : memref<1x1xf32, #tpu.memory_space<vmem>>, vector<1x1xf32>
    %59 = vector.broadcast %57 : vector<1x16xf32> to vector<8x16xf32>
    %60 = arith.mulf %56, %59 : vector<8x16xf32>
    %cst_46 = arith.constant dense<0.000000e+00> : vector<8xf32>
    %61 = vector.multi_reduction <add>, %60, %cst_46 [1] : vector<8x16xf32> to vector<8xf32>
    %62 = vector.shape_cast %61 : vector<8xf32> to vector<1x8xf32>
    %63 = vector.broadcast %58 : vector<1x1xf32> to vector<1x8xf32>
    %64 = arith.addf %62, %63 : vector<1x8xf32>
    %c0_47 = arith.constant 0 : index
    %c0_48 = arith.constant 0 : index
    %65 = vector.load %arg18[%c0_47, %c0_48] : memref<1x8xf32, #tpu.memory_space<vmem>>, vector<1x8xf32>
    tpu.vector_store %arg18[%c0_47, %c0_48], %64 {strides = array<i32>} : memref<1x8xf32, #tpu.memory_space<vmem>>, vector<1x8xf32>,
    return
  }
  func.func @transform_0(%arg0: i32) -> (i32, i32) {
    %c0_i32 = arith.constant 0 : i32
    %c0_i32_0 = arith.constant 0 : i32
    return %arg0, %c0_i32 : i32, i32
  }
  func.func @transform_1(%arg0: i32) -> (i32, i32) {
    %c0_i32 = arith.constant 0 : i32
    %c0_i32_0 = arith.constant 0 : i32
    %c0_i32_1 = arith.constant 0 : i32
    return %c0_i32, %c0_i32_0 : i32, i32
  }
  func.func @transform_2(%arg0: i32) -> (i32, i32) {
    %c0_i32 = arith.constant 0 : i32
    %c0_i32_0 = arith.constant 0 : i32
    %c0_i32_1 = arith.constant 0 : i32
    return %c0_i32, %c0_i32_0 : i32, i32
  }
  func.func @transform_3(%arg0: i32) -> (i32, i32) {
    %c0_i32 = arith.constant 0 : i32
    %c0_i32_0 = arith.constant 0 : i32
    %c0_i32_1 = arith.constant 0 : i32
    return %c0_i32, %c0_i32_0 : i32, i32
  }
  func.func @transform_4(%arg0: i32) -> (i32, i32) {
    %c0_i32 = arith.constant 0 : i32
    %c0_i32_0 = arith.constant 0 : i32
    %c0_i32_1 = arith.constant 0 : i32
    return %c0_i32, %c0_i32_0 : i32, i32
  }
  func.func @transform_5(%arg0: i32) -> (i32, i32) {
    %c0_i32 = arith.constant 0 : i32
    %c0_i32_0 = arith.constant 0 : i32
    %c0_i32_1 = arith.constant 0 : i32
    return %c0_i32, %c0_i32_0 : i32, i32
  }
  func.func @transform_6(%arg0: i32) -> (i32, i32) {
    %c0_i32 = arith.constant 0 : i32
    %c0_i32_0 = arith.constant 0 : i32
    %c0_i32_1 = arith.constant 0 : i32
    return %c0_i32, %c0_i32_0 : i32, i32
  }
  func.func @transform_7(%arg0: i32) -> (i32, i32) {
    %c0_i32 = arith.constant 0 : i32
    %c0_i32_0 = arith.constant 0 : i32
    %c0_i32_1 = arith.constant 0 : i32
    return %c0_i32, %c0_i32_0 : i32, i32
  }
  func.func @transform_8(%arg0: i32) -> (i32, i32) {
    %c0_i32 = arith.constant 0 : i32
    %c0_i32_0 = arith.constant 0 : i32
    %c0_i32_1 = arith.constant 0 : i32
    return %c0_i32, %c0_i32_0 : i32, i32
  }
  func.func @transform_9(%arg0: i32) -> (i32, i32) {
    %c0_i32 = arith.constant 0 : i32
    %c0_i32_0 = arith.constant 0 : i32
    %c0_i32_1 = arith.constant 0 : i32
    return %c0_i32, %c0_i32_0 : i32, i32
  }
  func.func @transform_10(%arg0: i32) -> (i32, i32) {
    %c0_i32 = arith.constant 0 : i32
    %c0_i32_0 = arith.constant 0 : i32
    %c0_i32_1 = arith.constant 0 : i32
    return %c0_i32, %c0_i32_0 : i32, i32
  }
  func.func @transform_11(%arg0: i32) -> (i32, i32) {
    %c0_i32 = arith.constant 0 : i32
    %c0_i32_0 = arith.constant 0 : i32
    %c0_i32_1 = arith.constant 0 : i32
    return %c0_i32, %c0_i32_0 : i32, i32
  }
  func.func @transform_12(%arg0: i32) -> (i32, i32) {
    %c0_i32 = arith.constant 0 : i32
    %c0_i32_0 = arith.constant 0 : i32
    %c0_i32_1 = arith.constant 0 : i32
    return %c0_i32, %c0_i32_0 : i32, i32
  }
  func.func @transform_13(%arg0: i32) -> (i32, i32) {
    %c0_i32 = arith.constant 0 : i32
    %c0_i32_0 = arith.constant 0 : i32
    %c0_i32_1 = arith.constant 0 : i32
    return %c0_i32, %c0_i32_0 : i32, i32
  }
  func.func @transform_14(%arg0: i32) -> (i32, i32) {
    %c0_i32 = arith.constant 0 : i32
    %c0_i32_0 = arith.constant 0 : i32
    %c0_i32_1 = arith.constant 0 : i32
    return %c0_i32, %c0_i32_0 : i32, i32
  }
  func.func @transform_15(%arg0: i32) -> (i32, i32) {
    %c0_i32 = arith.constant 0 : i32
    %c0_i32_0 = arith.constant 0 : i32
    %c0_i32_1 = arith.constant 0 : i32
    return %c0_i32, %c0_i32_0 : i32, i32
  }
  func.func @transform_16(%arg0: i32) -> (i32, i32) {
    %c0_i32 = arith.constant 0 : i32
    %c0_i32_0 = arith.constant 0 : i32
    %c0_i32_1 = arith.constant 0 : i32
    return %c0_i32, %c0_i32_0 : i32, i32
  }
  func.func @transform_17(%arg0: i32) -> (i32, i32) {
    %c0_i32 = arith.constant 0 : i32
    %c0_i32_0 = arith.constant 0 : i32
    return %c0_i32, %arg0 : i32, i32
  }
}

</mosaic_0001>

<bundles_post_ra>
// kernel: _forward.1
= control target key start
LH: loop header
LB: loop body
LE: loop exit
PB: predicated region body
PF: predicated region fallthrough
CT: control target
= control target key end

     0   :  { %s3573_s0 = inlined_call_operand.vmem [shape: f32[8,4], index: 0, kind: input, shape index: {}]   ;;  %s3574_s1 = inlined_call_operand.vmem [shape: bf16[4,16], index: 1, kind: input, shape index: {}]   ;;  %s3575_s2 = inlined_call_operand.vmem [shape: f32[1,16], index: 2, kind: input, shape index: {}]   ;;  %s3576_s3 = inlined_call_operand.vmem [shape: bf16[16,64], index: 3, kind: input, shape index: {}]   ;;  %s3577_s4 = inlined_call_operand.vmem [shape: f32[1,64], index: 4, kind: input, shape index: {}]   ;;  %s3578_s5 = inlined_call_operand.vmem [shape: bf16[64,256], index: 5, kind: input, shape index: {}]   ;;  %s3579_s6 = inlined_call_operand.vmem [shape: f32[1,256], index: 6, kind: input, shape index: {}]   ;;  %s3580_s7 = inlined_call_operand.hbm [shape: bf16[256,1024], index: 7, kind: input, shape index: {}]   ;;  %s3581_s8 = inlined_call_operand.vmem [shape: f32[1,1024], index: 8, kind: input, shape index: {}]   ;;  %s3582_s9 = inlined_call_operand.hbm [shape: bf16[1024,256], index: 9, kind: input, shape index: {}]   ;;  %s3583_s10 = inlined_call_operand.vmem [shape: f32[1,256], index: 10, kind: input, shape index: {}]   ;;  %s3584_s11 = inlined_call_operand.vmem [shape: bf16[256,64], index: 11, kind: input, shape index: {}]   ;;  %s3585_s12 = inlined_call_operand.vmem [shape: f32[1,64], index: 12, kind: input, shape index: {}]   ;;  %s3586_s13 = inlined_call_operand.vmem [shape: bf16[64,16], index: 13, kind: input, shape index: {}]   ;;  %s3587_s14 = inlined_call_operand.vmem [shape: f32[1,16], index: 14, kind: input, shape index: {}]   ;;  %s3588_s15 = inlined_call_operand.vmem [shape: f32[1,16], index: 15, kind: input, shape index: {}]   ;;  %s3589_s16 = inlined_call_operand.<no memory space> [shape: f32[1,1], index: 16, kind: input, shape index: {}]   ;;  %s3590_s17 = inlined_call_operand.hbm [shape: f32[1,8], index: 17, kind: output, shape index: {}]  }
   0x1   :  { %3591 = sst [smem:[#allocation12_spill]] %s3573_s0  ;;  %v22_v0 = vstv %s3589_s16 }
   0x2   :  { %3592 = sst [smem:[#allocation13_spill]] %s3574_s1  ;;  %23 = vst [vmem:[#allocation2] sm:$0x1] %v22_v0 }
   0x3   :  { %24 = vsyncpa [#allocation4], 0 }
   0x4   :  { %25 = vsyncpa [#allocation7], 0 }
   0x5   :  { %26 = vsyncpa [#allocation5], 0  ;;  %s3235_s26 = smov [#allocation3]   ;;  %s3163_s0 = scalar_lea.hbm %s3580_s7, 16384 }
   0x6   :  { %s46_s27 = sshll.u32 %s3235_s26, 4  ;;  %p3164_p0 = scmp.ne.s32.totalorder %s3580_s7, %s3163_s0  ;;  %s47_s27 = int_to_ptr.vmem [resolvable:$true] %s46_s27 }
   0x7   :  { %p3167_p1 = scmp.lt.u32.totalorder %s3163_s0, %s3580_s7 }
   0x9   :  { %p3169_p2 = pnand %p3167_p1, %p3164_p0 }
   0xb   :  { %3172 = shalt.err (!%p3169_p2)
}
   0xc   :  { %s3173_s16 = scalar_lea.vmem %s47_s27, 16384  ;;  %p3178_p4 = scmp.lt.s32.totalorder %s47_s27, %s47_s27 }
   0xd   :  { %p3174_p3 = scmp.ne.s32.totalorder %s47_s27, %s3173_s16  ;;  %p3179_p5 = scmp.lt.s32.totalorder %s3173_s16, %s3173_s16 }
   0xf   :  { %p3180_p6 = por %p3179_p5, %p3178_p4 }
  0x11   :  { %p3181_p7 = pnand %p3180_p6, %p3174_p3 }
  0x13   :  { %3184 = shalt.err (!%p3181_p7)
}
  0x14   :  { %s3236_s20 = smov 512   ;;  %s3237_s21 = smov 32  }
  0x15   :  { %52 = dma.hbm_to_vmem [thread:$0]  %s3580_s7, 16384, %s47_s27, [#allocation4], %s3236_s20, %s3236_s20, %s3237_s21  }
  0x16   :  { %s3238_s24 = smov [#allocation6]   ;;  %s3185_s29 = scalar_lea.hbm %s3582_s9, 16384 }
  0x17   :  { %s60_s25 = sshll.u32 %s3238_s24, 4  ;;  %p3186_p8 = scmp.ne.s32.totalorder %s3582_s9, %s3185_s29  ;;  %s61_s25 = int_to_ptr.vmem [resolvable:$true] %s60_s25 }
  0x18   :  { %p3189_p9 = scmp.lt.u32.totalorder %s3185_s29, %s3582_s9 }
  0x1a   :  { %p3191_p10 = pnand %p3189_p9, %p3186_p8 }
  0x1c   :  { %3194 = shalt.err (!%p3191_p10)
}
  0x1d   :  { %s3195_s1 = scalar_lea.vmem %s61_s25, 16384  ;;  %p3200_p12 = scmp.lt.s32.totalorder %s61_s25, %s61_s25 }
  0x1e   :  { %p3196_p11 = scmp.ne.s32.totalorder %s61_s25, %s3195_s1  ;;  %p3201_p13 = scmp.lt.s32.totalorder %s3195_s1, %s3195_s1 }
  0x20   :  { %p3202_p0 = por %p3201_p13, %p3200_p12 }
  0x22   :  { %p3203_p1 = pnand %p3202_p0, %p3196_p11 }
  0x24   :  { %3206 = shalt.err (!%p3203_p1)
}
  0x25   :  { %s3239_s7 = smov 128   ;;  %s3240_s27 = smov 8  }
  0x26   :  { %66 = dma.hbm_to_vmem [thread:$0]  %s3582_s9, 16384, %s61_s25, [#allocation7], %s3239_s7, %s3239_s7, %s3240_s27  }
  0x27   :  { %3229 = dma.done.wait [#allocation4], 16384  }
  0x28   :  { %3230 = vsyncadd [#allocation4], 4294950912 }
  0x29   :  { %3231 = dma.done.wait [#allocation7], 16384  }
  0x2a   :  { %3232 = vsyncadd [#allocation7], 4294950912  ;;  %v3241_v1 = vmov 0.0   ;;  %vm3242_vm0 = vmmov 0   ;;  %vm102_vm1 = vcmask 1041408   ;;  %s3593_s23 = sld [smem:[#allocation13_spill]] }
  0x2b   :  { %2889 = vmatprep.subr.bf16.mxu0 %v3241_v1  ;;  %2891 = vmatprep.mubr.msk.bf16.mxu0 %vm3242_vm0, %v3241_v1  ;;  %s3594_s28 = sld [smem:[#allocation12_spill]]  ;;  %v2938_v6 = vld [vmem:[%s3576_s3] sm:$0xff]   ;;  %vm98_vm2 = vcmask 31744   ;;  %vm163_vm3 = vcmask 130048   ;;  %v2944_v17 = vld [vmem:[%s3578_s5 + $0x14] ss:$8 sps:$4 sm:$0xff]  }
  0x2c   :  { %v2941_v7 = vld [vmem:[%s3578_s5 + $0x4] ss:$8 sps:$4 sm:$0xff]   ;;  %v2564_v8 = vld [vmem:[%s3575_s2] ss:$0 sm:$0xff]  ;;  %v2942_v18 = vld [vmem:[%s3578_s5 + $0x10] ss:$8 sps:$4 sm:$0xff]  }
  0x2d   :  { %v2939_v15 = vld [vmem:[%s3578_s5] ss:$8 sps:$4 sm:$0xff]   ;;  %v2947_v19 = vld [vmem:[%s3578_s5 + $0x24] ss:$8 sps:$4 sm:$0xff]   ;;  %v2950_v21 = vld [vmem:[%s3578_s5 + $0x34] ss:$8 sps:$4 sm:$0xff]  }
  0x2e   :  { %v2945_v20 = vld [vmem:[%s3578_s5 + $0x20] ss:$8 sps:$4 sm:$0xff]   ;;  %v2948_v22 = vld [vmem:[%s3578_s5 + $0x30] ss:$8 sps:$4 sm:$0xff]   ;;  %v3243_v23 = vmov 0   ;;  %vm269_vm4 = vcmask 523264  }
  0x2f   :  { %2937 = vset.pattern.permute.xlu0 %v3243_v23  ;;  %v3405_v24 = vld [vmem:[#allocation3] sm:$0xff]  ;;  %v318_v28 = vld [vmem:[#allocation3 + $0x10] sm:$0xff]  ;;  %vm2546_vm5 = vcmask 57344  }
  0x30   :  { %v89_v2 = vld [vmem:[%s3593_s23] sm:$0x3]  ;;  %v322_v29 = vld [vmem:[#allocation3 + $0x30] sm:$0xff] }
  0x31   :  { %v88_v3 = vld [vmem:[%s3594_s28] sm:$0xff]  ;;  %v104_v4 = vsel %vm102_vm1, %v89_v2, 0  ;;  %v2583_v30 = vcombine.high %v318_v28, %v322_v29  ;;  %v2582_v31 = vcombine.low %v318_v28, %v322_v29  ;;  %v326_v32 = vld [vmem:[#allocation3 + $0x50] sm:$0xff] }
  0x32   :  { %v91_v5 = vpack.c.bf16 %v88_v3, %v88_v3  ;;  %2890 = vmatpush3.bf16.msra.mxu0 %v104_v4  ;;  %v3407_v25 = vld [vmem:[#allocation3 + $0x20] sm:$0xff]  ;;  %v330_v33 = vld [vmem:[#allocation3 + $0x70] sm:$0xff] }
  0x33   :  { %2895 = vmatprep.subr.bf16.mxu0 %v3241_v1  ;;  %v2578_v26 = vcombine.low %v3405_v24, %v3407_v25  ;;  %v2579_v27 = vcombine.high %v3405_v24, %v3407_v25  ;;  %1210 = vmatprep.subr.bf16.mxu1 %v2583_v30  ;;  %v2591_v34 = vcombine.high %v326_v32, %v330_v33  ;;  %v334_v36 = vld [vmem:[#allocation3 + $0x90] sm:$0xff]  ;;  %v324_v29 = vld [vmem:[#allocation3 + $0x40] sm:$0xff] }
  0x34   :  { %1211 = vmatpush1.bf16.msra.mxu1 %v2582_v31  ;;  %v2590_v35 = vcombine.low %v326_v32, %v330_v33  ;;  %v338_v37 = vld [vmem:[#allocation3 + $0xb0] sm:$0xff]  ;;  %v328_v30 = vld [vmem:[#allocation3 + $0x60] sm:$0xff] }
  0x35   :  { %2892 = vmatmul.mubr.msk.bf16.vlgmr.msra.gmra.mrb[0].mxu0 %vm98_vm2, %v91_v5  ;;  %1212 = vmatprep.subr.bf16.mxu1 %v2591_v34  ;;  %v2599_v38 = vcombine.high %v334_v36, %v338_v37  ;;  %v2598_v39 = vcombine.low %v334_v36, %v338_v37  ;;  %v342_v40 = vld [vmem:[#allocation3 + $0xd0] sm:$0xff]  ;;  %v2587_v34 = vcombine.high %v324_v29, %v328_v30  ;;  %v336_v36 = vld [vmem:[#allocation3 + $0xa0] sm:$0xff] }
  0x36   :  { %2896 = vmatpush3.bf16.msra.mxu0 %v2938_v6  ;;  %2897 = vmatprep.mubr.msk.bf16.mxu0 %vm3242_vm0, %v3241_v1  ;;  %v346_v41 = vld [vmem:[#allocation3 + $0xf0] sm:$0xff]  ;;  %v2586_v37 = vcombine.low %v324_v29, %v328_v30  ;;  %v436_v29 = vld [vmem:[#allocation3 + $0x3c0] sm:$0xff] }
  0x37   :  { %273 = vmatprep.subr.bf16.mxu0 %v2941_v7  ;;  %v2607_v42 = vcombine.high %v342_v40, %v346_v41  ;;  %v2606_v43 = vcombine.low %v342_v40, %v346_v41  ;;  %v350_v44 = vld [vmem:[#allocation3 + $0x110] sm:$0xff]  ;;  %v344_v40 = vld [vmem:[#allocation3 + $0xe0] sm:$0xff] }
  0x38   :  { %1213 = vmatpush1.bf16.msra.mxu1 %v2590_v35  ;;  %v354_v45 = vld [vmem:[#allocation3 + $0x130] sm:$0xff]  ;;  %v332_v35 = vld [vmem:[#allocation3 + $0x80] sm:$0xff] }
  0x39   :  { %1214 = vmatprep.subr.bf16.mxu1 %v2599_v38  ;;  %v2615_v46 = vcombine.high %v350_v44, %v354_v45  ;;  %v2614_v47 = vcombine.low %v350_v44, %v354_v45  ;;  %v358_v48 = vld [vmem:[#allocation3 + $0x150] sm:$0xff]  ;;  %v2595_v38 = vcombine.high %v332_v35, %v336_v36  ;;  %v2594_v41 = vcombine.low %v332_v35, %v336_v36  ;;  %v352_v44 = vld [vmem:[#allocation3 + $0x120] sm:$0xff] }
  0x3a   :  { %v362_v49 = vld [vmem:[#allocation3 + $0x170] sm:$0xff]  ;;  %v440_v30 = vld [vmem:[#allocation3 + $0x3e0] sm:$0xff] }
  0x3b   :  { %v2623_v50 = vcombine.high %v358_v48, %v362_v49  ;;  %v2622_v51 = vcombine.low %v358_v48, %v362_v49  ;;  %v366_v52 = vld [vmem:[#allocation3 + $0x190] sm:$0xff]  ;;  %v360_v48 = vld [vmem:[#allocation3 + $0x160] sm:$0xff] }
  0x3c   :  { %1215 = vmatpush1.bf16.msra.mxu1 %v2598_v39  ;;  %v370_v53 = vld [vmem:[#allocation3 + $0x1b0] sm:$0xff]  ;;  %v340_v39 = vld [vmem:[#allocation3 + $0xc0] sm:$0xff] }
  0x3d   :  { %1216 = vmatprep.subr.bf16.mxu1 %v2607_v42  ;;  %v2631_v54 = vcombine.high %v366_v52, %v370_v53  ;;  %v2630_v55 = vcombine.low %v366_v52, %v370_v53  ;;  %v374_v56 = vld [vmem:[#allocation3 + $0x1d0] sm:$0xff]  ;;  %v2603_v42 = vcombine.high %v340_v39, %v344_v40  ;;  %v2602_v45 = vcombine.low %v340_v39, %v344_v40  ;;  %v368_v49 = vld [vmem:[#allocation3 + $0x1a0] sm:$0xff] }
  0x3e   :  { %v378_v57 = vld [vmem:[#allocation3 + $0x1f0] sm:$0xff]  ;;  %v372_v52 = vld [vmem:[#allocation3 + $0x1c0] sm:$0xff] }
  0x3f   :  { %v2639_v58 = vcombine.high %v374_v56, %v378_v57  ;;  %v2638_v59 = vcombine.low %v374_v56, %v378_v57  ;;  %v382_v60 = vld [vmem:[#allocation3 + $0x210] sm:$0xff]  ;;  %v376_v53 = vld [vmem:[#allocation3 + $0x1e0] sm:$0xff] }
  0x40   :  { %1217 = vmatpush1.bf16.msra.mxu1 %v2606_v43  ;;  %v386_v61 = vld [vmem:[#allocation3 + $0x230] sm:$0xff]  ;;  %v348_v43 = vld [vmem:[#allocation3 + $0x100] sm:$0xff] }
  0x41   :  { %1218 = vmatprep.subr.bf16.mxu1 %v2615_v46  ;;  %v2647_v62 = vcombine.high %v382_v60, %v386_v61  ;;  %v2646_v63 = vcombine.low %v382_v60, %v386_v61  ;;  %v390_v0 = vld [vmem:[#allocation3 + $0x250] sm:$0xff]  ;;  %v2611_v46 = vcombine.high %v348_v43, %v352_v44  ;;  %v2610_v24 = vcombine.low %v348_v43, %v352_v44  ;;  %v380_v56 = vld [vmem:[#allocation3 + $0x200] sm:$0xff] }
  0x42   :  { %v394_v2 = vld [vmem:[#allocation3 + $0x270] sm:$0xff]  ;;  %v384_v57 = vld [vmem:[#allocation3 + $0x220] sm:$0xff] }
  0x43   :  { %v2655_v3 = vcombine.high %v390_v0, %v394_v2  ;;  %v2654_v4 = vcombine.low %v390_v0, %v394_v2  ;;  %v398_v5 = vld [vmem:[#allocation3 + $0x290] sm:$0xff]  ;;  %v388_v60 = vld [vmem:[#allocation3 + $0x240] sm:$0xff] }
  0x44   :  { %1219 = vmatpush1.bf16.msra.mxu1 %v2614_v47  ;;  %v402_v6 = vld [vmem:[#allocation3 + $0x2b0] sm:$0xff]  ;;  %v356_v47 = vld [vmem:[#allocation3 + $0x140] sm:$0xff] }
  0x45   :  { %1220 = vmatprep.subr.bf16.mxu1 %v2623_v50  ;;  %v2663_v7 = vcombine.high %v398_v5, %v402_v6  ;;  %v2619_v25 = vcombine.high %v356_v47, %v360_v48  ;;  %v2618_v50 = vcombine.low %v356_v47, %v360_v48  ;;  %v392_v61 = vld [vmem:[#allocation3 + $0x260] sm:$0xff] }
  0x46   :  { %v396_v0 = vld [vmem:[#allocation3 + $0x280] sm:$0xff] }
  0x47   :  { %v400_v2 = vld [vmem:[#allocation3 + $0x2a0] sm:$0xff] }
  0x48   :  { %1221 = vmatpush1.bf16.msra.mxu1 %v2622_v51  ;;  %v216_v44 = vld [vmem:[%s3579_s6] sm:$0x3] }
  0x49   :  { %1222 = vmatprep.subr.bf16.mxu1 %v2631_v54 }
  0x4c   :  { %1223 = vmatpush1.bf16.msra.mxu1 %v2630_v55  ;;  %v2635_v55 = vcombine.high %v372_v52, %v376_v53 }
  0x4d   :  { %1224 = vmatprep.subr.bf16.mxu1 %v2639_v58  ;;  %v2634_v58 = vcombine.low %v372_v52, %v376_v53  ;;  %v325_v53 = vld [vmem:[#allocation3 + $0x48] sm:$0xff] }
  0x50   :  { %1225 = vmatpush1.bf16.msra.mxu1 %v2638_v59  ;;  %v2643_v59 = vcombine.high %v380_v56, %v384_v57 }
  0x51   :  { %1226 = vmatprep.subr.bf16.mxu1 %v2647_v62  ;;  %v2642_v62 = vcombine.low %v380_v56, %v384_v57 }
  0x54   :  { %1227 = vmatpush1.bf16.msra.mxu1 %v2646_v63  ;;  %v2651_v63 = vcombine.high %v388_v60, %v392_v61 }
  0x55   :  { %1228 = vmatprep.subr.bf16.mxu1 %v2655_v3  ;;  %v2650_v3 = vcombine.low %v388_v60, %v392_v61  ;;  %v2951_v60 = vld [vmem:[#allocation6] ss:$8 sps:$4 sm:$0xff]   ;;  %v2953_v61 = vld [vmem:[#allocation6 + $0x4] ss:$8 sps:$4 sm:$0xff]  }
  0x58   :  { %1229 = vmatpush1.bf16.msra.mxu1 %v2654_v4  ;;  %v2659_v4 = vcombine.high %v396_v0, %v400_v2 }
  0x59   :  { %1230 = vmatprep.subr.bf16.mxu1 %v2663_v7  ;;  %v2658_v7 = vcombine.low %v396_v0, %v400_v2  ;;  %v341_v2 = vld [vmem:[#allocation3 + $0xc8] sm:$0xff] }
 0x108   :  { %v140_v9 = vpop.f32.mrb[0].mxu0 }
 0x109   :  { %v141_v10 = vadd.f32 %v2564_v8, %v140_v9  ;;  %v2893_v11 = vpop.f32.mrb[1].mxu0  ;;  %v2662_v8 = vcombine.low %v398_v5, %v402_v6  ;;  %v406_v9 = vld [vmem:[#allocation3 + $0x2d0] sm:$0xff]  ;;  %v404_v5 = vld [vmem:[#allocation3 + $0x2c0] sm:$0xff] }
 0x10a   :  { %v143_v12 = vpop.f32.mrb[2].mxu0  ;;  %v408_v6 = vld [vmem:[#allocation3 + $0x2e0] sm:$0xff] }
 0x10b   :  { %v146_v13 = vmax.f32 %v141_v10, 0.0  ;;  %v2894_v14 = vpop.f32.mrb[3].mxu0  ;;  %1231 = vmatpush1.bf16.msra.mxu1 %v2662_v8  ;;  %v410_v10 = vld [vmem:[#allocation3 + $0x2f0] sm:$0xff]  ;;  %v2667_v8 = vcombine.high %v404_v5, %v408_v6 }
 0x10c   :  { %v2671_v11 = vcombine.high %v406_v9, %v410_v10  ;;  %v2670_v12 = vcombine.low %v406_v9, %v410_v10  ;;  %v418_v14 = vld [vmem:[#allocation3 + $0x330] sm:$0xff]  ;;  %v412_v9 = vld [vmem:[#allocation3 + $0x300] sm:$0xff] }
 0x10d   :  { %v150_v16 = vpack.c.bf16 %v146_v13, %v146_v13  ;;  %v414_v13 = vld [vmem:[#allocation3 + $0x310] sm:$0xff]  ;;  %v416_v10 = vld [vmem:[#allocation3 + $0x320] sm:$0xff] }
 0x10e   :  { %1232 = vmatprep.subr.bf16.mxu1 %v2671_v11  ;;  %v2666_v11 = vcombine.low %v404_v5, %v408_v6  ;;  %v2959_v5 = vld [vmem:[#allocation6 + $0x24] ss:$8 sps:$4 sm:$0xff]  }
 0x10f   :  { %2898 = vmatmul.mubr.msk.bf16.vlgmr.msra.gmra.mrb[4].mxu0 %vm163_vm3, %v150_v16  ;;  %1233 = vmatpush1.bf16.msra.mxu1 %v2670_v12  ;;  %v2678_v16 = vcombine.low %v414_v13, %v418_v14  ;;  %v2675_v12 = vcombine.high %v412_v9, %v416_v10 }
 0x110   :  { %274 = vmatpush1.bf16.msra.mxu0 %v2939_v15  ;;  %305 = vmatprep.mubr.bf16.mxu0 %v3243_v23  ;;  %v2679_v15 = vcombine.high %v414_v13, %v418_v14  ;;  %v420_v13 = vld [vmem:[#allocation3 + $0x340] sm:$0xff] }
 0x111   :  { %275 = vmatprep.subr.bf16.mxu0 %v2944_v17  ;;  %v422_v17 = vld [vmem:[#allocation3 + $0x350] sm:$0xff]  ;;  %v424_v14 = vld [vmem:[#allocation3 + $0x360] sm:$0xff] }
 0x112   :  { %1234 = vmatprep.subr.bf16.mxu1 %v2679_v15  ;;  %v2674_v15 = vcombine.low %v412_v9, %v416_v10  ;;  %v353_v9 = vld [vmem:[#allocation3 + $0x128] sm:$0xff] }
 0x113   :  { %1235 = vmatpush1.bf16.msra.mxu1 %v2678_v16  ;;  %v2683_v16 = vcombine.high %v420_v13, %v424_v14  ;;  %v2957_v10 = vld [vmem:[#allocation6 + $0x20] ss:$8 sps:$4 sm:$0xff]  }
 0x114   :  { %276 = vmatpush1.bf16.msra.mxu0 %v2942_v18  ;;  %v426_v18 = vld [vmem:[#allocation3 + $0x370] sm:$0xff] }
 0x115   :  { %277 = vmatprep.subr.bf16.mxu0 %v2947_v19  ;;  %v2687_v19 = vcombine.high %v422_v17, %v426_v18 }
 0x117   :  { %1236 = vmatprep.subr.bf16.mxu1 %v2687_v19  ;;  %v432_v19 = vld [vmem:[#allocation3 + $0x3a0] sm:$0xff] }
 0x118   :  { %278 = vmatpush1.bf16.msra.mxu0 %v2945_v20  ;;  %v2686_v20 = vcombine.low %v422_v17, %v426_v18  ;;  %v2682_v17 = vcombine.low %v420_v13, %v424_v14  ;;  %v428_v18 = vld [vmem:[#allocation3 + $0x380] sm:$0xff]  ;;  %v357_v14 = vld [vmem:[#allocation3 + $0x148] sm:$0xff] }
 0x119   :  { %279 = vmatprep.subr.bf16.mxu0 %v2950_v21  ;;  %v2566_v21 = vld [vmem:[%s3577_s4] ss:$0 sm:$0xff] }
 0x11a   :  { %1237 = vmatpush1.bf16.msra.mxu1 %v2686_v20  ;;  %v2691_v20 = vcombine.high %v428_v18, %v432_v19 }
 0x11c   :  { %280 = vmatpush1.bf16.msra.mxu0 %v2948_v22 }
 0x11d   :  { %1128 = vmatprep.subr.bf16.mxu0 %v2579_v27 }
 0x1e2   :  { %v201_v22 = vpop.f32.mrb[4].mxu0 }
 0x1e3   :  { %v202_v23 = vadd.f32 %v2566_v21, %v201_v22  ;;  %v2899_v27 = vpop.f32.mrb[5].mxu0  ;;  %v430_v21 = vld [vmem:[#allocation3 + $0x390] sm:$0xff] }
 0x1e4   :  { %v204_v28 = vpop.f32.mrb[6].mxu0  ;;  %v434_v22 = vld [vmem:[#allocation3 + $0x3b0] sm:$0xff] }
 0x1e5   :  { %v207_v31 = vmax.f32 %v202_v23, 0.0  ;;  %v2900_v32 = vpop.f32.mrb[7].mxu0  ;;  %v2690_v23 = vcombine.low %v428_v18, %v432_v19  ;;  %v2695_v27 = vcombine.high %v430_v21, %v434_v22  ;;  %v2694_v28 = vcombine.low %v430_v21, %v434_v22  ;;  %v369_v21 = vld [vmem:[#allocation3 + $0x1a8] sm:$0xff] }
 0x1e6   :  { %v438_v32 = vld [vmem:[#allocation3 + $0x3d0] sm:$0xff]  ;;  %v2963_v22 = vld [vmem:[#allocation6 + $0x40] ss:$8 sps:$4 sm:$0xff]  }
 0x1e7   :  { %v217_v33 = vpack.c.bf16 %v207_v31, %v207_v31  ;;  %1238 = vmatprep.subr.bf16.mxu1 %v2695_v27  ;;  %v2699_v31 = vcombine.high %v436_v29, %v440_v30 }
 0x1e8   :  { %1239 = vmatpush1.bf16.msra.mxu1 %v2694_v28 }
 0x1e9   :  { %2577 = vmatmul.mubr.msk.bf16.vlgmr.msra.gmra.mrb[8].mxu0 %vm269_vm4, %v217_v33  ;;  %v442_v33 = vld [vmem:[#allocation3 + $0x3f0] sm:$0xff] }
 0x1ea   :  { %1129 = vmatpush1.bf16.msra.mxu0 %v2578_v26  ;;  %v364_v26 = vld [vmem:[#allocation3 + $0x180] sm:$0xff]  ;;  %v2703_v35 = vcombine.high %v438_v32, %v442_v33  ;;  %v2702_v36 = vcombine.low %v438_v32, %v442_v33 }
 0x1eb   :  { %1130 = vmatprep.subr.bf16.mxu0 %v2587_v34  ;;  %v2627_v51 = vcombine.high %v364_v26, %v368_v49  ;;  %v2626_v54 = vcombine.low %v364_v26, %v368_v49  ;;  %v2698_v34 = vcombine.low %v436_v29, %v440_v30  ;;  %v373_v29 = vld [vmem:[#allocation3 + $0x1c8] sm:$0xff] }
 0x1ec   :  { %1240 = vmatprep.subr.bf16.mxu1 %v2703_v35  ;;  %v377_v30 = vld [vmem:[#allocation3 + $0x1e8] sm:$0xff] }
 0x1ed   :  { %1241 = vmatpush1.bf16.msra.mxu1 %v2702_v36  ;;  %v2971_v32 = vld [vmem:[#allocation6 + $0x64] ss:$8 sps:$4 sm:$0xff]  }
 0x1ee   :  { %1131 = vmatpush1.bf16.msra.mxu0 %v2586_v37  ;;  %v317_v37 = vld [vmem:[#allocation3 + $0x8] sm:$0xff]  ;;  %2088 = vmatprep.subr.bf16.mxu1 %v2953_v61 }
 0x1ef   :  { %1132 = vmatprep.subr.bf16.mxu0 %v2595_v38  ;;  %v321_v38 = vld [vmem:[#allocation3 + $0x28] sm:$0xff] }
 0x1f0   :  { %v2581_v39 = vcombine.high %v317_v37, %v321_v38  ;;  %v2580_v40 = vcombine.low %v317_v37, %v321_v38  ;;  %v381_v35 = vld [vmem:[#allocation3 + $0x208] sm:$0xff]  ;;  %v2974_v38 = vld [vmem:[#allocation6 + $0x74] ss:$8 sps:$4 sm:$0xff]  }
 0x1f1   :  { %v385_v36 = vld [vmem:[#allocation3 + $0x228] sm:$0xff] }
 0x1f2   :  { %1133 = vmatpush1.bf16.msra.mxu0 %v2594_v41  ;;  %v219_v41 = vlaneseq  ;;  %v2969_v37 = vld [vmem:[#allocation6 + $0x60] ss:$8 sps:$4 sm:$0xff]  }
 0x1f3   :  { %1134 = vmatprep.subr.bf16.mxu0 %v2603_v42 }
 0x1f4   :  { %v3421_v42 = vshrl.u32 %v219_v41, 7 }
 0x1f6   :  { %1135 = vmatpush1.bf16.msra.mxu0 %v2602_v45  ;;  %v3424_v43 = vsub.s32 0, %v3421_v42  ;;  %v3430_v45 = vsub.s32 1, %v3421_v42 }
 0x1f7   :  { %1136 = vmatprep.subr.bf16.mxu0 %v2611_v46 }
 0x1f8   :  { %v222_v46 = vrot.slane %v216_v44, %v3424_v43  ;;  %v226_v47 = vrot.slane %v216_v44, %v3430_v45  ;;  %v389_v44 = vld [vmem:[#allocation3 + $0x248] sm:$0xff] }
 0x1fa   :  { %1137 = vmatpush1.bf16.msra.mxu0 %v2610_v24 }
 0x1fb   :  { %1138 = vmatprep.subr.bf16.mxu0 %v2619_v25 }
 0x1fe   :  { %1139 = vmatpush1.bf16.msra.mxu0 %v2618_v50 }
 0x1ff   :  { %1140 = vmatprep.subr.bf16.mxu0 %v2627_v51 }
 0x202   :  { %1141 = vmatpush1.bf16.msra.mxu0 %v2626_v54  ;;  %v329_v54 = vld [vmem:[#allocation3 + $0x68] sm:$0xff] }
 0x203   :  { %1142 = vmatprep.subr.bf16.mxu0 %v2635_v55  ;;  %v2589_v57 = vcombine.high %v325_v53, %v329_v54 }
 0x206   :  { %1143 = vmatpush1.bf16.msra.mxu0 %v2634_v58  ;;  %v333_v58 = vld [vmem:[#allocation3 + $0x88] sm:$0xff] }
 0x207   :  { %1144 = vmatprep.subr.bf16.mxu0 %v2643_v59  ;;  %v337_v59 = vld [vmem:[#allocation3 + $0xa8] sm:$0xff] }
 0x208   :  { %v2597_v0 = vcombine.high %v333_v58, %v337_v59  ;;  %v2596_v6 = vcombine.low %v333_v58, %v337_v59  ;;  %v2978_v58 = vld [vmem:[#allocation6 + $0x90] ss:$8 sps:$4 sm:$0xff]   ;;  %v2983_v59 = vld [vmem:[#allocation6 + $0xa4] ss:$8 sps:$4 sm:$0xff]  }
 0x20a   :  { %1145 = vmatpush1.bf16.msra.mxu0 %v2642_v62  ;;  %v2588_v62 = vcombine.low %v325_v53, %v329_v54  ;;  %v405_v54 = vld [vmem:[#allocation3 + $0x2c8] sm:$0xff] }
 0x20b   :  { %1146 = vmatprep.subr.bf16.mxu0 %v2651_v63  ;;  %v2956_v63 = vld [vmem:[#allocation6 + $0x14] ss:$8 sps:$4 sm:$0xff]  }
 0x20e   :  { %1147 = vmatpush1.bf16.msra.mxu0 %v2650_v3  ;;  %v345_v3 = vld [vmem:[#allocation3 + $0xe8] sm:$0xff] }
 0x20f   :  { %1148 = vmatprep.subr.bf16.mxu0 %v2659_v4  ;;  %v2954_v4 = vld [vmem:[#allocation6 + $0x10] ss:$8 sps:$4 sm:$0xff]  }
 0x212   :  { %1149 = vmatpush1.bf16.msra.mxu0 %v2658_v7  ;;  %v2605_v7 = vcombine.high %v341_v2, %v345_v3 }
 0x213   :  { %1150 = vmatprep.subr.bf16.mxu0 %v2667_v8  ;;  %v349_v8 = vld [vmem:[#allocation3 + $0x108] sm:$0xff] }
 0x214   :  { %v2613_v13 = vcombine.high %v349_v8, %v353_v9  ;;  %v2612_v18 = vcombine.low %v349_v8, %v353_v9  ;;  %v2989_v8 = vld [vmem:[#allocation6 + $0xc4] ss:$8 sps:$4 sm:$0xff]  }
 0x216   :  { %1151 = vmatpush1.bf16.msra.mxu0 %v2666_v11  ;;  %v2962_v11 = vld [vmem:[#allocation6 + $0x34] ss:$8 sps:$4 sm:$0xff]  }
 0x217   :  { %1152 = vmatprep.subr.bf16.mxu0 %v2675_v12  ;;  %v2604_v12 = vcombine.low %v341_v2, %v345_v3  ;;  %v2986_v2 = vld [vmem:[#allocation6 + $0xb4] ss:$8 sps:$4 sm:$0xff]  }
 0x21a   :  { %1153 = vmatpush1.bf16.msra.mxu0 %v2674_v15  ;;  %v361_v15 = vld [vmem:[#allocation3 + $0x168] sm:$0xff] }
 0x21b   :  { %1154 = vmatprep.subr.bf16.mxu0 %v2683_v16  ;;  %v2960_v16 = vld [vmem:[#allocation6 + $0x30] ss:$8 sps:$4 sm:$0xff]   ;;  %v2621_v19 = vcombine.high %v357_v14, %v361_v15  ;;  %v2620_v27 = vcombine.low %v357_v14, %v361_v15  ;;  %v2992_v14 = vld [vmem:[#allocation6 + $0xd4] ss:$8 sps:$4 sm:$0xff]  }
 0x21e   :  { %1155 = vmatpush1.bf16.msra.mxu0 %v2682_v17  ;;  %v2965_v17 = vld [vmem:[#allocation6 + $0x44] ss:$8 sps:$4 sm:$0xff]  }
 0x21f   :  { %1156 = vmatprep.subr.bf16.mxu0 %v2691_v20  ;;  %v365_v20 = vld [vmem:[#allocation3 + $0x188] sm:$0xff] }
 0x220   :  { %v2629_v28 = vcombine.high %v365_v20, %v369_v21  ;;  %v2628_v33 = vcombine.low %v365_v20, %v369_v21 }
 0x222   :  { %1157 = vmatpush1.bf16.msra.mxu0 %v2690_v23  ;;  %v2968_v23 = vld [vmem:[#allocation6 + $0x54] ss:$8 sps:$4 sm:$0xff]  }
 0x223   :  { %1158 = vmatprep.subr.bf16.mxu0 %v2699_v31  ;;  %v2966_v31 = vld [vmem:[#allocation6 + $0x50] ss:$8 sps:$4 sm:$0xff]  }
 0x226   :  { %1159 = vmatpush1.bf16.msra.mxu0 %v2698_v34  ;;  %v2637_v34 = vcombine.high %v373_v29, %v377_v30 }
 0x227   :  { %1169 = vmatprep.subr.bf16.mxu0 %v2581_v39  ;;  %v2636_v39 = vcombine.low %v373_v29, %v377_v30  ;;  %v327_v29 = vld [vmem:[#allocation3 + $0x58] sm:$0xff] }
 0x228   :  { %v331_v30 = vld [vmem:[#allocation3 + $0x78] sm:$0xff] }
 0x2bc   :  { %v307_v48 = vpop.f32.mrb[8].mxu0 }
 0x2bd   :  { %v308_v24 = vadd.f32 %v307_v48, %v222_v46  ;;  %v309_v25 = vpop.f32.mrb[9].mxu0  ;;  %v393_v46 = vld [vmem:[#allocation3 + $0x268] sm:$0xff] }
 0x2be   :  { %v310_v26 = vadd.f32 %v309_v25, %v226_v47  ;;  %v311_v49 = vpop.f32.mrb[10].mxu0  ;;  %v2972_v47 = vld [vmem:[#allocation6 + $0x70] ss:$8 sps:$4 sm:$0xff]   ;;  %v2977_v48 = vld [vmem:[#allocation6 + $0x84] ss:$8 sps:$4 sm:$0xff]   ;;  %v2653_v25 = vcombine.high %v389_v44, %v393_v46 }
 0x2bf   :  { %v314_v50 = vmax.f32 %v308_v24, 0.0  ;;  %v312_v51 = vpop.f32.mrb[11].mxu0  ;;  %v2644_v24 = vcombine.low %v381_v35, %v385_v36  ;;  %v401_v49 = vld [vmem:[#allocation3 + $0x2a8] sm:$0xff] }
 0x2c0   :  { %v315_v52 = vmax.f32 %v310_v26, 0.0  ;;  %v397_v26 = vld [vmem:[#allocation3 + $0x288] sm:$0xff]  ;;  %v2980_v51 = vld [vmem:[#allocation6 + $0x94] ss:$8 sps:$4 sm:$0xff]  }
 0x2c1   :  { %v3436_v56 = vpack.c.bf16 %v314_v50, %v314_v50  ;;  %v2975_v50 = vld [vmem:[#allocation6 + $0x80] ss:$8 sps:$4 sm:$0xff]   ;;  %v2661_v53 = vcombine.high %v397_v26, %v401_v49 }
 0x2c2   :  { %v3434_v55 = vpack.c.bf16 %v315_v52, %v315_v52  ;;  %v2652_v52 = vcombine.low %v389_v44, %v393_v46  ;;  %v351_v44 = vld [vmem:[#allocation3 + $0x118] sm:$0xff] }
 0x2c3   :  { %v355_v46 = vld [vmem:[#allocation3 + $0x138] sm:$0xff] }
 0x2c4   :  { %1160 = vmatprep.mubr.bf16.mxu0 %v3434_v55  ;;  %1242 = vmatprep.mubr.bf16.mxu1 %v3434_v55 }
 0x2c5   :  { %1161 = vmatmul.mubr.bf16.vlgmr.msra.gmra.mrb[12].mxu0 %v3436_v56  ;;  %1243 = vmatmul.mubr.bf16.vlgmr.msra.gmra.mrb[0].mxu1 %v3436_v56 }
 0x2c6   :  { %1170 = vmatpush1.bf16.msra.mxu0 %v2580_v40  ;;  %1201 = vmatprep.mubr.bf16.mxu0 %v3434_v55  ;;  %v2645_v40 = vcombine.high %v381_v35, %v385_v36  ;;  %v2592_v35 = vcombine.low %v327_v29, %v331_v30 }
 0x2c7   :  { %1171 = vmatprep.subr.bf16.mxu0 %v2589_v57  ;;  %2089 = vmatpush1.bf16.msra.mxu1 %v2951_v60  ;;  %v409_v57 = vld [vmem:[#allocation3 + $0x2e8] sm:$0xff]  ;;  %v2660_v60 = vcombine.low %v397_v26, %v401_v49  ;;  %v2616_v26 = vcombine.low %v351_v44, %v355_v46  ;;  %v367_v49 = vld [vmem:[#allocation3 + $0x198] sm:$0xff] }
 0x2c8   :  { %2090 = vmatprep.subr.bf16.mxu1 %v2956_v63  ;;  %v2669_v61 = vcombine.high %v405_v54, %v409_v57  ;;  %v417_v63 = vld [vmem:[#allocation3 + $0x328] sm:$0xff]  ;;  %v2668_v3 = vcombine.low %v405_v54, %v409_v57  ;;  %v375_v54 = vld [vmem:[#allocation3 + $0x1d8] sm:$0xff] }
 0x2c9   :  { %v379_v57 = vld [vmem:[#allocation3 + $0x1f8] sm:$0xff] }
 0x2ca   :  { %1172 = vmatpush1.bf16.msra.mxu0 %v2588_v62  ;;  %v413_v62 = vld [vmem:[#allocation3 + $0x308] sm:$0xff] }
 0x2cb   :  { %1173 = vmatprep.subr.bf16.mxu0 %v2597_v0  ;;  %2091 = vmatpush1.bf16.msra.mxu1 %v2954_v4  ;;  %v2981_v0 = vld [vmem:[#allocation6 + $0xa0] ss:$8 sps:$4 sm:$0xff]   ;;  %v2677_v4 = vcombine.high %v413_v62, %v417_v63  ;;  %v2676_v9 = vcombine.low %v413_v62, %v417_v63  ;;  %v383_v62 = vld [vmem:[#allocation3 + $0x218] sm:$0xff] }
 0x2cc   :  { %2092 = vmatprep.subr.bf16.mxu1 %v2959_v5  ;;  %v421_v5 = vld [vmem:[#allocation3 + $0x348] sm:$0xff]  ;;  %v387_v63 = vld [vmem:[#allocation3 + $0x238] sm:$0xff] }
 0x2ce   :  { %1174 = vmatpush1.bf16.msra.mxu0 %v2596_v6  ;;  %v425_v6 = vld [vmem:[#allocation3 + $0x368] sm:$0xff] }
 0x2cf   :  { %1175 = vmatprep.subr.bf16.mxu0 %v2605_v7  ;;  %2093 = vmatpush1.bf16.msra.mxu1 %v2957_v10  ;;  %v2984_v7 = vld [vmem:[#allocation6 + $0xb0] ss:$8 sps:$4 sm:$0xff]   ;;  %v2685_v10 = vcombine.high %v421_v5, %v425_v6  ;;  %v2684_v15 = vcombine.low %v421_v5, %v425_v6 }
 0x2d0   :  { %2094 = vmatprep.subr.bf16.mxu1 %v2962_v11  ;;  %v429_v11 = vld [vmem:[#allocation3 + $0x388] sm:$0xff]  ;;  %v391_v5 = vld [vmem:[#allocation3 + $0x258] sm:$0xff] }
 0x2d1   :  { %v395_v6 = vld [vmem:[#allocation3 + $0x278] sm:$0xff] }
 0x2d2   :  { %1176 = vmatpush1.bf16.msra.mxu0 %v2604_v12  ;;  %v433_v12 = vld [vmem:[#allocation3 + $0x3a8] sm:$0xff] }
 0x2d3   :  { %1177 = vmatprep.subr.bf16.mxu0 %v2613_v13  ;;  %2095 = vmatpush1.bf16.msra.mxu1 %v2960_v16  ;;  %v2987_v13 = vld [vmem:[#allocation6 + $0xc0] ss:$8 sps:$4 sm:$0xff]   ;;  %v2693_v16 = vcombine.high %v429_v11, %v433_v12  ;;  %v2692_v20 = vcombine.low %v429_v11, %v433_v12  ;;  %v2656_v11 = vcombine.low %v391_v5, %v395_v6 }
 0x2d4   :  { %2096 = vmatprep.subr.bf16.mxu1 %v2965_v17  ;;  %v437_v17 = vld [vmem:[#allocation3 + $0x3c8] sm:$0xff] }
 0x2d6   :  { %1178 = vmatpush1.bf16.msra.mxu0 %v2612_v18  ;;  %v441_v18 = vld [vmem:[#allocation3 + $0x3e8] sm:$0xff] }
 0x2d7   :  { %1179 = vmatprep.subr.bf16.mxu0 %v2621_v19  ;;  %2097 = vmatpush1.bf16.msra.mxu1 %v2963_v22  ;;  %v2990_v19 = vld [vmem:[#allocation6 + $0xd0] ss:$8 sps:$4 sm:$0xff]   ;;  %v2701_v21 = vcombine.high %v437_v17, %v441_v18 }
 0x2d8   :  { %2098 = vmatprep.subr.bf16.mxu1 %v2968_v23  ;;  %v319_v22 = vld [vmem:[#allocation3 + $0x18] sm:$0xff] }
 0x2d9   :  { %v323_v23 = vld [vmem:[#allocation3 + $0x38] sm:$0xff] }
 0x2da   :  { %1180 = vmatpush1.bf16.msra.mxu0 %v2620_v27  ;;  %v2700_v27 = vcombine.low %v437_v17, %v441_v18  ;;  %v415_v17 = vld [vmem:[#allocation3 + $0x318] sm:$0xff] }
 0x2db   :  { %1181 = vmatprep.subr.bf16.mxu0 %v2629_v28  ;;  %2099 = vmatpush1.bf16.msra.mxu1 %v2966_v31  ;;  %v2585_v28 = vcombine.high %v319_v22, %v323_v23  ;;  %v2584_v31 = vcombine.low %v319_v22, %v323_v23  ;;  %v419_v18 = vld [vmem:[#allocation3 + $0x338] sm:$0xff] }
 0x2dc   :  { %2100 = vmatprep.subr.bf16.mxu1 %v2971_v32  ;;  %v2593_v32 = vcombine.high %v327_v29, %v331_v30  ;;  %v427_v22 = vld [vmem:[#allocation3 + $0x378] sm:$0xff]  ;;  %v2680_v23 = vcombine.low %v415_v17, %v419_v18 }
 0x2dd   :  { %v435_v29 = vld [vmem:[#allocation3 + $0x3b8] sm:$0xff] }
 0x2de   :  { %1182 = vmatpush1.bf16.msra.mxu0 %v2628_v33  ;;  %v335_v33 = vld [vmem:[#allocation3 + $0x98] sm:$0xff] }
 0x2df   :  { %1183 = vmatprep.subr.bf16.mxu0 %v2637_v34  ;;  %2101 = vmatpush1.bf16.msra.mxu1 %v2969_v37  ;;  %v339_v34 = vld [vmem:[#allocation3 + $0xb8] sm:$0xff] }
 0x2e0   :  { %2102 = vmatprep.subr.bf16.mxu1 %v2974_v38  ;;  %v2601_v36 = vcombine.high %v335_v33, %v339_v34  ;;  %v343_v37 = vld [vmem:[#allocation3 + $0xd8] sm:$0xff] }
 0x2e1   :  { %v347_v38 = vld [vmem:[#allocation3 + $0xf8] sm:$0xff] }
 0x2e2   :  { %1184 = vmatpush1.bf16.msra.mxu0 %v2636_v39  ;;  %v2600_v39 = vcombine.low %v335_v33, %v339_v34  ;;  %v443_v33 = vld [vmem:[#allocation3 + $0x3f8] sm:$0xff] }
 0x2e3   :  { %1185 = vmatprep.subr.bf16.mxu0 %v2645_v40  ;;  %2103 = vmatpush1.bf16.msra.mxu1 %v2972_v47  ;;  %v2609_v40 = vcombine.high %v343_v37, %v347_v38  ;;  %v2608_v47 = vcombine.low %v343_v37, %v347_v38  ;;  %v3449_v37 = vld [vmem:[%s3581_s8] sm:$0xff] }
 0x2e4   :  { %2104 = vmatprep.subr.bf16.mxu1 %v2977_v48  ;;  %v2617_v48 = vcombine.high %v351_v44, %v355_v46  ;;  %v451_v38 = vrot.slane %v3449_v37, %v3424_v43 }
 0x2e6   :  { %1186 = vmatpush1.bf16.msra.mxu0 %v2644_v24  ;;  %v359_v24 = vld [vmem:[#allocation3 + $0x158] sm:$0xff] }
 0x2e7   :  { %1187 = vmatprep.subr.bf16.mxu0 %v2653_v25  ;;  %2105 = vmatpush1.bf16.msra.mxu1 %v2975_v50  ;;  %v363_v25 = vld [vmem:[#allocation3 + $0x178] sm:$0xff] }
 0x2e8   :  { %2106 = vmatprep.subr.bf16.mxu1 %v2980_v51  ;;  %v371_v50 = vld [vmem:[#allocation3 + $0x1b8] sm:$0xff]  ;;  %v2624_v51 = vcombine.low %v359_v24, %v363_v25 }
 0x2ea   :  { %1188 = vmatpush1.bf16.msra.mxu0 %v2652_v52  ;;  %v2633_v52 = vcombine.high %v367_v49, %v371_v50 }
 0x2eb   :  { %1189 = vmatprep.subr.bf16.mxu0 %v2661_v53  ;;  %2107 = vmatpush1.bf16.msra.mxu1 %v2978_v58  ;;  %v2995_v53 = vld [vmem:[#allocation6 + $0xe4] ss:$8 sps:$4 sm:$0xff]   ;;  %v2993_v58 = vld [vmem:[#allocation6 + $0xe0] ss:$8 sps:$4 sm:$0xff]  }
 0x2ec   :  { %2108 = vmatprep.subr.bf16.mxu1 %v2983_v59  ;;  %v2632_v59 = vcombine.low %v367_v49, %v371_v50 }
 0x2ee   :  { %1190 = vmatpush1.bf16.msra.mxu0 %v2660_v60  ;;  %v2641_v60 = vcombine.high %v375_v54, %v379_v57 }
 0x2ef   :  { %1191 = vmatprep.subr.bf16.mxu0 %v2669_v61  ;;  %2109 = vmatpush1.bf16.msra.mxu1 %v2981_v0  ;;  %v2998_v61 = vld [vmem:[#allocation6 + $0xf4] ss:$8 sps:$4 sm:$0xff]   ;;  %v2996_v0 = vld [vmem:[#allocation6 + $0xf0] ss:$8 sps:$4 sm:$0xff]  }
 0x2f0   :  { %2110 = vmatprep.subr.bf16.mxu1 %v2986_v2  ;;  %v2640_v2 = vcombine.low %v375_v54, %v379_v57  ;;  %v3004_v54 = vld [vmem:[#allocation6 + $0x114] ss:$8 sps:$4 sm:$0xff]   ;;  %v3002_v57 = vld [vmem:[#allocation6 + $0x110] ss:$8 sps:$4 sm:$0xff]  }
 0x2f2   :  { %1192 = vmatpush1.bf16.msra.mxu0 %v2668_v3  ;;  %v2649_v3 = vcombine.high %v383_v62, %v387_v63 }
 0x2f3   :  { %1193 = vmatprep.subr.bf16.mxu0 %v2677_v4  ;;  %2111 = vmatpush1.bf16.msra.mxu1 %v2984_v7  ;;  %v3001_v4 = vld [vmem:[#allocation6 + $0x104] ss:$8 sps:$4 sm:$0xff]   ;;  %v2648_v7 = vcombine.low %v383_v62, %v387_v63  ;;  %v3011_v63 = vld [vmem:[#allocation6 + $0x140] ss:$8 sps:$4 sm:$0xff]  }
 0x2f4   :  { %2112 = vmatprep.subr.bf16.mxu1 %v2989_v8  ;;  %v2657_v8 = vcombine.high %v391_v5, %v395_v6  ;;  %v3013_v62 = vld [vmem:[#allocation6 + $0x144] ss:$8 sps:$4 sm:$0xff]   ;;  %v3022_v5 = vld [vmem:[#allocation6 + $0x174] ss:$8 sps:$4 sm:$0xff]   ;;  %v3020_v6 = vld [vmem:[#allocation6 + $0x170] ss:$8 sps:$4 sm:$0xff]  }
 0x2f6   :  { %1194 = vmatpush1.bf16.msra.mxu0 %v2676_v9  ;;  %v399_v9 = vld [vmem:[#allocation3 + $0x298] sm:$0xff] }
 0x2f7   :  { %1195 = vmatprep.subr.bf16.mxu0 %v2685_v10  ;;  %2113 = vmatpush1.bf16.msra.mxu1 %v2987_v13  ;;  %v403_v10 = vld [vmem:[#allocation3 + $0x2b8] sm:$0xff] }
 0x2f8   :  { %2114 = vmatprep.subr.bf16.mxu1 %v2992_v14  ;;  %v2665_v12 = vcombine.high %v399_v9, %v403_v10  ;;  %v407_v13 = vld [vmem:[#allocation3 + $0x2d8] sm:$0xff] }
 0x2f9   :  { %v411_v14 = vld [vmem:[#allocation3 + $0x2f8] sm:$0xff] }
 0x2fa   :  { %1196 = vmatpush1.bf16.msra.mxu0 %v2684_v15  ;;  %v2664_v15 = vcombine.low %v399_v9, %v403_v10  ;;  %v3028_v9 = vld [vmem:[#allocation6 + $0x194] ss:$8 sps:$4 sm:$0xff]   ;;  %v3026_v10 = vld [vmem:[#allocation6 + $0x190] ss:$8 sps:$4 sm:$0xff]  }
 0x2fb   :  { %1197 = vmatprep.subr.bf16.mxu0 %v2693_v16  ;;  %2115 = vmatpush1.bf16.msra.mxu1 %v2990_v19  ;;  %v2673_v16 = vcombine.high %v407_v13, %v411_v14  ;;  %v2672_v19 = vcombine.low %v407_v13, %v411_v14  ;;  %v3034_v13 = vld [vmem:[#allocation6 + $0x1b4] ss:$8 sps:$4 sm:$0xff]   ;;  %v3032_v14 = vld [vmem:[#allocation6 + $0x1b0] ss:$8 sps:$4 sm:$0xff]  }
 0x2fc   :  { %2116 = vmatprep.subr.bf16.mxu1 %v2995_v53 }
 0x2fe   :  { %1198 = vmatpush1.bf16.msra.mxu0 %v2692_v20  ;;  %v2681_v20 = vcombine.high %v415_v17, %v419_v18  ;;  %v3040_v17 = vld [vmem:[#allocation6 + $0x1d4] ss:$8 sps:$4 sm:$0xff]   ;;  %v470_v18 = vsub.s32 5, %v3421_v42 }
 0x2ff   :  { %1199 = vmatprep.subr.bf16.mxu0 %v2701_v21  ;;  %2117 = vmatpush1.bf16.msra.mxu1 %v2993_v58  ;;  %v423_v21 = vld [vmem:[#allocation3 + $0x358] sm:$0xff]  ;;  %v3007_v58 = vld [vmem:[#allocation6 + $0x124] ss:$8 sps:$4 sm:$0xff]  }
 0x300   :  { %2118 = vmatprep.subr.bf16.mxu1 %v2998_v61  ;;  %v2688_v30 = vcombine.low %v423_v21, %v427_v22  ;;  %v3008_v61 = vld [vmem:[#allocation6 + $0x130] ss:$8 sps:$4 sm:$0xff]  }
 0x302   :  { %1200 = vmatpush1.bf16.msra.mxu0 %v2700_v27  ;;  %v2689_v27 = vcombine.high %v423_v21, %v427_v22  ;;  %v462_v21 = vsub.s32 3, %v3421_v42  ;;  %v3043_v22 = vld [vmem:[#allocation6 + $0x1e4] ss:$8 sps:$4 sm:$0xff]  }
 0x303   :  { %1251 = vmatprep.subr.bf16.mxu0 %v2585_v28  ;;  %2119 = vmatpush1.bf16.msra.mxu1 %v2996_v0  ;;  %v431_v28 = vld [vmem:[#allocation3 + $0x398] sm:$0xff] }
 0x304   :  { %2129 = vmatprep.subr.bf16.mxu1 %v3001_v4  ;;  %v2696_v34 = vcombine.low %v431_v28, %v435_v29  ;;  %v3016_v0 = vld [vmem:[#allocation6 + $0x154] ss:$8 sps:$4 sm:$0xff]   ;;  %v3017_v4 = vld [vmem:[#allocation6 + $0x160] ss:$8 sps:$4 sm:$0xff]  }
 0x305   :  { %1202 = vmatmul.mubr.bf16.vlgmr.msra.gmra.mrb[16].mxu0 %v3436_v56 }
 0x306   :  { %1252 = vmatpush1.bf16.msra.mxu0 %v2584_v31  ;;  %1283 = vmatprep.mubr.bf16.mxu0 %v3434_v55  ;;  %v2625_v55 = vcombine.high %v359_v24, %v363_v25  ;;  %v2697_v31 = vcombine.high %v431_v28, %v435_v29  ;;  %v463_v28 = vrot.slane %v3449_v37, %v462_v21  ;;  %v3041_v29 = vld [vmem:[#allocation6 + $0x1e0] ss:$8 sps:$4 sm:$0xff]   ;;  %v3085_v21 = vld [vmem:[#allocation6 + $0x2c4] ss:$8 sps:$4 sm:$0xff]  }
 0x307   :  { %1253 = vmatprep.subr.bf16.mxu0 %v2593_v32  ;;  %v439_v32 = vld [vmem:[#allocation3 + $0x3d8] sm:$0xff] }
 0x30a   :  { %1254 = vmatpush1.bf16.msra.mxu0 %v2592_v35  ;;  %v2705_v35 = vcombine.high %v439_v32, %v443_v33 }
 0x30b   :  { %1255 = vmatprep.subr.bf16.mxu0 %v2601_v36  ;;  %v2704_v36 = vcombine.low %v439_v32, %v443_v33 }
 0x30e   :  { %1256 = vmatpush1.bf16.msra.mxu0 %v2600_v39  ;;  %v455_v39 = vrot.slane %v3449_v37, %v3430_v45 }
 0x30f   :  { %1257 = vmatprep.subr.bf16.mxu0 %v2609_v40 }
 0x312   :  { %1258 = vmatpush1.bf16.msra.mxu0 %v2608_v47 }
 0x313   :  { %1259 = vmatprep.subr.bf16.mxu0 %v2617_v48 }
 0x316   :  { %1260 = vmatpush1.bf16.msra.mxu0 %v2616_v26 }
 0x317   :  { %1261 = vmatprep.subr.bf16.mxu0 %v2625_v55 }
 0x31a   :  { %1262 = vmatpush1.bf16.msra.mxu0 %v2624_v51 }
 0x31b   :  { %1263 = vmatprep.subr.bf16.mxu0 %v2633_v52  ;;  %v2999_v52 = vld [vmem:[#allocation6 + $0x100] ss:$8 sps:$4 sm:$0xff]  }
 0x31e   :  { %1264 = vmatpush1.bf16.msra.mxu0 %v2632_v59  ;;  %v3005_v59 = vld [vmem:[#allocation6 + $0x120] ss:$8 sps:$4 sm:$0xff]  }
 0x31f   :  { %1265 = vmatprep.subr.bf16.mxu0 %v2641_v60  ;;  %v3010_v60 = vld [vmem:[#allocation6 + $0x134] ss:$8 sps:$4 sm:$0xff]  }
 0x322   :  { %1266 = vmatpush1.bf16.msra.mxu0 %v2640_v2  ;;  %v3014_v2 = vld [vmem:[#allocation6 + $0x150] ss:$8 sps:$4 sm:$0xff]  }
 0x323   :  { %1267 = vmatprep.subr.bf16.mxu0 %v2649_v3  ;;  %v3019_v3 = vld [vmem:[#allocation6 + $0x164] ss:$8 sps:$4 sm:$0xff]  }
 0x326   :  { %1268 = vmatpush1.bf16.msra.mxu0 %v2648_v7  ;;  %v3025_v7 = vld [vmem:[#allocation6 + $0x184] ss:$8 sps:$4 sm:$0xff]  }
 0x327   :  { %1269 = vmatprep.subr.bf16.mxu0 %v2657_v8  ;;  %v3023_v8 = vld [vmem:[#allocation6 + $0x180] ss:$8 sps:$4 sm:$0xff]  }
 0x32a   :  { %1270 = vmatpush1.bf16.msra.mxu0 %v2656_v11  ;;  %v3031_v11 = vld [vmem:[#allocation6 + $0x1a4] ss:$8 sps:$4 sm:$0xff]  }
 0x32b   :  { %1271 = vmatprep.subr.bf16.mxu0 %v2665_v12  ;;  %v3029_v12 = vld [vmem:[#allocation6 + $0x1a0] ss:$8 sps:$4 sm:$0xff]  }
 0x32e   :  { %1272 = vmatpush1.bf16.msra.mxu0 %v2664_v15  ;;  %v3037_v15 = vld [vmem:[#allocation6 + $0x1c4] ss:$8 sps:$4 sm:$0xff]  }
 0x32f   :  { %1273 = vmatprep.subr.bf16.mxu0 %v2673_v16  ;;  %v3035_v16 = vld [vmem:[#allocation6 + $0x1c0] ss:$8 sps:$4 sm:$0xff]  }
 0x332   :  { %1274 = vmatpush1.bf16.msra.mxu0 %v2672_v19  ;;  %v458_v19 = vsub.s32 2, %v3421_v42 }
 0x333   :  { %1275 = vmatprep.subr.bf16.mxu0 %v2681_v20  ;;  %v3038_v20 = vld [vmem:[#allocation6 + $0x1d0] ss:$8 sps:$4 sm:$0xff]  }
 0x336   :  { %1276 = vmatpush1.bf16.msra.mxu0 %v2680_v23  ;;  %v471_v23 = vrot.slane %v3449_v37, %v470_v18  ;;  %v3077_v18 = vld [vmem:[#allocation6 + $0x2a0] ss:$8 sps:$4 sm:$0xff]  }
 0x337   :  { %1277 = vmatprep.subr.bf16.mxu0 %v2689_v27  ;;  %v459_v27 = vrot.slane %v3449_v37, %v458_v19  ;;  %v3082_v19 = vld [vmem:[#allocation6 + $0x2b4] ss:$8 sps:$4 sm:$0xff]  }
 0x33a   :  { %1278 = vmatpush1.bf16.msra.mxu0 %v2688_v30  ;;  %v3046_v30 = vld [vmem:[#allocation6 + $0x1f4] ss:$8 sps:$4 sm:$0xff]  }
 0x33b   :  { %1279 = vmatprep.subr.bf16.mxu0 %v2697_v31 }
 0x33e   :  { %1280 = vmatpush1.bf16.msra.mxu0 %v2696_v34 }
 0x33f   :  { %1281 = vmatprep.subr.bf16.mxu0 %v2705_v35 }
 0x342   :  { %1282 = vmatpush1.bf16.msra.mxu0 %v2704_v36 }
 0x345   :  { %1284 = vmatmul.mubr.bf16.vlgmr.msra.gmra.mrb[20].mxu0 %v3436_v56 }
 0x398   :  { %v1162_v40 = vpop.f32.mrb[12].mxu0  ;;  %v3455_v44 = vpop.f32.mrb[0].mxu1 }
 0x399   :  { %v1163_v46 = vadd.f32 %v1162_v40, %v451_v38  ;;  %v1164_v47 = vpop.f32.mrb[13].mxu0  ;;  %v3457_v48 = vpop.f32.mrb[1].mxu1  ;;  %v3044_v38 = vld [vmem:[#allocation6 + $0x1f0] ss:$8 sps:$4 sm:$0xff]  }
 0x39a   :  { %v1165_v24 = vadd.f32 %v1164_v47, %v455_v39  ;;  %v1166_v56 = vpop.f32.mrb[14].mxu0  ;;  %v1248_v25 = vpop.f32.mrb[2].mxu1  ;;  %v1247_v31 = vadd.f32 %v3457_v48, %v471_v23  ;;  %v466_v23 = vsub.s32 4, %v3421_v42 }
 0x39b   :  { %v1292_v26 = vmax.f32 %v1163_v46, 0.0  ;;  %v1167_v55 = vpop.f32.mrb[15].mxu0  ;;  %v1249_v49 = vpop.f32.mrb[3].mxu1  ;;  %v3049_v46 = vld [vmem:[#allocation6 + $0x204] ss:$8 sps:$4 sm:$0xff]  }
 0x39c   :  { %v1293_v50 = vmax.f32 %v1165_v24, 0.0  ;;  %v1297_v47 = vmax.f32 %v1247_v31, 0.0  ;;  %v3047_v25 = vld [vmem:[#allocation6 + $0x200] ss:$8 sps:$4 sm:$0xff]   ;;  %v3052_v55 = vld [vmem:[#allocation6 + $0x214] ss:$8 sps:$4 sm:$0xff]  }
 0x39d   :  { %v1429_v53 = vpack.c.bf16 %v1292_v26, %v1292_v26  ;;  %v3143_v49 = vld [vmem:[%s3584_s11 + $0x40] sm:$0xff]  }
 0x39e   :  { %v1430_v51 = vpack.c.bf16 %v1293_v50, %v1293_v50  ;;  %v1434_v48 = vpack.c.bf16 %v1297_v47, %v1297_v47  ;;  %v3144_v50 = vld [vmem:[%s3584_s11] sm:$0xff]   ;;  %2862 = vmatprep.subr.bf16.mxu0 %v3143_v49  ;;  %v3098_v49 = vld [vmem:[#allocation6 + $0x310] ss:$8 sps:$4 sm:$0xff]  }
 0x39f   :  { %2863 = vmatpush3.bf16.msra.mxu0 %v3144_v50  ;;  %v3091_v31 = vld [vmem:[#allocation6 + $0x2e4] ss:$8 sps:$4 sm:$0xff]  }
 0x3a0   :  { %2120 = vmatprep.mubr.bf16.mxu1 %v1430_v51  ;;  %v3145_v51 = vld [vmem:[%s3584_s11 + $0x48] sm:$0xff]  }
 0x3a1   :  { %2121 = vmatmul.mubr.bf16.vlgmr.msra.gmra.mrb[4].mxu1 %v1429_v53  ;;  %v3055_v53 = vld [vmem:[#allocation6 + $0x224] ss:$8 sps:$4 sm:$0xff]   ;;  %2864 = vmatprep.subr.bf16.mxu0 %v3145_v51  ;;  %v3101_v51 = vld [vmem:[#allocation6 + $0x320] ss:$8 sps:$4 sm:$0xff]  }
 0x3a2   :  { %2130 = vmatpush1.bf16.msra.mxu1 %v2999_v52  ;;  %v3050_v52 = vld [vmem:[#allocation6 + $0x210] ss:$8 sps:$4 sm:$0xff]   ;;  %v3103_v50 = vld [vmem:[#allocation6 + $0x324] ss:$8 sps:$4 sm:$0xff]  }
 0x3a3   :  { %2131 = vmatprep.subr.bf16.mxu1 %v3004_v54  ;;  %v3146_v54 = vld [vmem:[%s3584_s11 + $0x8] sm:$0xff]  }
 0x3a4   :  { %2865 = vmatpush3.bf16.msra.mxu0 %v3146_v54  ;;  %v3109_v54 = vld [vmem:[#allocation6 + $0x344] ss:$8 sps:$4 sm:$0xff]  }
 0x3a6   :  { %2132 = vmatpush1.bf16.msra.mxu1 %v3002_v57  ;;  %v3147_v57 = vld [vmem:[%s3584_s11 + $0x50] sm:$0xff]  }
 0x3a7   :  { %2133 = vmatprep.subr.bf16.mxu1 %v3007_v58  ;;  %v3053_v58 = vld [vmem:[#allocation6 + $0x220] ss:$8 sps:$4 sm:$0xff]   ;;  %2866 = vmatprep.subr.bf16.mxu0 %v3147_v57 }
 0x3a8   :  { %v3107_v57 = vld [vmem:[#allocation6 + $0x340] ss:$8 sps:$4 sm:$0xff]  }
 0x3aa   :  { %2134 = vmatpush1.bf16.msra.mxu1 %v3005_v59  ;;  %v3058_v59 = vld [vmem:[#allocation6 + $0x234] ss:$8 sps:$4 sm:$0xff]  }
 0x3ab   :  { %2135 = vmatprep.subr.bf16.mxu1 %v3010_v60  ;;  %v3148_v60 = vld [vmem:[%s3584_s11 + $0x10] sm:$0xff]  }
 0x3ac   :  { %2867 = vmatpush3.bf16.msra.mxu0 %v3148_v60  ;;  %v3115_v60 = vld [vmem:[#allocation6 + $0x364] ss:$8 sps:$4 sm:$0xff]  }
 0x3ae   :  { %2136 = vmatpush1.bf16.msra.mxu1 %v3008_v61  ;;  %v3149_v61 = vld [vmem:[%s3584_s11 + $0x58] sm:$0xff]  }
 0x3af   :  { %2137 = vmatprep.subr.bf16.mxu1 %v3013_v62  ;;  %v3056_v62 = vld [vmem:[#allocation6 + $0x230] ss:$8 sps:$4 sm:$0xff]   ;;  %2868 = vmatprep.subr.bf16.mxu0 %v3149_v61  ;;  %v3113_v61 = vld [vmem:[#allocation6 + $0x360] ss:$8 sps:$4 sm:$0xff]  }
 0x3b2   :  { %2138 = vmatpush1.bf16.msra.mxu1 %v3011_v63  ;;  %v3061_v63 = vld [vmem:[#allocation6 + $0x244] ss:$8 sps:$4 sm:$0xff]  }
 0x3b3   :  { %2139 = vmatprep.subr.bf16.mxu1 %v3016_v0  ;;  %v3150_v0 = vld [vmem:[%s3584_s11 + $0x18] sm:$0xff]  }
 0x3b4   :  { %2869 = vmatpush3.bf16.msra.mxu0 %v3150_v0  ;;  %v3121_v0 = vld [vmem:[#allocation6 + $0x384] ss:$8 sps:$4 sm:$0xff]  }
 0x3b6   :  { %2140 = vmatpush1.bf16.msra.mxu1 %v3014_v2  ;;  %v3151_v2 = vld [vmem:[%s3584_s11 + $0x60] sm:$0xff]  }
 0x3b7   :  { %2141 = vmatprep.subr.bf16.mxu1 %v3019_v3  ;;  %v3059_v3 = vld [vmem:[#allocation6 + $0x240] ss:$8 sps:$4 sm:$0xff]   ;;  %2870 = vmatprep.subr.bf16.mxu0 %v3151_v2 }
 0x3b8   :  { %v3119_v2 = vld [vmem:[#allocation6 + $0x380] ss:$8 sps:$4 sm:$0xff]  }
 0x3ba   :  { %2142 = vmatpush1.bf16.msra.mxu1 %v3017_v4  ;;  %v3064_v4 = vld [vmem:[#allocation6 + $0x254] ss:$8 sps:$4 sm:$0xff]  }
 0x3bb   :  { %2143 = vmatprep.subr.bf16.mxu1 %v3022_v5  ;;  %v3152_v5 = vld [vmem:[%s3584_s11 + $0x20] sm:$0xff]  }
 0x3bc   :  { %2871 = vmatpush3.bf16.msra.mxu0 %v3152_v5  ;;  %v3127_v5 = vld [vmem:[#allocation6 + $0x3a4] ss:$8 sps:$4 sm:$0xff]  }
 0x3be   :  { %2144 = vmatpush1.bf16.msra.mxu1 %v3020_v6  ;;  %v3153_v6 = vld [vmem:[%s3584_s11 + $0x68] sm:$0xff]  }
 0x3bf   :  { %2145 = vmatprep.subr.bf16.mxu1 %v3025_v7  ;;  %v3062_v7 = vld [vmem:[#allocation6 + $0x250] ss:$8 sps:$4 sm:$0xff]   ;;  %2872 = vmatprep.subr.bf16.mxu0 %v3153_v6  ;;  %v3125_v6 = vld [vmem:[#allocation6 + $0x3a0] ss:$8 sps:$4 sm:$0xff]  }
 0x3c2   :  { %2146 = vmatpush1.bf16.msra.mxu1 %v3023_v8  ;;  %v3067_v8 = vld [vmem:[#allocation6 + $0x264] ss:$8 sps:$4 sm:$0xff]  }
 0x3c3   :  { %2147 = vmatprep.subr.bf16.mxu1 %v3028_v9  ;;  %v3154_v9 = vld [vmem:[%s3584_s11 + $0x28] sm:$0xff]  }
 0x3c4   :  { %2873 = vmatpush3.bf16.msra.mxu0 %v3154_v9  ;;  %v3133_v9 = vld [vmem:[#allocation6 + $0x3c4] ss:$8 sps:$4 sm:$0xff]  }
 0x3c6   :  { %2148 = vmatpush1.bf16.msra.mxu1 %v3026_v10  ;;  %v3065_v10 = vld [vmem:[#allocation6 + $0x260] ss:$8 sps:$4 sm:$0xff]  }
 0x3c7   :  { %2149 = vmatprep.subr.bf16.mxu1 %v3031_v11  ;;  %v3070_v11 = vld [vmem:[#allocation6 + $0x274] ss:$8 sps:$4 sm:$0xff]  }
 0x3ca   :  { %2150 = vmatpush1.bf16.msra.mxu1 %v3029_v12  ;;  %v3068_v12 = vld [vmem:[#allocation6 + $0x270] ss:$8 sps:$4 sm:$0xff]  }
 0x3cb   :  { %2151 = vmatprep.subr.bf16.mxu1 %v3034_v13  ;;  %v3073_v13 = vld [vmem:[#allocation6 + $0x284] ss:$8 sps:$4 sm:$0xff]  }
 0x3ce   :  { %2152 = vmatpush1.bf16.msra.mxu1 %v3032_v14  ;;  %v3071_v14 = vld [vmem:[#allocation6 + $0x280] ss:$8 sps:$4 sm:$0xff]  }
 0x3cf   :  { %2153 = vmatprep.subr.bf16.mxu1 %v3037_v15  ;;  %v3076_v15 = vld [vmem:[#allocation6 + $0x294] ss:$8 sps:$4 sm:$0xff]  }
 0x3d2   :  { %2154 = vmatpush1.bf16.msra.mxu1 %v3035_v16  ;;  %v3074_v16 = vld [vmem:[#allocation6 + $0x290] ss:$8 sps:$4 sm:$0xff]  }
 0x3d3   :  { %2155 = vmatprep.subr.bf16.mxu1 %v3040_v17  ;;  %v3079_v17 = vld [vmem:[#allocation6 + $0x2a4] ss:$8 sps:$4 sm:$0xff]  }
 0x3d6   :  { %2156 = vmatpush1.bf16.msra.mxu1 %v3038_v20  ;;  %v3080_v20 = vld [vmem:[#allocation6 + $0x2b0] ss:$8 sps:$4 sm:$0xff]  }
 0x3d7   :  { %2157 = vmatprep.subr.bf16.mxu1 %v3043_v22  ;;  %v3083_v22 = vld [vmem:[#allocation6 + $0x2c0] ss:$8 sps:$4 sm:$0xff]  }
 0x3d8   :  { %v1203_v32 = vpop.f32.mrb[16].mxu0 }
 0x3d9   :  { %v1204_v33 = vadd.f32 %v1203_v32, %v459_v27  ;;  %v1205_v34 = vpop.f32.mrb[17].mxu0  ;;  %v3088_v27 = vld [vmem:[#allocation6 + $0x2d4] ss:$8 sps:$4 sm:$0xff]  }
 0x3da   :  { %v1206_v35 = vadd.f32 %v1205_v34, %v463_v28  ;;  %v1207_v36 = vpop.f32.mrb[18].mxu0  ;;  %2158 = vmatpush1.bf16.msra.mxu1 %v3041_v29  ;;  %v3086_v28 = vld [vmem:[#allocation6 + $0x2d0] ss:$8 sps:$4 sm:$0xff]   ;;  %v478_v29 = vsub.s32 7, %v3421_v42 }
 0x3db   :  { %v1294_v39 = vmax.f32 %v1204_v33, 0.0  ;;  %v1208_v40 = vpop.f32.mrb[19].mxu0  ;;  %2159 = vmatprep.subr.bf16.mxu1 %v3046_v30  ;;  %v467_v30 = vrot.slane %v3449_v37, %v466_v23  ;;  %v3089_v33 = vld [vmem:[#allocation6 + $0x2e0] ss:$8 sps:$4 sm:$0xff]   ;;  %v3157_v23 = vld [vmem:[%s3584_s11 + $0x78] sm:$0xff]  }
 0x3dc   :  { %v1295_v24 = vmax.f32 %v1206_v35, 0.0  ;;  %v479_v32 = vrot.slane %v3449_v37, %v478_v29  ;;  %v3094_v35 = vld [vmem:[#allocation6 + $0x2f4] ss:$8 sps:$4 sm:$0xff]  }
 0x3dd   :  { %v1431_v26 = vpack.c.bf16 %v1294_v39, %v1294_v39  ;;  %v1245_v34 = vadd.f32 %v3455_v44, %v467_v30 }
 0x3de   :  { %v1432_v56 = vpack.c.bf16 %v1295_v24, %v1295_v24  ;;  %2160 = vmatpush1.bf16.msra.mxu1 %v3044_v38 }
 0x3df   :  { %2170 = vmatprep.subr.bf16.mxu1 %v3049_v46  ;;  %v3092_v46 = vld [vmem:[#allocation6 + $0x2f0] ss:$8 sps:$4 sm:$0xff]   ;;  %v1296_v47 = vmax.f32 %v1245_v34, 0.0 }
 0x3e0   :  { %2161 = vmatprep.mubr.bf16.mxu1 %v1432_v56  ;;  %v3097_v56 = vld [vmem:[#allocation6 + $0x304] ss:$8 sps:$4 sm:$0xff]  }
 0x3e1   :  { %2162 = vmatmul.mubr.bf16.vlgmr.msra.gmra.mrb[4].mxu1 %v1431_v26  ;;  %v3095_v26 = vld [vmem:[#allocation6 + $0x300] ss:$8 sps:$4 sm:$0xff]  }
 0x3e2   :  { %2171 = vmatpush1.bf16.msra.mxu1 %v3047_v25  ;;  %2202 = vmatprep.mubr.bf16.mxu1 %v1434_v48  ;;  %v3100_v48 = vld [vmem:[#allocation6 + $0x314] ss:$8 sps:$4 sm:$0xff]  }
 0x3e3   :  { %2172 = vmatprep.subr.bf16.mxu1 %v3052_v55  ;;  %v1433_v55 = vpack.c.bf16 %v1296_v47, %v1296_v47 }
 0x3e6   :  { %2173 = vmatpush1.bf16.msra.mxu1 %v3050_v52  ;;  %v3106_v52 = vld [vmem:[#allocation6 + $0x334] ss:$8 sps:$4 sm:$0xff]  }
 0x3e7   :  { %2174 = vmatprep.subr.bf16.mxu1 %v3055_v53  ;;  %v3104_v53 = vld [vmem:[#allocation6 + $0x330] ss:$8 sps:$4 sm:$0xff]  }
 0x3ea   :  { %2175 = vmatpush1.bf16.msra.mxu1 %v3053_v58  ;;  %v3112_v58 = vld [vmem:[#allocation6 + $0x354] ss:$8 sps:$4 sm:$0xff]  }
 0x3eb   :  { %2176 = vmatprep.subr.bf16.mxu1 %v3058_v59  ;;  %v3110_v59 = vld [vmem:[#allocation6 + $0x350] ss:$8 sps:$4 sm:$0xff]  }
 0x3ee   :  { %2177 = vmatpush1.bf16.msra.mxu1 %v3056_v62  ;;  %v3118_v62 = vld [vmem:[#allocation6 + $0x374] ss:$8 sps:$4 sm:$0xff]  }
 0x3ef   :  { %2178 = vmatprep.subr.bf16.mxu1 %v3061_v63  ;;  %v3116_v63 = vld [vmem:[#allocation6 + $0x370] ss:$8 sps:$4 sm:$0xff]  }
 0x3f2   :  { %2179 = vmatpush1.bf16.msra.mxu1 %v3059_v3  ;;  %v3124_v3 = vld [vmem:[#allocation6 + $0x394] ss:$8 sps:$4 sm:$0xff]  }
 0x3f3   :  { %2180 = vmatprep.subr.bf16.mxu1 %v3064_v4  ;;  %v3122_v4 = vld [vmem:[#allocation6 + $0x390] ss:$8 sps:$4 sm:$0xff]  }
 0x3f6   :  { %2181 = vmatpush1.bf16.msra.mxu1 %v3062_v7  ;;  %v3130_v7 = vld [vmem:[#allocation6 + $0x3b4] ss:$8 sps:$4 sm:$0xff]  }
 0x3f7   :  { %2182 = vmatprep.subr.bf16.mxu1 %v3067_v8  ;;  %v3128_v8 = vld [vmem:[#allocation6 + $0x3b0] ss:$8 sps:$4 sm:$0xff]  }
 0x3fa   :  { %2183 = vmatpush1.bf16.msra.mxu1 %v3065_v10  ;;  %v3131_v10 = vld [vmem:[#allocation6 + $0x3c0] ss:$8 sps:$4 sm:$0xff]  }
 0x3fb   :  { %2184 = vmatprep.subr.bf16.mxu1 %v3070_v11  ;;  %v474_v11 = vsub.s32 6, %v3421_v42 }
 0x3fe   :  { %2185 = vmatpush1.bf16.msra.mxu1 %v3068_v12  ;;  %v3136_v12 = vld [vmem:[#allocation6 + $0x3d4] ss:$8 sps:$4 sm:$0xff]  }
 0x3ff   :  { %2186 = vmatprep.subr.bf16.mxu1 %v3073_v13  ;;  %v3134_v13 = vld [vmem:[#allocation6 + $0x3d0] ss:$8 sps:$4 sm:$0xff]  }
 0x402   :  { %2187 = vmatpush1.bf16.msra.mxu1 %v3071_v14  ;;  %v475_v14 = vrot.slane %v3449_v37, %v474_v11  ;;  %v3156_v37 = vld [vmem:[%s3584_s11 + $0x30] sm:$0xff]  }
 0x403   :  { %2188 = vmatprep.subr.bf16.mxu1 %v3076_v15  ;;  %v3139_v15 = vld [vmem:[#allocation6 + $0x3e4] ss:$8 sps:$4 sm:$0xff]  }
 0x406   :  { %2189 = vmatpush1.bf16.msra.mxu1 %v3074_v16  ;;  %v3137_v16 = vld [vmem:[#allocation6 + $0x3e0] ss:$8 sps:$4 sm:$0xff]  }
 0x407   :  { %2190 = vmatprep.subr.bf16.mxu1 %v3079_v17 }
 0x40a   :  { %2191 = vmatpush1.bf16.msra.mxu1 %v3077_v18  ;;  %v3142_v18 = vld [vmem:[#allocation6 + $0x3f4] ss:$8 sps:$4 sm:$0xff]  }
 0x40b   :  { %2192 = vmatprep.subr.bf16.mxu1 %v3082_v19  ;;  %v3140_v19 = vld [vmem:[#allocation6 + $0x3f0] ss:$8 sps:$4 sm:$0xff]  }
 0x40e   :  { %2193 = vmatpush1.bf16.msra.mxu1 %v3080_v20 }
 0x40f   :  { %2194 = vmatprep.subr.bf16.mxu1 %v3085_v21 }
 0x412   :  { %2195 = vmatpush1.bf16.msra.mxu1 %v3083_v22  ;;  %v3155_v22 = vld [vmem:[%s3584_s11 + $0x70] sm:$0xff]  }
 0x413   :  { %2196 = vmatprep.subr.bf16.mxu1 %v3088_v27  ;;  %2874 = vmatprep.subr.bf16.mxu0 %v3155_v22  ;;  %v3158_v27 = vld [vmem:[%s3584_s11 + $0x38] sm:$0xff]  }
 0x414   :  { %2875 = vmatpush3.bf16.msra.mxu0 %v3156_v37 }
 0x415   :  { %2876 = vmatprep.subr.bf16.mxu0 %v3157_v23 }
 0x416   :  { %2197 = vmatpush1.bf16.msra.mxu1 %v3086_v28  ;;  %v1428_v28 = vld [vmem:[%s3583_s10] sm:$0x3] }
 0x417   :  { %2198 = vmatprep.subr.bf16.mxu1 %v3091_v31  ;;  %v1441_v29 = vrot.slane %v1428_v28, %v3424_v43  ;;  %v1445_v30 = vrot.slane %v1428_v28, %v3430_v45  ;;  %v3160_v45 = vld [vmem:[%s3586_s13 + $0x8] sm:$0xff]  }
 0x418   :  { %v3507_v36 = vpop.f32.mrb[20].mxu0  ;;  %2877 = vmatpush3.bf16.msra.mxu0 %v3158_v27 }
 0x419   :  { %v1287_v38 = vpop.f32.mrb[21].mxu0  ;;  %v1286_v17 = vadd.f32 %v3507_v36, %v475_v14  ;;  %2901 = vmatprep.subr.bf16.mxu0 %v3241_v1 }
 0x41a   :  { %v1288_v39 = vadd.f32 %v1287_v38, %v479_v32  ;;  %v1289_v40 = vpop.f32.mrb[22].mxu0  ;;  %2199 = vmatpush1.bf16.msra.mxu1 %v3089_v33 }
 0x41b   :  { %v1290_v24 = vpop.f32.mrb[23].mxu0  ;;  %2200 = vmatprep.subr.bf16.mxu1 %v3094_v35  ;;  %v1298_v20 = vmax.f32 %v1286_v17, 0.0 }
 0x41c   :  { %v1299_v25 = vmax.f32 %v1288_v39, 0.0  ;;  %v3161_v24 = vld [vmem:[%s3586_s13 + $0x10] sm:$0xff]  }
 0x41d   :  { %v1435_v21 = vpack.c.bf16 %v1298_v20, %v1298_v20 }
 0x41e   :  { %2201 = vmatpush1.bf16.msra.mxu1 %v3092_v46  ;;  %v1436_v44 = vpack.c.bf16 %v1299_v25, %v1299_v25  ;;  %v3159_v46 = vld [vmem:[%s3586_s13] sm:$0xff]  }
 0x41f   :  { %2211 = vmatprep.subr.bf16.mxu1 %v3097_v56  ;;  %v3162_v56 = vld [vmem:[%s3586_s13 + $0x18] sm:$0xff]  }
 0x421   :  { %2203 = vmatmul.mubr.bf16.vlgmr.msra.gmra.mrb[4].mxu1 %v1433_v55 }
 0x422   :  { %2212 = vmatpush1.bf16.msra.mxu1 %v3095_v26  ;;  %2243 = vmatprep.mubr.bf16.mxu1 %v1436_v44  ;;  %v2834_v26 = vld [vmem:[%s3585_s12] ss:$0 sm:$0xff]  ;;  %s3244_s12 = smov [#allocation8]  }
 0x423   :  { %2213 = vmatprep.subr.bf16.mxu1 %v3100_v48 }
 0x426   :  { %2214 = vmatpush1.bf16.msra.mxu1 %v3098_v49 }
 0x427   :  { %2215 = vmatprep.subr.bf16.mxu1 %v3103_v50 }
 0x42a   :  { %2216 = vmatpush1.bf16.msra.mxu1 %v3101_v51 }
 0x42b   :  { %2217 = vmatprep.subr.bf16.mxu1 %v3106_v52 }
 0x42e   :  { %2218 = vmatpush1.bf16.msra.mxu1 %v3104_v53 }
 0x42f   :  { %2219 = vmatprep.subr.bf16.mxu1 %v3109_v54 }
 0x432   :  { %2220 = vmatpush1.bf16.msra.mxu1 %v3107_v57 }
 0x433   :  { %2221 = vmatprep.subr.bf16.mxu1 %v3112_v58 }
 0x436   :  { %2222 = vmatpush1.bf16.msra.mxu1 %v3110_v59  ;;  %v2857_v59 = vld [vmem:[%s3588_s15] ss:$0 sm:$0xff] }
 0x437   :  { %2223 = vmatprep.subr.bf16.mxu1 %v3115_v60 }
 0x43a   :  { %2224 = vmatpush1.bf16.msra.mxu1 %v3113_v61 }
 0x43b   :  { %2225 = vmatprep.subr.bf16.mxu1 %v3118_v62 }
 0x43e   :  { %2226 = vmatpush1.bf16.msra.mxu1 %v3116_v63 }
 0x43f   :  { %2227 = vmatprep.subr.bf16.mxu1 %v3121_v0  ;;  %v2517_v0 = vld [vmem:[#allocation2] sm:$0x1] }
 0x442   :  { %2228 = vmatpush1.bf16.msra.mxu1 %v3119_v2 }
 0x443   :  { %2229 = vmatprep.subr.bf16.mxu1 %v3124_v3  ;;  %v2540_v3 = vand.u32 127, %v219_v41 }
 0x446   :  { %2230 = vmatpush1.bf16.msra.mxu1 %v3122_v4 }
 0x447   :  { %2231 = vmatprep.subr.bf16.mxu1 %v3127_v5  ;;  %v2543_v5 = vsub.s32 %v2540_v3, %v3421_v42 }
 0x44a   :  { %2232 = vmatpush1.bf16.msra.mxu1 %v3125_v6 }
 0x44b   :  { %2233 = vmatprep.subr.bf16.mxu1 %v3130_v7 }
 0x44e   :  { %2234 = vmatpush1.bf16.msra.mxu1 %v3128_v8 }
 0x44f   :  { %2235 = vmatprep.subr.bf16.mxu1 %v3133_v9 }
 0x452   :  { %2236 = vmatpush1.bf16.msra.mxu1 %v3131_v10 }
 0x453   :  { %2237 = vmatprep.subr.bf16.mxu1 %v3136_v12 }
 0x456   :  { %2238 = vmatpush1.bf16.msra.mxu1 %v3134_v13 }
 0x457   :  { %2239 = vmatprep.subr.bf16.mxu1 %v3139_v15 }
 0x45a   :  { %2240 = vmatpush1.bf16.msra.mxu1 %v3137_v16 }
 0x45b   :  { %2241 = vmatprep.subr.bf16.mxu1 %v3142_v18 }
 0x45e   :  { %2242 = vmatpush1.bf16.msra.mxu1 %v3140_v19 }
 0x461   :  { %2244 = vmatmul.mubr.bf16.vlgmr.msra.gmra.mrb[4].mxu1 %v1435_v21 }
 0x534   :  { %v2245_v31 = vpop.f32.mrb[4].mxu1 }
 0x535   :  { %v2913_v32 = vadd.f32 %v2245_v31, %v1441_v29  ;;  %v2247_v33 = vpop.f32.mrb[5].mxu1 }
 0x536   :  { %v2914_v34 = vadd.f32 %v2247_v33, %v1445_v30  ;;  %v2249_v35 = vpop.f32.mrb[6].mxu1 }
 0x537   :  { %v2252_v36 = vmax.f32 %v2913_v32, 0.0  ;;  %v2250_v38 = vpop.f32.mrb[7].mxu1 }
 0x538   :  { %v2253_v39 = vmax.f32 %v2914_v34, 0.0 }
 0x539   :  { %v2287_v47 = vpack.c.bf16 %v2252_v36, %v2252_v36 }
 0x53a   :  { %v2288_v40 = vpack.c.bf16 %v2253_v39, %v2253_v39 }
 0x53c   :  { %2423 = vmatprep.mubr.bf16.mxu0 %v2288_v40 }
 0x53d   :  { %2424 = vmatmul.mubr.bf16.vlgmr.msra.gmra.mrb[24].mxu0 %v2287_v47 }
 0x53e   :  { %2902 = vmatpush3.bf16.msra.mxu0 %v3159_v46  ;;  %2909 = vmatprep.mubr.msk.bf16.mxu0 %vm3242_vm0, %v3241_v1 }
 0x53f   :  { %2903 = vmatprep.subr.bf16.mxu0 %v3241_v1 }
 0x542   :  { %2904 = vmatpush3.bf16.msra.mxu0 %v3160_v45 }
 0x543   :  { %2905 = vmatprep.subr.bf16.mxu0 %v3241_v1 }
 0x546   :  { %2906 = vmatpush3.bf16.msra.mxu0 %v3161_v24 }
 0x547   :  { %2907 = vmatprep.subr.bf16.mxu0 %v3241_v1  ;;  %v2851_v1 = vld [vmem:[%s3587_s14] ss:$0 sm:$0xff]  ;;  %s2554_s14 = sshll.u32 %s3244_s12, 4  ;;  %s2555_s14 = int_to_ptr.vmem [resolvable:$true] %s2554_s14 }
 0x548   :  { %s3207_s15 = scalar_lea.vmem %s2555_s14, 16  ;;  %s3211_s25 = scalar_lea.vmem %s2555_s14, 32 }
 0x549   :  { %p3208_p2 = scmp.ne.s32.totalorder %s2555_s14, %s3207_s15  ;;  %p3212_p3 = scmp.lt.s32.totalorder %s2555_s14, %s2555_s14 }
 0x54a   :  { %2908 = vmatpush3.bf16.msra.mxu0 %v3162_v56  ;;  %p3213_p4 = scmp.lt.s32.totalorder %s3211_s25, %s3207_s15 }
 0x54c   :  { %p3214_p5 = por %p3213_p4, %p3212_p3 }
 0x54e   :  { %p3215_p6 = pnand %p3214_p5, %p3208_p2 }
 0x610   :  { %v2878_v25 = vpop.f32.mrb[24].mxu0 }
 0x611   :  { %v2879_v55 = vpop.f32.mrb[25].mxu0 }
 0x612   :  { %v2880_v48 = vadd.f32 %v2879_v55, %v2878_v25  ;;  %v2881_v44 = vpop.f32.mrb[26].mxu0 }
 0x613   :  { %v2882_v49 = vpop.f32.mrb[27].mxu0 }
 0x614   :  { %v2426_v50 = vadd.f32 %v2880_v48, %v2834_v26 }
 0x616   :  { %v2431_v51 = vmax.f32 %v2426_v50, 0.0 }
 0x618   :  { %v2441_v52 = vpack.c.bf16 %v2431_v51, %v2431_v51 }
 0x61a   :  { %2910 = vmatmul.mubr.msk.bf16.vlgmr.msra.gmra.mrb[28].mxu0 %vm269_vm4, %v2441_v52 }
 0x6ed   :  { %v2509_v53 = vpop.f32.mrb[28].mxu0 }
 0x6ee   :  { %v2510_v54 = vadd.f32 %v2851_v1, %v2509_v53  ;;  %v2911_v57 = vpop.f32.mrb[29].mxu0 }
 0x6ef   :  { %v2512_v58 = vpop.f32.mrb[30].mxu0 }
 0x6f0   :  { %v2515_v60 = vmax.f32 %v2510_v54, 0.0  ;;  %v2912_v61 = vpop.f32.mrb[31].mxu0 }
 0x6f2   :  { %v2524_v62 = vmul.f32 %v2857_v59, %v2515_v60 }
 0x6f4   :  { %v2525_v63 = vsel %vm163_vm3, %v2524_v62, 0.0 }
 0x6f5   :  { %2526 = vadd.xlane.f32.xlu0 %v2525_v63 }
 0x70b   :  { %2530 = vperm.xlu0 %2937, %v2517_v0  }
 0x782   :  { %v2527_v2 = vpop.xlane.xlu0 %2526 }
 0x78a   :  { %v2531_v4 = vpop.permute.xlu0 %2530 }
 0x78b   :  { %v2536_v6 = vrot.slane %v2531_v4, %v3424_v43 }
 0x78d   :  { %v2537_v7 = vadd.f32 %v2536_v6, %v2527_v2 }
 0x78f   :  { %v2544_v8 = vrot.slane %v2537_v7, %v2543_v5 }
 0x791   :  { %2547 = vst.msk [vmem:[#allocation8] sm:$0x1] %vm2546_vm5, %v2544_v8 }
 0x792   :  { %3218 = shalt.err (!%p3215_p6)
}
 0x793   :  { %s3219_s8 = scalar_lea.hbm %s3590_s17, 16 }
 0x794   :  { %p3220_p7 = scmp.ne.s32.totalorder %s3590_s17, %s3219_s8  ;;  %p3223_p8 = scmp.lt.u32.totalorder %s3219_s8, %s3590_s17 }
 0x796   :  { %p3225_p9 = pnand %p3223_p8, %p3220_p7 }
 0x798   :  { %3228 = shalt.err (!%p3225_p9)
}
 0x799   :  { %2557 = dma.vmem_to_hbm [thread:$0]  %s2555_s14, 16, %s3590_s17, [#allocation5]  }
 0x79a   :  { %3233 = dma.done.wait [#allocation5], 16  }
 0x79b   :  { %3234 = vsyncadd [#allocation5], 4294967280 }
 0x79c   :  { %2561 = vsyncpa [#allocation4], 1 }
 0x79d   :  { %2562 = vsyncpa [#allocation7], 1 }
 0x79e   :  { %2563 = vsyncpa [#allocation5], 1 }

// kernel: _forward.1
= control target key start
LH: loop header
LB: loop body
LE: loop exit
PB: predicated region body
PF: predicated region fallthrough
CT: control target
= control target key end

     0   :  { %s3573_s0 = inlined_call_operand.vmem [shape: f32[8,4], index: 0, kind: input, shape index: {}]   ;;  %s3574_s1 = inlined_call_operand.vmem [shape: bf16[4,16], index: 1, kind: input, shape index: {}]   ;;  %s3575_s2 = inlined_call_operand.vmem [shape: f32[1,16], index: 2, kind: input, shape index: {}]   ;;  %s3576_s3 = inlined_call_operand.vmem [shape: bf16[16,64], index: 3, kind: input, shape index: {}]   ;;  %s3577_s4 = inlined_call_operand.vmem [shape: f32[1,64], index: 4, kind: input, shape index: {}]   ;;  %s3578_s5 = inlined_call_operand.vmem [shape: bf16[64,256], index: 5, kind: input, shape index: {}]   ;;  %s3579_s6 = inlined_call_operand.vmem [shape: f32[1,256], index: 6, kind: input, shape index: {}]   ;;  %s3580_s7 = inlined_call_operand.hbm [shape: bf16[256,1024], index: 7, kind: input, shape index: {}]   ;;  %s3581_s8 = inlined_call_operand.vmem [shape: f32[1,1024], index: 8, kind: input, shape index: {}]   ;;  %s3582_s9 = inlined_call_operand.hbm [shape: bf16[1024,256], index: 9, kind: input, shape index: {}]   ;;  %s3583_s10 = inlined_call_operand.vmem [shape: f32[1,256], index: 10, kind: input, shape index: {}]   ;;  %s3584_s11 = inlined_call_operand.vmem [shape: bf16[256,64], index: 11, kind: input, shape index: {}]   ;;  %s3585_s12 = inlined_call_operand.vmem [shape: f32[1,64], index: 12, kind: input, shape index: {}]   ;;  %s3586_s13 = inlined_call_operand.vmem [shape: bf16[64,16], index: 13, kind: input, shape index: {}]   ;;  %s3587_s14 = inlined_call_operand.vmem [shape: f32[1,16], index: 14, kind: input, shape index: {}]   ;;  %s3588_s15 = inlined_call_operand.vmem [shape: f32[1,16], index: 15, kind: input, shape index: {}]   ;;  %s3589_s16 = inlined_call_operand.<no memory space> [shape: f32[1,1], index: 16, kind: input, shape index: {}]   ;;  %s3590_s17 = inlined_call_operand.hbm [shape: f32[1,8], index: 17, kind: output, shape index: {}]  }
   0x1   :  { %3591 = sst [smem:[#allocation12_spill]] %s3573_s0  ;;  %v22_v0 = vstv %s3589_s16 }
   0x2   :  { %3592 = sst [smem:[#allocation13_spill]] %s3574_s1  ;;  %23 = vst [vmem:[#allocation2] sm:$0x1] %v22_v0 }
   0x3   :  { %24 = vsyncpa [#allocation4], 0 }
   0x4   :  { %25 = vsyncpa [#allocation7], 0 }
   0x5   :  { %26 = vsyncpa [#allocation5], 0  ;;  %s3235_s26 = smov [#allocation3]   ;;  %s3163_s0 = scalar_lea.hbm %s3580_s7, 16384 }
   0x6   :  { %s46_s27 = sshll.u32 %s3235_s26, 4  ;;  %p3164_p0 = scmp.ne.s32.totalorder %s3580_s7, %s3163_s0  ;;  %s47_s27 = int_to_ptr.vmem [resolvable:$true] %s46_s27 }
   0x7   :  { %p3167_p1 = scmp.lt.u32.totalorder %s3163_s0, %s3580_s7 }
   0x9   :  { %p3169_p2 = pnand %p3167_p1, %p3164_p0 }
   0xb   :  { %3172 = shalt.err (!%p3169_p2)
}
   0xc   :  { %s3173_s16 = scalar_lea.vmem %s47_s27, 16384  ;;  %p3178_p4 = scmp.lt.s32.totalorder %s47_s27, %s47_s27 }
   0xd   :  { %p3174_p3 = scmp.ne.s32.totalorder %s47_s27, %s3173_s16  ;;  %p3179_p5 = scmp.lt.s32.totalorder %s3173_s16, %s3173_s16 }
   0xf   :  { %p3180_p6 = por %p3179_p5, %p3178_p4 }
  0x11   :  { %p3181_p7 = pnand %p3180_p6, %p3174_p3 }
  0x13   :  { %3184 = shalt.err (!%p3181_p7)
}
  0x14   :  { %s3236_s20 = smov 512   ;;  %s3237_s21 = smov 32  }
  0x15   :  { %52 = dma.hbm_to_vmem [thread:$0]  %s3580_s7, 16384, %s47_s27, [#allocation4], %s3236_s20, %s3236_s20, %s3237_s21  }
  0x16   :  { %s3238_s24 = smov [#allocation6]   ;;  %s3185_s29 = scalar_lea.hbm %s3582_s9, 16384 }
  0x17   :  { %s60_s25 = sshll.u32 %s3238_s24, 4  ;;  %p3186_p8 = scmp.ne.s32.totalorder %s3582_s9, %s3185_s29  ;;  %s61_s25 = int_to_ptr.vmem [resolvable:$true] %s60_s25 }
  0x18   :  { %p3189_p9 = scmp.lt.u32.totalorder %s3185_s29, %s3582_s9 }
  0x1a   :  { %p3191_p10 = pnand %p3189_p9, %p3186_p8 }
  0x1c   :  { %3194 = shalt.err (!%p3191_p10)
}
  0x1d   :  { %s3195_s1 = scalar_lea.vmem %s61_s25, 16384  ;;  %p3200_p12 = scmp.lt.s32.totalorder %s61_s25, %s61_s25 }
  0x1e   :  { %p3196_p11 = scmp.ne.s32.totalorder %s61_s25, %s3195_s1  ;;  %p3201_p13 = scmp.lt.s32.totalorder %s3195_s1, %s3195_s1 }
  0x20   :  { %p3202_p0 = por %p3201_p13, %p3200_p12 }
  0x22   :  { %p3203_p1 = pnand %p3202_p0, %p3196_p11 }
  0x24   :  { %3206 = shalt.err (!%p3203_p1)
}
  0x25   :  { %s3239_s7 = smov 128   ;;  %s3240_s27 = smov 8  }
  0x26   :  { %66 = dma.hbm_to_vmem [thread:$0]  %s3582_s9, 16384, %s61_s25, [#allocation7], %s3239_s7, %s3239_s7, %s3240_s27  }
  0x27   :  { %3229 = dma.done.wait [#allocation4], 16384  }
  0x28   :  { %3230 = vsyncadd [#allocation4], 4294950912 }
  0x29   :  { %3231 = dma.done.wait [#allocation7], 16384  }
  0x2a   :  { %3232 = vsyncadd [#allocation7], 4294950912  ;;  %v3241_v1 = vmov 0.0   ;;  %vm3242_vm0 = vmmov 0   ;;  %vm102_vm1 = vcmask 1041408   ;;  %s3593_s23 = sld [smem:[#allocation13_spill]] }
  0x2b   :  { %2889 = vmatprep.subr.bf16.mxu0 %v3241_v1  ;;  %2891 = vmatprep.mubr.msk.bf16.mxu0 %vm3242_vm0, %v3241_v1  ;;  %s3594_s28 = sld [smem:[#allocation12_spill]]  ;;  %v2938_v6 = vld [vmem:[%s3576_s3] sm:$0xff]   ;;  %vm98_vm2 = vcmask 31744   ;;  %vm163_vm3 = vcmask 130048   ;;  %v2944_v17 = vld [vmem:[%s3578_s5 + $0x14] ss:$8 sps:$4 sm:$0xff]  }
  0x2c   :  { %v2941_v7 = vld [vmem:[%s3578_s5 + $0x4] ss:$8 sps:$4 sm:$0xff]   ;;  %v2564_v8 = vld [vmem:[%s3575_s2] ss:$0 sm:$0xff]  ;;  %v2942_v18 = vld [vmem:[%s3578_s5 + $0x10] ss:$8 sps:$4 sm:$0xff]  }
  0x2d   :  { %v2939_v15 = vld [vmem:[%s3578_s5] ss:$8 sps:$4 sm:$0xff]   ;;  %v2947_v19 = vld [vmem:[%s3578_s5 + $0x24] ss:$8 sps:$4 sm:$0xff]   ;;  %v2950_v21 = vld [vmem:[%s3578_s5 + $0x34] ss:$8 sps:$4 sm:$0xff]  }
  0x2e   :  { %v2945_v20 = vld [vmem:[%s3578_s5 + $0x20] ss:$8 sps:$4 sm:$0xff]   ;;  %v2948_v22 = vld [vmem:[%s3578_s5 + $0x30] ss:$8 sps:$4 sm:$0xff]   ;;  %v3243_v23 = vmov 0   ;;  %vm269_vm4 = vcmask 523264  }
  0x2f   :  { %2937 = vset.pattern.permute.xlu0 %v3243_v23  ;;  %v3405_v24 = vld [vmem:[#allocation3] sm:$0xff]  ;;  %v318_v28 = vld [vmem:[#allocation3 + $0x10] sm:$0xff]  ;;  %vm2546_vm5 = vcmask 57344  }
  0x30   :  { %v89_v2 = vld [vmem:[%s3593_s23] sm:$0x3]  ;;  %v322_v29 = vld [vmem:[#allocation3 + $0x30] sm:$0xff] }
  0x31   :  { %v88_v3 = vld [vmem:[%s3594_s28] sm:$0xff]  ;;  %v104_v4 = vsel %vm102_vm1, %v89_v2, 0  ;;  %v2583_v30 = vcombine.high %v318_v28, %v322_v29  ;;  %v2582_v31 = vcombine.low %v318_v28, %v322_v29  ;;  %v326_v32 = vld [vmem:[#allocation3 + $0x50] sm:$0xff] }
  0x32   :  { %v91_v5 = vpack.c.bf16 %v88_v3, %v88_v3  ;;  %2890 = vmatpush3.bf16.msra.mxu0 %v104_v4  ;;  %v3407_v25 = vld [vmem:[#allocation3 + $0x20] sm:$0xff]  ;;  %v330_v33 = vld [vmem:[#allocation3 + $0x70] sm:$0xff] }
  0x33   :  { %2895 = vmatprep.subr.bf16.mxu0 %v3241_v1  ;;  %v2578_v26 = vcombine.low %v3405_v24, %v3407_v25  ;;  %v2579_v27 = vcombine.high %v3405_v24, %v3407_v25  ;;  %1210 = vmatprep.subr.bf16.mxu1 %v2583_v30  ;;  %v2591_v34 = vcombine.high %v326_v32, %v330_v33  ;;  %v334_v36 = vld [vmem:[#allocation3 + $0x90] sm:$0xff]  ;;  %v324_v29 = vld [vmem:[#allocation3 + $0x40] sm:$0xff] }
  0x34   :  { %1211 = vmatpush1.bf16.msra.mxu1 %v2582_v31  ;;  %v2590_v35 = vcombine.low %v326_v32, %v330_v33  ;;  %v338_v37 = vld [vmem:[#allocation3 + $0xb0] sm:$0xff]  ;;  %v328_v30 = vld [vmem:[#allocation3 + $0x60] sm:$0xff] }
  0x35   :  { %2892 = vmatmul.mubr.msk.bf16.vlgmr.msra.gmra.mrb[0].mxu0 %vm98_vm2, %v91_v5  ;;  %1212 = vmatprep.subr.bf16.mxu1 %v2591_v34  ;;  %v2599_v38 = vcombine.high %v334_v36, %v338_v37  ;;  %v2598_v39 = vcombine.low %v334_v36, %v338_v37  ;;  %v342_v40 = vld [vmem:[#allocation3 + $0xd0] sm:$0xff]  ;;  %v2587_v34 = vcombine.high %v324_v29, %v328_v30  ;;  %v336_v36 = vld [vmem:[#allocation3 + $0xa0] sm:$0xff] }
  0x36   :  { %2896 = vmatpush3.bf16.msra.mxu0 %v2938_v6  ;;  %2897 = vmatprep.mubr.msk.bf16.mxu0 %vm3242_vm0, %v3241_v1  ;;  %v346_v41 = vld [vmem:[#allocation3 + $0xf0] sm:$0xff]  ;;  %v2586_v37 = vcombine.low %v324_v29, %v328_v30  ;;  %v436_v29 = vld [vmem:[#allocation3 + $0x3c0] sm:$0xff] }
  0x37   :  { %273 = vmatprep.subr.bf16.mxu0 %v2941_v7  ;;  %v2607_v42 = vcombine.high %v342_v40, %v346_v41  ;;  %v2606_v43 = vcombine.low %v342_v40, %v346_v41  ;;  %v350_v44 = vld [vmem:[#allocation3 + $0x110] sm:$0xff]  ;;  %v344_v40 = vld [vmem:[#allocation3 + $0xe0] sm:$0xff] }
  0x38   :  { %1213 = vmatpush1.bf16.msra.mxu1 %v2590_v35  ;;  %v354_v45 = vld [vmem:[#allocation3 + $0x130] sm:$0xff]  ;;  %v332_v35 = vld [vmem:[#allocation3 + $0x80] sm:$0xff] }
  0x39   :  { %1214 = vmatprep.subr.bf16.mxu1 %v2599_v38  ;;  %v2615_v46 = vcombine.high %v350_v44, %v354_v45  ;;  %v2614_v47 = vcombine.low %v350_v44, %v354_v45  ;;  %v358_v48 = vld [vmem:[#allocation3 + $0x150] sm:$0xff]  ;;  %v2595_v38 = vcombine.high %v332_v35, %v336_v36  ;;  %v2594_v41 = vcombine.low %v332_v35, %v336_v36  ;;  %v352_v44 = vld [vmem:[#allocation3 + $0x120] sm:$0xff] }
  0x3a   :  { %v362_v49 = vld [vmem:[#allocation3 + $0x170] sm:$0xff]  ;;  %v440_v30 = vld [vmem:[#allocation3 + $0x3e0] sm:$0xff] }
  0x3b   :  { %v2623_v50 = vcombine.high %v358_v48, %v362_v49  ;;  %v2622_v51 = vcombine.low %v358_v48, %v362_v49  ;;  %v366_v52 = vld [vmem:[#allocation3 + $0x190] sm:$0xff]  ;;  %v360_v48 = vld [vmem:[#allocation3 + $0x160] sm:$0xff] }
  0x3c   :  { %1215 = vmatpush1.bf16.msra.mxu1 %v2598_v39  ;;  %v370_v53 = vld [vmem:[#allocation3 + $0x1b0] sm:$0xff]  ;;  %v340_v39 = vld [vmem:[#allocation3 + $0xc0] sm:$0xff] }
  0x3d   :  { %1216 = vmatprep.subr.bf16.mxu1 %v2607_v42  ;;  %v2631_v54 = vcombine.high %v366_v52, %v370_v53  ;;  %v2630_v55 = vcombine.low %v366_v52, %v370_v53  ;;  %v374_v56 = vld [vmem:[#allocation3 + $0x1d0] sm:$0xff]  ;;  %v2603_v42 = vcombine.high %v340_v39, %v344_v40  ;;  %v2602_v45 = vcombine.low %v340_v39, %v344_v40  ;;  %v368_v49 = vld [vmem:[#allocation3 + $0x1a0] sm:$0xff] }
  0x3e   :  { %v378_v57 = vld [vmem:[#allocation3 + $0x1f0] sm:$0xff]  ;;  %v372_v52 = vld [vmem:[#allocation3 + $0x1c0] sm:$0xff] }
  0x3f   :  { %v2639_v58 = vcombine.high %v374_v56, %v378_v57  ;;  %v2638_v59 = vcombine.low %v374_v56, %v378_v57  ;;  %v382_v60 = vld [vmem:[#allocation3 + $0x210] sm:$0xff]  ;;  %v376_v53 = vld [vmem:[#allocation3 + $0x1e0] sm:$0xff] }
  0x40   :  { %1217 = vmatpush1.bf16.msra.mxu1 %v2606_v43  ;;  %v386_v61 = vld [vmem:[#allocation3 + $0x230] sm:$0xff]  ;;  %v348_v43 = vld [vmem:[#allocation3 + $0x100] sm:$0xff] }
  0x41   :  { %1218 = vmatprep.subr.bf16.mxu1 %v2615_v46  ;;  %v2647_v62 = vcombine.high %v382_v60, %v386_v61  ;;  %v2646_v63 = vcombine.low %v382_v60, %v386_v61  ;;  %v390_v0 = vld [vmem:[#allocation3 + $0x250] sm:$0xff]  ;;  %v2611_v46 = vcombine.high %v348_v43, %v352_v44  ;;  %v2610_v24 = vcombine.low %v348_v43, %v352_v44  ;;  %v380_v56 = vld [vmem:[#allocation3 + $0x200] sm:$0xff] }
  0x42   :  { %v394_v2 = vld [vmem:[#allocation3 + $0x270] sm:$0xff]  ;;  %v384_v57 = vld [vmem:[#allocation3 + $0x220] sm:$0xff] }
  0x43   :  { %v2655_v3 = vcombine.high %v390_v0, %v394_v2  ;;  %v2654_v4 = vcombine.low %v390_v0, %v394_v2  ;;  %v398_v5 = vld [vmem:[#allocation3 + $0x290] sm:$0xff]  ;;  %v388_v60 = vld [vmem:[#allocation3 + $0x240] sm:$0xff] }
  0x44   :  { %1219 = vmatpush1.bf16.msra.mxu1 %v2614_v47  ;;  %v402_v6 = vld [vmem:[#allocation3 + $0x2b0] sm:$0xff]  ;;  %v356_v47 = vld [vmem:[#allocation3 + $0x140] sm:$0xff] }
  0x45   :  { %1220 = vmatprep.subr.bf16.mxu1 %v2623_v50  ;;  %v2663_v7 = vcombine.high %v398_v5, %v402_v6  ;;  %v2619_v25 = vcombine.high %v356_v47, %v360_v48  ;;  %v2618_v50 = vcombine.low %v356_v47, %v360_v48  ;;  %v392_v61 = vld [vmem:[#allocation3 + $0x260] sm:$0xff] }
  0x46   :  { %v396_v0 = vld [vmem:[#allocation3 + $0x280] sm:$0xff] }
  0x47   :  { %v400_v2 = vld [vmem:[#allocation3 + $0x2a0] sm:$0xff] }
  0x48   :  { %1221 = vmatpush1.bf16.msra.mxu1 %v2622_v51  ;;  %v216_v44 = vld [vmem:[%s3579_s6] sm:$0x3] }
  0x49   :  { %1222 = vmatprep.subr.bf16.mxu1 %v2631_v54 }
  0x4c   :  { %1223 = vmatpush1.bf16.msra.mxu1 %v2630_v55  ;;  %v2635_v55 = vcombine.high %v372_v52, %v376_v53 }
  0x4d   :  { %1224 = vmatprep.subr.bf16.mxu1 %v2639_v58  ;;  %v2634_v58 = vcombine.low %v372_v52, %v376_v53  ;;  %v325_v53 = vld [vmem:[#allocation3 + $0x48] sm:$0xff] }
  0x50   :  { %1225 = vmatpush1.bf16.msra.mxu1 %v2638_v59  ;;  %v2643_v59 = vcombine.high %v380_v56, %v384_v57 }
  0x51   :  { %1226 = vmatprep.subr.bf16.mxu1 %v2647_v62  ;;  %v2642_v62 = vcombine.low %v380_v56, %v384_v57 }
  0x54   :  { %1227 = vmatpush1.bf16.msra.mxu1 %v2646_v63  ;;  %v2651_v63 = vcombine.high %v388_v60, %v392_v61 }
  0x55   :  { %1228 = vmatprep.subr.bf16.mxu1 %v2655_v3  ;;  %v2650_v3 = vcombine.low %v388_v60, %v392_v61  ;;  %v2951_v60 = vld [vmem:[#allocation6] ss:$8 sps:$4 sm:$0xff]   ;;  %v2953_v61 = vld [vmem:[#allocation6 + $0x4] ss:$8 sps:$4 sm:$0xff]  }
  0x58   :  { %1229 = vmatpush1.bf16.msra.mxu1 %v2654_v4  ;;  %v2659_v4 = vcombine.high %v396_v0, %v400_v2 }
  0x59   :  { %1230 = vmatprep.subr.bf16.mxu1 %v2663_v7  ;;  %v2658_v7 = vcombine.low %v396_v0, %v400_v2  ;;  %v341_v2 = vld [vmem:[#allocation3 + $0xc8] sm:$0xff] }
 0x108   :  { %v140_v9 = vpop.f32.mrb[0].mxu0 }
 0x109   :  { %v141_v10 = vadd.f32 %v2564_v8, %v140_v9  ;;  %v2893_v11 = vpop.f32.mrb[1].mxu0  ;;  %v2662_v8 = vcombine.low %v398_v5, %v402_v6  ;;  %v406_v9 = vld [vmem:[#allocation3 + $0x2d0] sm:$0xff]  ;;  %v404_v5 = vld [vmem:[#allocation3 + $0x2c0] sm:$0xff] }
 0x10a   :  { %v143_v12 = vpop.f32.mrb[2].mxu0  ;;  %v408_v6 = vld [vmem:[#allocation3 + $0x2e0] sm:$0xff] }
 0x10b   :  { %v146_v13 = vmax.f32 %v141_v10, 0.0  ;;  %v2894_v14 = vpop.f32.mrb[3].mxu0  ;;  %1231 = vmatpush1.bf16.msra.mxu1 %v2662_v8  ;;  %v410_v10 = vld [vmem:[#allocation3 + $0x2f0] sm:$0xff]  ;;  %v2667_v8 = vcombine.high %v404_v5, %v408_v6 }
 0x10c   :  { %v2671_v11 = vcombine.high %v406_v9, %v410_v10  ;;  %v2670_v12 = vcombine.low %v406_v9, %v410_v10  ;;  %v418_v14 = vld [vmem:[#allocation3 + $0x330] sm:$0xff]  ;;  %v412_v9 = vld [vmem:[#allocation3 + $0x300] sm:$0xff] }
 0x10d   :  { %v150_v16 = vpack.c.bf16 %v146_v13, %v146_v13  ;;  %v414_v13 = vld [vmem:[#allocation3 + $0x310] sm:$0xff]  ;;  %v416_v10 = vld [vmem:[#allocation3 + $0x320] sm:$0xff] }
 0x10e   :  { %1232 = vmatprep.subr.bf16.mxu1 %v2671_v11  ;;  %v2666_v11 = vcombine.low %v404_v5, %v408_v6  ;;  %v2959_v5 = vld [vmem:[#allocation6 + $0x24] ss:$8 sps:$4 sm:$0xff]  }
 0x10f   :  { %2898 = vmatmul.mubr.msk.bf16.vlgmr.msra.gmra.mrb[4].mxu0 %vm163_vm3, %v150_v16  ;;  %1233 = vmatpush1.bf16.msra.mxu1 %v2670_v12  ;;  %v2678_v16 = vcombine.low %v414_v13, %v418_v14  ;;  %v2675_v12 = vcombine.high %v412_v9, %v416_v10 }
 0x110   :  { %274 = vmatpush1.bf16.msra.mxu0 %v2939_v15  ;;  %305 = vmatprep.mubr.bf16.mxu0 %v3243_v23  ;;  %v2679_v15 = vcombine.high %v414_v13, %v418_v14  ;;  %v420_v13 = vld [vmem:[#allocation3 + $0x340] sm:$0xff] }
 0x111   :  { %275 = vmatprep.subr.bf16.mxu0 %v2944_v17  ;;  %v422_v17 = vld [vmem:[#allocation3 + $0x350] sm:$0xff]  ;;  %v424_v14 = vld [vmem:[#allocation3 + $0x360] sm:$0xff] }
 0x112   :  { %1234 = vmatprep.subr.bf16.mxu1 %v2679_v15  ;;  %v2674_v15 = vcombine.low %v412_v9, %v416_v10  ;;  %v353_v9 = vld [vmem:[#allocation3 + $0x128] sm:$0xff] }
 0x113   :  { %1235 = vmatpush1.bf16.msra.mxu1 %v2678_v16  ;;  %v2683_v16 = vcombine.high %v420_v13, %v424_v14  ;;  %v2957_v10 = vld [vmem:[#allocation6 + $0x20] ss:$8 sps:$4 sm:$0xff]  }
 0x114   :  { %276 = vmatpush1.bf16.msra.mxu0 %v2942_v18  ;;  %v426_v18 = vld [vmem:[#allocation3 + $0x370] sm:$0xff] }
 0x115   :  { %277 = vmatprep.subr.bf16.mxu0 %v2947_v19  ;;  %v2687_v19 = vcombine.high %v422_v17, %v426_v18 }
 0x117   :  { %1236 = vmatprep.subr.bf16.mxu1 %v2687_v19  ;;  %v432_v19 = vld [vmem:[#allocation3 + $0x3a0] sm:$0xff] }
 0x118   :  { %278 = vmatpush1.bf16.msra.mxu0 %v2945_v20  ;;  %v2686_v20 = vcombine.low %v422_v17, %v426_v18  ;;  %v2682_v17 = vcombine.low %v420_v13, %v424_v14  ;;  %v428_v18 = vld [vmem:[#allocation3 + $0x380] sm:$0xff]  ;;  %v357_v14 = vld [vmem:[#allocation3 + $0x148] sm:$0xff] }
 0x119   :  { %279 = vmatprep.subr.bf16.mxu0 %v2950_v21  ;;  %v2566_v21 = vld [vmem:[%s3577_s4] ss:$0 sm:$0xff] }
 0x11a   :  { %1237 = vmatpush1.bf16.msra.mxu1 %v2686_v20  ;;  %v2691_v20 = vcombine.high %v428_v18, %v432_v19 }
 0x11c   :  { %280 = vmatpush1.bf16.msra.mxu0 %v2948_v22 }
 0x11d   :  { %1128 = vmatprep.subr.bf16.mxu0 %v2579_v27 }
 0x1e2   :  { %v201_v22 = vpop.f32.mrb[4].mxu0 }
 0x1e3   :  { %v202_v23 = vadd.f32 %v2566_v21, %v201_v22  ;;  %v2899_v27 = vpop.f32.mrb[5].mxu0  ;;  %v430_v21 = vld [vmem:[#allocation3 + $0x390] sm:$0xff] }
 0x1e4   :  { %v204_v28 = vpop.f32.mrb[6].mxu0  ;;  %v434_v22 = vld [vmem:[#allocation3 + $0x3b0] sm:$0xff] }
 0x1e5   :  { %v207_v31 = vmax.f32 %v202_v23, 0.0  ;;  %v2900_v32 = vpop.f32.mrb[7].mxu0  ;;  %v2690_v23 = vcombine.low %v428_v18, %v432_v19  ;;  %v2695_v27 = vcombine.high %v430_v21, %v434_v22  ;;  %v2694_v28 = vcombine.low %v430_v21, %v434_v22  ;;  %v369_v21 = vld [vmem:[#allocation3 + $0x1a8] sm:$0xff] }
 0x1e6   :  { %v438_v32 = vld [vmem:[#allocation3 + $0x3d0] sm:$0xff]  ;;  %v2963_v22 = vld [vmem:[#allocation6 + $0x40] ss:$8 sps:$4 sm:$0xff]  }
 0x1e7   :  { %v217_v33 = vpack.c.bf16 %v207_v31, %v207_v31  ;;  %1238 = vmatprep.subr.bf16.mxu1 %v2695_v27  ;;  %v2699_v31 = vcombine.high %v436_v29, %v440_v30 }
 0x1e8   :  { %1239 = vmatpush1.bf16.msra.mxu1 %v2694_v28 }
 0x1e9   :  { %2577 = vmatmul.mubr.msk.bf16.vlgmr.msra.gmra.mrb[8].mxu0 %vm269_vm4, %v217_v33  ;;  %v442_v33 = vld [vmem:[#allocation3 + $0x3f0] sm:$0xff] }
 0x1ea   :  { %1129 = vmatpush1.bf16.msra.mxu0 %v2578_v26  ;;  %v364_v26 = vld [vmem:[#allocation3 + $0x180] sm:$0xff]  ;;  %v2703_v35 = vcombine.high %v438_v32, %v442_v33  ;;  %v2702_v36 = vcombine.low %v438_v32, %v442_v33 }
 0x1eb   :  { %1130 = vmatprep.subr.bf16.mxu0 %v2587_v34  ;;  %v2627_v51 = vcombine.high %v364_v26, %v368_v49  ;;  %v2626_v54 = vcombine.low %v364_v26, %v368_v49  ;;  %v2698_v34 = vcombine.low %v436_v29, %v440_v30  ;;  %v373_v29 = vld [vmem:[#allocation3 + $0x1c8] sm:$0xff] }
 0x1ec   :  { %1240 = vmatprep.subr.bf16.mxu1 %v2703_v35  ;;  %v377_v30 = vld [vmem:[#allocation3 + $0x1e8] sm:$0xff] }
 0x1ed   :  { %1241 = vmatpush1.bf16.msra.mxu1 %v2702_v36  ;;  %v2971_v32 = vld [vmem:[#allocation6 + $0x64] ss:$8 sps:$4 sm:$0xff]  }
 0x1ee   :  { %1131 = vmatpush1.bf16.msra.mxu0 %v2586_v37  ;;  %v317_v37 = vld [vmem:[#allocation3 + $0x8] sm:$0xff]  ;;  %2088 = vmatprep.subr.bf16.mxu1 %v2953_v61 }
 0x1ef   :  { %1132 = vmatprep.subr.bf16.mxu0 %v2595_v38  ;;  %v321_v38 = vld [vmem:[#allocation3 + $0x28] sm:$0xff] }
 0x1f0   :  { %v2581_v39 = vcombine.high %v317_v37, %v321_v38  ;;  %v2580_v40 = vcombine.low %v317_v37, %v321_v38  ;;  %v381_v35 = vld [vmem:[#allocation3 + $0x208] sm:$0xff]  ;;  %v2974_v38 = vld [vmem:[#allocation6 + $0x74] ss:$8 sps:$4 sm:$0xff]  }
 0x1f1   :  { %v385_v36 = vld [vmem:[#allocation3 + $0x228] sm:$0xff] }
 0x1f2   :  { %1133 = vmatpush1.bf16.msra.mxu0 %v2594_v41  ;;  %v219_v41 = vlaneseq  ;;  %v2969_v37 = vld [vmem:[#allocation6 + $0x60] ss:$8 sps:$4 sm:$0xff]  }
 0x1f3   :  { %1134 = vmatprep.subr.bf16.mxu0 %v2603_v42 }
 0x1f4   :  { %v3421_v42 = vshrl.u32 %v219_v41, 7 }
 0x1f6   :  { %1135 = vmatpush1.bf16.msra.mxu0 %v2602_v45  ;;  %v3424_v43 = vsub.s32 0, %v3421_v42  ;;  %v3430_v45 = vsub.s32 1, %v3421_v42 }
 0x1f7   :  { %1136 = vmatprep.subr.bf16.mxu0 %v2611_v46 }
 0x1f8   :  { %v222_v46 = vrot.slane %v216_v44, %v3424_v43  ;;  %v226_v47 = vrot.slane %v216_v44, %v3430_v45  ;;  %v389_v44 = vld [vmem:[#allocation3 + $0x248] sm:$0xff] }
 0x1fa   :  { %1137 = vmatpush1.bf16.msra.mxu0 %v2610_v24 }
 0x1fb   :  { %1138 = vmatprep.subr.bf16.mxu0 %v2619_v25 }
 0x1fe   :  { %1139 = vmatpush1.bf16.msra.mxu0 %v2618_v50 }
 0x1ff   :  { %1140 = vmatprep.subr.bf16.mxu0 %v2627_v51 }
 0x202   :  { %1141 = vmatpush1.bf16.msra.mxu0 %v2626_v54  ;;  %v329_v54 = vld [vmem:[#allocation3 + $0x68] sm:$0xff] }
 0x203   :  { %1142 = vmatprep.subr.bf16.mxu0 %v2635_v55  ;;  %v2589_v57 = vcombine.high %v325_v53, %v329_v54 }
 0x206   :  { %1143 = vmatpush1.bf16.msra.mxu0 %v2634_v58  ;;  %v333_v58 = vld [vmem:[#allocation3 + $0x88] sm:$0xff] }
 0x207   :  { %1144 = vmatprep.subr.bf16.mxu0 %v2643_v59  ;;  %v337_v59 = vld [vmem:[#allocation3 + $0xa8] sm:$0xff] }
 0x208   :  { %v2597_v0 = vcombine.high %v333_v58, %v337_v59  ;;  %v2596_v6 = vcombine.low %v333_v58, %v337_v59  ;;  %v2978_v58 = vld [vmem:[#allocation6 + $0x90] ss:$8 sps:$4 sm:$0xff]   ;;  %v2983_v59 = vld [vmem:[#allocation6 + $0xa4] ss:$8 sps:$4 sm:$0xff]  }
 0x20a   :  { %1145 = vmatpush1.bf16.msra.mxu0 %v2642_v62  ;;  %v2588_v62 = vcombine.low %v325_v53, %v329_v54  ;;  %v405_v54 = vld [vmem:[#allocation3 + $0x2c8] sm:$0xff] }
 0x20b   :  { %1146 = vmatprep.subr.bf16.mxu0 %v2651_v63  ;;  %v2956_v63 = vld [vmem:[#allocation6 + $0x14] ss:$8 sps:$4 sm:$0xff]  }
 0x20e   :  { %1147 = vmatpush1.bf16.msra.mxu0 %v2650_v3  ;;  %v345_v3 = vld [vmem:[#allocation3 + $0xe8] sm:$0xff] }
 0x20f   :  { %1148 = vmatprep.subr.bf16.mxu0 %v2659_v4  ;;  %v2954_v4 = vld [vmem:[#allocation6 + $0x10] ss:$8 sps:$4 sm:$0xff]  }
 0x212   :  { %1149 = vmatpush1.bf16.msra.mxu0 %v2658_v7  ;;  %v2605_v7 = vcombine.high %v341_v2, %v345_v3 }
 0x213   :  { %1150 = vmatprep.subr.bf16.mxu0 %v2667_v8  ;;  %v349_v8 = vld [vmem:[#allocation3 + $0x108] sm:$0xff] }
 0x214   :  { %v2613_v13 = vcombine.high %v349_v8, %v353_v9  ;;  %v2612_v18 = vcombine.low %v349_v8, %v353_v9  ;;  %v2989_v8 = vld [vmem:[#allocation6 + $0xc4] ss:$8 sps:$4 sm:$0xff]  }
 0x216   :  { %1151 = vmatpush1.bf16.msra.mxu0 %v2666_v11  ;;  %v2962_v11 = vld [vmem:[#allocation6 + $0x34] ss:$8 sps:$4 sm:$0xff]  }
 0x217   :  { %1152 = vmatprep.subr.bf16.mxu0 %v2675_v12  ;;  %v2604_v12 = vcombine.low %v341_v2, %v345_v3  ;;  %v2986_v2 = vld [vmem:[#allocation6 + $0xb4] ss:$8 sps:$4 sm:$0xff]  }
 0x21a   :  { %1153 = vmatpush1.bf16.msra.mxu0 %v2674_v15  ;;  %v361_v15 = vld [vmem:[#allocation3 + $0x168] sm:$0xff] }
 0x21b   :  { %1154 = vmatprep.subr.bf16.mxu0 %v2683_v16  ;;  %v2960_v16 = vld [vmem:[#allocation6 + $0x30] ss:$8 sps:$4 sm:$0xff]   ;;  %v2621_v19 = vcombine.high %v357_v14, %v361_v15  ;;  %v2620_v27 = vcombine.low %v357_v14, %v361_v15  ;;  %v2992_v14 = vld [vmem:[#allocation6 + $0xd4] ss:$8 sps:$4 sm:$0xff]  }
 0x21e   :  { %1155 = vmatpush1.bf16.msra.mxu0 %v2682_v17  ;;  %v2965_v17 = vld [vmem:[#allocation6 + $0x44] ss:$8 sps:$4 sm:$0xff]  }
 0x21f   :  { %1156 = vmatprep.subr.bf16.mxu0 %v2691_v20  ;;  %v365_v20 = vld [vmem:[#allocation3 + $0x188] sm:$0xff] }
 0x220   :  { %v2629_v28 = vcombine.high %v365_v20, %v369_v21  ;;  %v2628_v33 = vcombine.low %v365_v20, %v369_v21 }
 0x222   :  { %1157 = vmatpush1.bf16.msra.mxu0 %v2690_v23  ;;  %v2968_v23 = vld [vmem:[#allocation6 + $0x54] ss:$8 sps:$4 sm:$0xff]  }
 0x223   :  { %1158 = vmatprep.subr.bf16.mxu0 %v2699_v31  ;;  %v2966_v31 = vld [vmem:[#allocation6 + $0x50] ss:$8 sps:$4 sm:$0xff]  }
 0x226   :  { %1159 = vmatpush1.bf16.msra.mxu0 %v2698_v34  ;;  %v2637_v34 = vcombine.high %v373_v29, %v377_v30 }
 0x227   :  { %1169 = vmatprep.subr.bf16.mxu0 %v2581_v39  ;;  %v2636_v39 = vcombine.low %v373_v29, %v377_v30  ;;  %v327_v29 = vld [vmem:[#allocation3 + $0x58] sm:$0xff] }
 0x228   :  { %v331_v30 = vld [vmem:[#allocation3 + $0x78] sm:$0xff] }
 0x2bc   :  { %v307_v48 = vpop.f32.mrb[8].mxu0 }
 0x2bd   :  { %v308_v24 = vadd.f32 %v307_v48, %v222_v46  ;;  %v309_v25 = vpop.f32.mrb[9].mxu0  ;;  %v393_v46 = vld [vmem:[#allocation3 + $0x268] sm:$0xff] }
 0x2be   :  { %v310_v26 = vadd.f32 %v309_v25, %v226_v47  ;;  %v311_v49 = vpop.f32.mrb[10].mxu0  ;;  %v2972_v47 = vld [vmem:[#allocation6 + $0x70] ss:$8 sps:$4 sm:$0xff]   ;;  %v2977_v48 = vld [vmem:[#allocation6 + $0x84] ss:$8 sps:$4 sm:$0xff]   ;;  %v2653_v25 = vcombine.high %v389_v44, %v393_v46 }
 0x2bf   :  { %v314_v50 = vmax.f32 %v308_v24, 0.0  ;;  %v312_v51 = vpop.f32.mrb[11].mxu0  ;;  %v2644_v24 = vcombine.low %v381_v35, %v385_v36  ;;  %v401_v49 = vld [vmem:[#allocation3 + $0x2a8] sm:$0xff] }
 0x2c0   :  { %v315_v52 = vmax.f32 %v310_v26, 0.0  ;;  %v397_v26 = vld [vmem:[#allocation3 + $0x288] sm:$0xff]  ;;  %v2980_v51 = vld [vmem:[#allocation6 + $0x94] ss:$8 sps:$4 sm:$0xff]  }
 0x2c1   :  { %v3436_v56 = vpack.c.bf16 %v314_v50, %v314_v50  ;;  %v2975_v50 = vld [vmem:[#allocation6 + $0x80] ss:$8 sps:$4 sm:$0xff]   ;;  %v2661_v53 = vcombine.high %v397_v26, %v401_v49 }
 0x2c2   :  { %v3434_v55 = vpack.c.bf16 %v315_v52, %v315_v52  ;;  %v2652_v52 = vcombine.low %v389_v44, %v393_v46  ;;  %v351_v44 = vld [vmem:[#allocation3 + $0x118] sm:$0xff] }
 0x2c3   :  { %v355_v46 = vld [vmem:[#allocation3 + $0x138] sm:$0xff] }
 0x2c4   :  { %1160 = vmatprep.mubr.bf16.mxu0 %v3434_v55  ;;  %1242 = vmatprep.mubr.bf16.mxu1 %v3434_v55 }
 0x2c5   :  { %1161 = vmatmul.mubr.bf16.vlgmr.msra.gmra.mrb[12].mxu0 %v3436_v56  ;;  %1243 = vmatmul.mubr.bf16.vlgmr.msra.gmra.mrb[0].mxu1 %v3436_v56 }
 0x2c6   :  { %1170 = vmatpush1.bf16.msra.mxu0 %v2580_v40  ;;  %1201 = vmatprep.mubr.bf16.mxu0 %v3434_v55  ;;  %v2645_v40 = vcombine.high %v381_v35, %v385_v36  ;;  %v2592_v35 = vcombine.low %v327_v29, %v331_v30 }
 0x2c7   :  { %1171 = vmatprep.subr.bf16.mxu0 %v2589_v57  ;;  %2089 = vmatpush1.bf16.msra.mxu1 %v2951_v60  ;;  %v409_v57 = vld [vmem:[#allocation3 + $0x2e8] sm:$0xff]  ;;  %v2660_v60 = vcombine.low %v397_v26, %v401_v49  ;;  %v2616_v26 = vcombine.low %v351_v44, %v355_v46  ;;  %v367_v49 = vld [vmem:[#allocation3 + $0x198] sm:$0xff] }
 0x2c8   :  { %2090 = vmatprep.subr.bf16.mxu1 %v2956_v63  ;;  %v2669_v61 = vcombine.high %v405_v54, %v409_v57  ;;  %v417_v63 = vld [vmem:[#allocation3 + $0x328] sm:$0xff]  ;;  %v2668_v3 = vcombine.low %v405_v54, %v409_v57  ;;  %v375_v54 = vld [vmem:[#allocation3 + $0x1d8] sm:$0xff] }
 0x2c9   :  { %v379_v57 = vld [vmem:[#allocation3 + $0x1f8] sm:$0xff] }
 0x2ca   :  { %1172 = vmatpush1.bf16.msra.mxu0 %v2588_v62  ;;  %v413_v62 = vld [vmem:[#allocation3 + $0x308] sm:$0xff] }
 0x2cb   :  { %1173 = vmatprep.subr.bf16.mxu0 %v2597_v0  ;;  %2091 = vmatpush1.bf16.msra.mxu1 %v2954_v4  ;;  %v2981_v0 = vld [vmem:[#allocation6 + $0xa0] ss:$8 sps:$4 sm:$0xff]   ;;  %v2677_v4 = vcombine.high %v413_v62, %v417_v63  ;;  %v2676_v9 = vcombine.low %v413_v62, %v417_v63  ;;  %v383_v62 = vld [vmem:[#allocation3 + $0x218] sm:$0xff] }
 0x2cc   :  { %2092 = vmatprep.subr.bf16.mxu1 %v2959_v5  ;;  %v421_v5 = vld [vmem:[#allocation3 + $0x348] sm:$0xff]  ;;  %v387_v63 = vld [vmem:[#allocation3 + $0x238] sm:$0xff] }
 0x2ce   :  { %1174 = vmatpush1.bf16.msra.mxu0 %v2596_v6  ;;  %v425_v6 = vld [vmem:[#allocation3 + $0x368] sm:$0xff] }
 0x2cf   :  { %1175 = vmatprep.subr.bf16.mxu0 %v2605_v7  ;;  %2093 = vmatpush1.bf16.msra.mxu1 %v2957_v10  ;;  %v2984_v7 = vld [vmem:[#allocation6 + $0xb0] ss:$8 sps:$4 sm:$0xff]   ;;  %v2685_v10 = vcombine.high %v421_v5, %v425_v6  ;;  %v2684_v15 = vcombine.low %v421_v5, %v425_v6 }
 0x2d0   :  { %2094 = vmatprep.subr.bf16.mxu1 %v2962_v11  ;;  %v429_v11 = vld [vmem:[#allocation3 + $0x388] sm:$0xff]  ;;  %v391_v5 = vld [vmem:[#allocation3 + $0x258] sm:$0xff] }
 0x2d1   :  { %v395_v6 = vld [vmem:[#allocation3 + $0x278] sm:$0xff] }
 0x2d2   :  { %1176 = vmatpush1.bf16.msra.mxu0 %v2604_v12  ;;  %v433_v12 = vld [vmem:[#allocation3 + $0x3a8] sm:$0xff] }
 0x2d3   :  { %1177 = vmatprep.subr.bf16.mxu0 %v2613_v13  ;;  %2095 = vmatpush1.bf16.msra.mxu1 %v2960_v16  ;;  %v2987_v13 = vld [vmem:[#allocation6 + $0xc0] ss:$8 sps:$4 sm:$0xff]   ;;  %v2693_v16 = vcombine.high %v429_v11, %v433_v12  ;;  %v2692_v20 = vcombine.low %v429_v11, %v433_v12  ;;  %v2656_v11 = vcombine.low %v391_v5, %v395_v6 }
 0x2d4   :  { %2096 = vmatprep.subr.bf16.mxu1 %v2965_v17  ;;  %v437_v17 = vld [vmem:[#allocation3 + $0x3c8] sm:$0xff] }
 0x2d6   :  { %1178 = vmatpush1.bf16.msra.mxu0 %v2612_v18  ;;  %v441_v18 = vld [vmem:[#allocation3 + $0x3e8] sm:$0xff] }
 0x2d7   :  { %1179 = vmatprep.subr.bf16.mxu0 %v2621_v19  ;;  %2097 = vmatpush1.bf16.msra.mxu1 %v2963_v22  ;;  %v2990_v19 = vld [vmem:[#allocation6 + $0xd0] ss:$8 sps:$4 sm:$0xff]   ;;  %v2701_v21 = vcombine.high %v437_v17, %v441_v18 }
 0x2d8   :  { %2098 = vmatprep.subr.bf16.mxu1 %v2968_v23  ;;  %v319_v22 = vld [vmem:[#allocation3 + $0x18] sm:$0xff] }
 0x2d9   :  { %v323_v23 = vld [vmem:[#allocation3 + $0x38] sm:$0xff] }
 0x2da   :  { %1180 = vmatpush1.bf16.msra.mxu0 %v2620_v27  ;;  %v2700_v27 = vcombine.low %v437_v17, %v441_v18  ;;  %v415_v17 = vld [vmem:[#allocation3 + $0x318] sm:$0xff] }
 0x2db   :  { %1181 = vmatprep.subr.bf16.mxu0 %v2629_v28  ;;  %2099 = vmatpush1.bf16.msra.mxu1 %v2966_v31  ;;  %v2585_v28 = vcombine.high %v319_v22, %v323_v23  ;;  %v2584_v31 = vcombine.low %v319_v22, %v323_v23  ;;  %v419_v18 = vld [vmem:[#allocation3 + $0x338] sm:$0xff] }
 0x2dc   :  { %2100 = vmatprep.subr.bf16.mxu1 %v2971_v32  ;;  %v2593_v32 = vcombine.high %v327_v29, %v331_v30  ;;  %v427_v22 = vld [vmem:[#allocation3 + $0x378] sm:$0xff]  ;;  %v2680_v23 = vcombine.low %v415_v17, %v419_v18 }
 0x2dd   :  { %v435_v29 = vld [vmem:[#allocation3 + $0x3b8] sm:$0xff] }
 0x2de   :  { %1182 = vmatpush1.bf16.msra.mxu0 %v2628_v33  ;;  %v335_v33 = vld [vmem:[#allocation3 + $0x98] sm:$0xff] }
 0x2df   :  { %1183 = vmatprep.subr.bf16.mxu0 %v2637_v34  ;;  %2101 = vmatpush1.bf16.msra.mxu1 %v2969_v37  ;;  %v339_v34 = vld [vmem:[#allocation3 + $0xb8] sm:$0xff] }
 0x2e0   :  { %2102 = vmatprep.subr.bf16.mxu1 %v2974_v38  ;;  %v2601_v36 = vcombine.high %v335_v33, %v339_v34  ;;  %v343_v37 = vld [vmem:[#allocation3 + $0xd8] sm:$0xff] }
 0x2e1   :  { %v347_v38 = vld [vmem:[#allocation3 + $0xf8] sm:$0xff] }
 0x2e2   :  { %1184 = vmatpush1.bf16.msra.mxu0 %v2636_v39  ;;  %v2600_v39 = vcombine.low %v335_v33, %v339_v34  ;;  %v443_v33 = vld [vmem:[#allocation3 + $0x3f8] sm:$0xff] }
 0x2e3   :  { %1185 = vmatprep.subr.bf16.mxu0 %v2645_v40  ;;  %2103 = vmatpush1.bf16.msra.mxu1 %v2972_v47  ;;  %v2609_v40 = vcombine.high %v343_v37, %v347_v38  ;;  %v2608_v47 = vcombine.low %v343_v37, %v347_v38  ;;  %v3449_v37 = vld [vmem:[%s3581_s8] sm:$0xff] }
 0x2e4   :  { %2104 = vmatprep.subr.bf16.mxu1 %v2977_v48  ;;  %v2617_v48 = vcombine.high %v351_v44, %v355_v46  ;;  %v451_v38 = vrot.slane %v3449_v37, %v3424_v43 }
 0x2e6   :  { %1186 = vmatpush1.bf16.msra.mxu0 %v2644_v24  ;;  %v359_v24 = vld [vmem:[#allocation3 + $0x158] sm:$0xff] }
 0x2e7   :  { %1187 = vmatprep.subr.bf16.mxu0 %v2653_v25  ;;  %2105 = vmatpush1.bf16.msra.mxu1 %v2975_v50  ;;  %v363_v25 = vld [vmem:[#allocation3 + $0x178] sm:$0xff] }
 0x2e8   :  { %2106 = vmatprep.subr.bf16.mxu1 %v2980_v51  ;;  %v371_v50 = vld [vmem:[#allocation3 + $0x1b8] sm:$0xff]  ;;  %v2624_v51 = vcombine.low %v359_v24, %v363_v25 }
 0x2ea   :  { %1188 = vmatpush1.bf16.msra.mxu0 %v2652_v52  ;;  %v2633_v52 = vcombine.high %v367_v49, %v371_v50 }
 0x2eb   :  { %1189 = vmatprep.subr.bf16.mxu0 %v2661_v53  ;;  %2107 = vmatpush1.bf16.msra.mxu1 %v2978_v58  ;;  %v2995_v53 = vld [vmem:[#allocation6 + $0xe4] ss:$8 sps:$4 sm:$0xff]   ;;  %v2993_v58 = vld [vmem:[#allocation6 + $0xe0] ss:$8 sps:$4 sm:$0xff]  }
 0x2ec   :  { %2108 = vmatprep.subr.bf16.mxu1 %v2983_v59  ;;  %v2632_v59 = vcombine.low %v367_v49, %v371_v50 }
 0x2ee   :  { %1190 = vmatpush1.bf16.msra.mxu0 %v2660_v60  ;;  %v2641_v60 = vcombine.high %v375_v54, %v379_v57 }
 0x2ef   :  { %1191 = vmatprep.subr.bf16.mxu0 %v2669_v61  ;;  %2109 = vmatpush1.bf16.msra.mxu1 %v2981_v0  ;;  %v2998_v61 = vld [vmem:[#allocation6 + $0xf4] ss:$8 sps:$4 sm:$0xff]   ;;  %v2996_v0 = vld [vmem:[#allocation6 + $0xf0] ss:$8 sps:$4 sm:$0xff]  }
 0x2f0   :  { %2110 = vmatprep.subr.bf16.mxu1 %v2986_v2  ;;  %v2640_v2 = vcombine.low %v375_v54, %v379_v57  ;;  %v3004_v54 = vld [vmem:[#allocation6 + $0x114] ss:$8 sps:$4 sm:$0xff]   ;;  %v3002_v57 = vld [vmem:[#allocation6 + $0x110] ss:$8 sps:$4 sm:$0xff]  }
 0x2f2   :  { %1192 = vmatpush1.bf16.msra.mxu0 %v2668_v3  ;;  %v2649_v3 = vcombine.high %v383_v62, %v387_v63 }
 0x2f3   :  { %1193 = vmatprep.subr.bf16.mxu0 %v2677_v4  ;;  %2111 = vmatpush1.bf16.msra.mxu1 %v2984_v7  ;;  %v3001_v4 = vld [vmem:[#allocation6 + $0x104] ss:$8 sps:$4 sm:$0xff]   ;;  %v2648_v7 = vcombine.low %v383_v62, %v387_v63  ;;  %v3011_v63 = vld [vmem:[#allocation6 + $0x140] ss:$8 sps:$4 sm:$0xff]  }
 0x2f4   :  { %2112 = vmatprep.subr.bf16.mxu1 %v2989_v8  ;;  %v2657_v8 = vcombine.high %v391_v5, %v395_v6  ;;  %v3013_v62 = vld [vmem:[#allocation6 + $0x144] ss:$8 sps:$4 sm:$0xff]   ;;  %v3022_v5 = vld [vmem:[#allocation6 + $0x174] ss:$8 sps:$4 sm:$0xff]   ;;  %v3020_v6 = vld [vmem:[#allocation6 + $0x170] ss:$8 sps:$4 sm:$0xff]  }
 0x2f6   :  { %1194 = vmatpush1.bf16.msra.mxu0 %v2676_v9  ;;  %v399_v9 = vld [vmem:[#allocation3 + $0x298] sm:$0xff] }
 0x2f7   :  { %1195 = vmatprep.subr.bf16.mxu0 %v2685_v10  ;;  %2113 = vmatpush1.bf16.msra.mxu1 %v2987_v13  ;;  %v403_v10 = vld [vmem:[#allocation3 + $0x2b8] sm:$0xff] }
 0x2f8   :  { %2114 = vmatprep.subr.bf16.mxu1 %v2992_v14  ;;  %v2665_v12 = vcombine.high %v399_v9, %v403_v10  ;;  %v407_v13 = vld [vmem:[#allocation3 + $0x2d8] sm:$0xff] }
 0x2f9   :  { %v411_v14 = vld [vmem:[#allocation3 + $0x2f8] sm:$0xff] }
 0x2fa   :  { %1196 = vmatpush1.bf16.msra.mxu0 %v2684_v15  ;;  %v2664_v15 = vcombine.low %v399_v9, %v403_v10  ;;  %v3028_v9 = vld [vmem:[#allocation6 + $0x194] ss:$8 sps:$4 sm:$0xff]   ;;  %v3026_v10 = vld [vmem:[#allocation6 + $0x190] ss:$8 sps:$4 sm:$0xff]  }
 0x2fb   :  { %1197 = vmatprep.subr.bf16.mxu0 %v2693_v16  ;;  %2115 = vmatpush1.bf16.msra.mxu1 %v2990_v19  ;;  %v2673_v16 = vcombine.high %v407_v13, %v411_v14  ;;  %v2672_v19 = vcombine.low %v407_v13, %v411_v14  ;;  %v3034_v13 = vld [vmem:[#allocation6 + $0x1b4] ss:$8 sps:$4 sm:$0xff]   ;;  %v3032_v14 = vld [vmem:[#allocation6 + $0x1b0] ss:$8 sps:$4 sm:$0xff]  }
 0x2fc   :  { %2116 = vmatprep.subr.bf16.mxu1 %v2995_v53 }
 0x2fe   :  { %1198 = vmatpush1.bf16.msra.mxu0 %v2692_v20  ;;  %v2681_v20 = vcombine.high %v415_v17, %v419_v18  ;;  %v3040_v17 = vld [vmem:[#allocation6 + $0x1d4] ss:$8 sps:$4 sm:$0xff]   ;;  %v470_v18 = vsub.s32 5, %v3421_v42 }
 0x2ff   :  { %1199 = vmatprep.subr.bf16.mxu0 %v2701_v21  ;;  %2117 = vmatpush1.bf16.msra.mxu1 %v2993_v58  ;;  %v423_v21 = vld [vmem:[#allocation3 + $0x358] sm:$0xff]  ;;  %v3007_v58 = vld [vmem:[#allocation6 + $0x124] ss:$8 sps:$4 sm:$0xff]  }
 0x300   :  { %2118 = vmatprep.subr.bf16.mxu1 %v2998_v61  ;;  %v2688_v30 = vcombine.low %v423_v21, %v427_v22  ;;  %v3008_v61 = vld [vmem:[#allocation6 + $0x130] ss:$8 sps:$4 sm:$0xff]  }
 0x302   :  { %1200 = vmatpush1.bf16.msra.mxu0 %v2700_v27  ;;  %v2689_v27 = vcombine.high %v423_v21, %v427_v22  ;;  %v462_v21 = vsub.s32 3, %v3421_v42  ;;  %v3043_v22 = vld [vmem:[#allocation6 + $0x1e4] ss:$8 sps:$4 sm:$0xff]  }
 0x303   :  { %1251 = vmatprep.subr.bf16.mxu0 %v2585_v28  ;;  %2119 = vmatpush1.bf16.msra.mxu1 %v2996_v0  ;;  %v431_v28 = vld [vmem:[#allocation3 + $0x398] sm:$0xff] }
 0x304   :  { %2129 = vmatprep.subr.bf16.mxu1 %v3001_v4  ;;  %v2696_v34 = vcombine.low %v431_v28, %v435_v29  ;;  %v3016_v0 = vld [vmem:[#allocation6 + $0x154] ss:$8 sps:$4 sm:$0xff]   ;;  %v3017_v4 = vld [vmem:[#allocation6 + $0x160] ss:$8 sps:$4 sm:$0xff]  }
 0x305   :  { %1202 = vmatmul.mubr.bf16.vlgmr.msra.gmra.mrb[16].mxu0 %v3436_v56 }
 0x306   :  { %1252 = vmatpush1.bf16.msra.mxu0 %v2584_v31  ;;  %1283 = vmatprep.mubr.bf16.mxu0 %v3434_v55  ;;  %v2625_v55 = vcombine.high %v359_v24, %v363_v25  ;;  %v2697_v31 = vcombine.high %v431_v28, %v435_v29  ;;  %v463_v28 = vrot.slane %v3449_v37, %v462_v21  ;;  %v3041_v29 = vld [vmem:[#allocation6 + $0x1e0] ss:$8 sps:$4 sm:$0xff]   ;;  %v3085_v21 = vld [vmem:[#allocation6 + $0x2c4] ss:$8 sps:$4 sm:$0xff]  }
 0x307   :  { %1253 = vmatprep.subr.bf16.mxu0 %v2593_v32  ;;  %v439_v32 = vld [vmem:[#allocation3 + $0x3d8] sm:$0xff] }
 0x30a   :  { %1254 = vmatpush1.bf16.msra.mxu0 %v2592_v35  ;;  %v2705_v35 = vcombine.high %v439_v32, %v443_v33 }
 0x30b   :  { %1255 = vmatprep.subr.bf16.mxu0 %v2601_v36  ;;  %v2704_v36 = vcombine.low %v439_v32, %v443_v33 }
 0x30e   :  { %1256 = vmatpush1.bf16.msra.mxu0 %v2600_v39  ;;  %v455_v39 = vrot.slane %v3449_v37, %v3430_v45 }
 0x30f   :  { %1257 = vmatprep.subr.bf16.mxu0 %v2609_v40 }
 0x312   :  { %1258 = vmatpush1.bf16.msra.mxu0 %v2608_v47 }
 0x313   :  { %1259 = vmatprep.subr.bf16.mxu0 %v2617_v48 }
 0x316   :  { %1260 = vmatpush1.bf16.msra.mxu0 %v2616_v26 }
 0x317   :  { %1261 = vmatprep.subr.bf16.mxu0 %v2625_v55 }
 0x31a   :  { %1262 = vmatpush1.bf16.msra.mxu0 %v2624_v51 }
 0x31b   :  { %1263 = vmatprep.subr.bf16.mxu0 %v2633_v52  ;;  %v2999_v52 = vld [vmem:[#allocation6 + $0x100] ss:$8 sps:$4 sm:$0xff]  }
 0x31e   :  { %1264 = vmatpush1.bf16.msra.mxu0 %v2632_v59  ;;  %v3005_v59 = vld [vmem:[#allocation6 + $0x120] ss:$8 sps:$4 sm:$0xff]  }
 0x31f   :  { %1265 = vmatprep.subr.bf16.mxu0 %v2641_v60  ;;  %v3010_v60 = vld [vmem:[#allocation6 + $0x134] ss:$8 sps:$4 sm:$0xff]  }
 0x322   :  { %1266 = vmatpush1.bf16.msra.mxu0 %v2640_v2  ;;  %v3014_v2 = vld [vmem:[#allocation6 + $0x150] ss:$8 sps:$4 sm:$0xff]  }
 0x323   :  { %1267 = vmatprep.subr.bf16.mxu0 %v2649_v3  ;;  %v3019_v3 = vld [vmem:[#allocation6 + $0x164] ss:$8 sps:$4 sm:$0xff]  }
 0x326   :  { %1268 = vmatpush1.bf16.msra.mxu0 %v2648_v7  ;;  %v3025_v7 = vld [vmem:[#allocation6 + $0x184] ss:$8 sps:$4 sm:$0xff]  }
 0x327   :  { %1269 = vmatprep.subr.bf16.mxu0 %v2657_v8  ;;  %v3023_v8 = vld [vmem:[#allocation6 + $0x180] ss:$8 sps:$4 sm:$0xff]  }
 0x32a   :  { %1270 = vmatpush1.bf16.msra.mxu0 %v2656_v11  ;;  %v3031_v11 = vld [vmem:[#allocation6 + $0x1a4] ss:$8 sps:$4 sm:$0xff]  }
 0x32b   :  { %1271 = vmatprep.subr.bf16.mxu0 %v2665_v12  ;;  %v3029_v12 = vld [vmem:[#allocation6 + $0x1a0] ss:$8 sps:$4 sm:$0xff]  }
 0x32e   :  { %1272 = vmatpush1.bf16.msra.mxu0 %v2664_v15  ;;  %v3037_v15 = vld [vmem:[#allocation6 + $0x1c4] ss:$8 sps:$4 sm:$0xff]  }
 0x32f   :  { %1273 = vmatprep.subr.bf16.mxu0 %v2673_v16  ;;  %v3035_v16 = vld [vmem:[#allocation6 + $0x1c0] ss:$8 sps:$4 sm:$0xff]  }
 0x332   :  { %1274 = vmatpush1.bf16.msra.mxu0 %v2672_v19  ;;  %v458_v19 = vsub.s32 2, %v3421_v42 }
 0x333   :  { %1275 = vmatprep.subr.bf16.mxu0 %v2681_v20  ;;  %v3038_v20 = vld [vmem:[#allocation6 + $0x1d0] ss:$8 sps:$4 sm:$0xff]  }
 0x336   :  { %1276 = vmatpush1.bf16.msra.mxu0 %v2680_v23  ;;  %v471_v23 = vrot.slane %v3449_v37, %v470_v18  ;;  %v3077_v18 = vld [vmem:[#allocation6 + $0x2a0] ss:$8 sps:$4 sm:$0xff]  }
 0x337   :  { %1277 = vmatprep.subr.bf16.mxu0 %v2689_v27  ;;  %v459_v27 = vrot.slane %v3449_v37, %v458_v19  ;;  %v3082_v19 = vld [vmem:[#allocation6 + $0x2b4] ss:$8 sps:$4 sm:$0xff]  }
 0x33a   :  { %1278 = vmatpush1.bf16.msra.mxu0 %v2688_v30  ;;  %v3046_v30 = vld [vmem:[#allocation6 + $0x1f4] ss:$8 sps:$4 sm:$0xff]  }
 0x33b   :  { %1279 = vmatprep.subr.bf16.mxu0 %v2697_v31 }
 0x33e   :  { %1280 = vmatpush1.bf16.msra.mxu0 %v2696_v34 }
 0x33f   :  { %1281 = vmatprep.subr.bf16.mxu0 %v2705_v35 }
 0x342   :  { %1282 = vmatpush1.bf16.msra.mxu0 %v2704_v36 }
 0x345   :  { %1284 = vmatmul.mubr.bf16.vlgmr.msra.gmra.mrb[20].mxu0 %v3436_v56 }
 0x398   :  { %v1162_v40 = vpop.f32.mrb[12].mxu0  ;;  %v3455_v44 = vpop.f32.mrb[0].mxu1 }
 0x399   :  { %v1163_v46 = vadd.f32 %v1162_v40, %v451_v38  ;;  %v1164_v47 = vpop.f32.mrb[13].mxu0  ;;  %v3457_v48 = vpop.f32.mrb[1].mxu1  ;;  %v3044_v38 = vld [vmem:[#allocation6 + $0x1f0] ss:$8 sps:$4 sm:$0xff]  }
 0x39a   :  { %v1165_v24 = vadd.f32 %v1164_v47, %v455_v39  ;;  %v1166_v56 = vpop.f32.mrb[14].mxu0  ;;  %v1248_v25 = vpop.f32.mrb[2].mxu1  ;;  %v1247_v31 = vadd.f32 %v3457_v48, %v471_v23  ;;  %v466_v23 = vsub.s32 4, %v3421_v42 }
 0x39b   :  { %v1292_v26 = vmax.f32 %v1163_v46, 0.0  ;;  %v1167_v55 = vpop.f32.mrb[15].mxu0  ;;  %v1249_v49 = vpop.f32.mrb[3].mxu1  ;;  %v3049_v46 = vld [vmem:[#allocation6 + $0x204] ss:$8 sps:$4 sm:$0xff]  }
 0x39c   :  { %v1293_v50 = vmax.f32 %v1165_v24, 0.0  ;;  %v1297_v47 = vmax.f32 %v1247_v31, 0.0  ;;  %v3047_v25 = vld [vmem:[#allocation6 + $0x200] ss:$8 sps:$4 sm:$0xff]   ;;  %v3052_v55 = vld [vmem:[#allocation6 + $0x214] ss:$8 sps:$4 sm:$0xff]  }
 0x39d   :  { %v1429_v53 = vpack.c.bf16 %v1292_v26, %v1292_v26  ;;  %v3143_v49 = vld [vmem:[%s3584_s11 + $0x40] sm:$0xff]  }
 0x39e   :  { %v1430_v51 = vpack.c.bf16 %v1293_v50, %v1293_v50  ;;  %v1434_v48 = vpack.c.bf16 %v1297_v47, %v1297_v47  ;;  %v3144_v50 = vld [vmem:[%s3584_s11] sm:$0xff]   ;;  %2862 = vmatprep.subr.bf16.mxu0 %v3143_v49  ;;  %v3098_v49 = vld [vmem:[#allocation6 + $0x310] ss:$8 sps:$4 sm:$0xff]  }
 0x39f   :  { %2863 = vmatpush3.bf16.msra.mxu0 %v3144_v50  ;;  %v3091_v31 = vld [vmem:[#allocation6 + $0x2e4] ss:$8 sps:$4 sm:$0xff]  }
 0x3a0   :  { %2120 = vmatprep.mubr.bf16.mxu1 %v1430_v51  ;;  %v3145_v51 = vld [vmem:[%s3584_s11 + $0x48] sm:$0xff]  }
 0x3a1   :  { %2121 = vmatmul.mubr.bf16.vlgmr.msra.gmra.mrb[4].mxu1 %v1429_v53  ;;  %v3055_v53 = vld [vmem:[#allocation6 + $0x224] ss:$8 sps:$4 sm:$0xff]   ;;  %2864 = vmatprep.subr.bf16.mxu0 %v3145_v51  ;;  %v3101_v51 = vld [vmem:[#allocation6 + $0x320] ss:$8 sps:$4 sm:$0xff]  }
 0x3a2   :  { %2130 = vmatpush1.bf16.msra.mxu1 %v2999_v52  ;;  %v3050_v52 = vld [vmem:[#allocation6 + $0x210] ss:$8 sps:$4 sm:$0xff]   ;;  %v3103_v50 = vld [vmem:[#allocation6 + $0x324] ss:$8 sps:$4 sm:$0xff]  }
 0x3a3   :  { %2131 = vmatprep.subr.bf16.mxu1 %v3004_v54  ;;  %v3146_v54 = vld [vmem:[%s3584_s11 + $0x8] sm:$0xff]  }
 0x3a4   :  { %2865 = vmatpush3.bf16.msra.mxu0 %v3146_v54  ;;  %v3109_v54 = vld [vmem:[#allocation6 + $0x344] ss:$8 sps:$4 sm:$0xff]  }
 0x3a6   :  { %2132 = vmatpush1.bf16.msra.mxu1 %v3002_v57  ;;  %v3147_v57 = vld [vmem:[%s3584_s11 + $0x50] sm:$0xff]  }
 0x3a7   :  { %2133 = vmatprep.subr.bf16.mxu1 %v3007_v58  ;;  %v3053_v58 = vld [vmem:[#allocation6 + $0x220] ss:$8 sps:$4 sm:$0xff]   ;;  %2866 = vmatprep.subr.bf16.mxu0 %v3147_v57 }
 0x3a8   :  { %v3107_v57 = vld [vmem:[#allocation6 + $0x340] ss:$8 sps:$4 sm:$0xff]  }
 0x3aa   :  { %2134 = vmatpush1.bf16.msra.mxu1 %v3005_v59  ;;  %v3058_v59 = vld [vmem:[#allocation6 + $0x234] ss:$8 sps:$4 sm:$0xff]  }
 0x3ab   :  { %2135 = vmatprep.subr.bf16.mxu1 %v3010_v60  ;;  %v3148_v60 = vld [vmem:[%s3584_s11 + $0x10] sm:$0xff]  }
 0x3ac   :  { %2867 = vmatpush3.bf16.msra.mxu0 %v3148_v60  ;;  %v3115_v60 = vld [vmem:[#allocation6 + $0x364] ss:$8 sps:$4 sm:$0xff]  }
 0x3ae   :  { %2136 = vmatpush1.bf16.msra.mxu1 %v3008_v61  ;;  %v3149_v61 = vld [vmem:[%s3584_s11 + $0x58] sm:$0xff]  }
 0x3af   :  { %2137 = vmatprep.subr.bf16.mxu1 %v3013_v62  ;;  %v3056_v62 = vld [vmem:[#allocation6 + $0x230] ss:$8 sps:$4 sm:$0xff]   ;;  %2868 = vmatprep.subr.bf16.mxu0 %v3149_v61  ;;  %v3113_v61 = vld [vmem:[#allocation6 + $0x360] ss:$8 sps:$4 sm:$0xff]  }
 0x3b2   :  { %2138 = vmatpush1.bf16.msra.mxu1 %v3011_v63  ;;  %v3061_v63 = vld [vmem:[#allocation6 + $0x244] ss:$8 sps:$4 sm:$0xff]  }
 0x3b3   :  { %2139 = vmatprep.subr.bf16.mxu1 %v3016_v0  ;;  %v3150_v0 = vld [vmem:[%s3584_s11 + $0x18] sm:$0xff]  }
 0x3b4   :  { %2869 = vmatpush3.bf16.msra.mxu0 %v3150_v0  ;;  %v3121_v0 = vld [vmem:[#allocation6 + $0x384] ss:$8 sps:$4 sm:$0xff]  }
 0x3b6   :  { %2140 = vmatpush1.bf16.msra.mxu1 %v3014_v2  ;;  %v3151_v2 = vld [vmem:[%s3584_s11 + $0x60] sm:$0xff]  }
 0x3b7   :  { %2141 = vmatprep.subr.bf16.mxu1 %v3019_v3  ;;  %v3059_v3 = vld [vmem:[#allocation6 + $0x240] ss:$8 sps:$4 sm:$0xff]   ;;  %2870 = vmatprep.subr.bf16.mxu0 %v3151_v2 }
 0x3b8   :  { %v3119_v2 = vld [vmem:[#allocation6 + $0x380] ss:$8 sps:$4 sm:$0xff]  }
 0x3ba   :  { %2142 = vmatpush1.bf16.msra.mxu1 %v3017_v4  ;;  %v3064_v4 = vld [vmem:[#allocation6 + $0x254] ss:$8 sps:$4 sm:$0xff]  }
 0x3bb   :  { %2143 = vmatprep.subr.bf16.mxu1 %v3022_v5  ;;  %v3152_v5 = vld [vmem:[%s3584_s11 + $0x20] sm:$0xff]  }
 0x3bc   :  { %2871 = vmatpush3.bf16.msra.mxu0 %v3152_v5  ;;  %v3127_v5 = vld [vmem:[#allocation6 + $0x3a4] ss:$8 sps:$4 sm:$0xff]  }
 0x3be   :  { %2144 = vmatpush1.bf16.msra.mxu1 %v3020_v6  ;;  %v3153_v6 = vld [vmem:[%s3584_s11 + $0x68] sm:$0xff]  }
 0x3bf   :  { %2145 = vmatprep.subr.bf16.mxu1 %v3025_v7  ;;  %v3062_v7 = vld [vmem:[#allocation6 + $0x250] ss:$8 sps:$4 sm:$0xff]   ;;  %2872 = vmatprep.subr.bf16.mxu0 %v3153_v6  ;;  %v3125_v6 = vld [vmem:[#allocation6 + $0x3a0] ss:$8 sps:$4 sm:$0xff]  }
 0x3c2   :  { %2146 = vmatpush1.bf16.msra.mxu1 %v3023_v8  ;;  %v3067_v8 = vld [vmem:[#allocation6 + $0x264] ss:$8 sps:$4 sm:$0xff]  }
 0x3c3   :  { %2147 = vmatprep.subr.bf16.mxu1 %v3028_v9  ;;  %v3154_v9 = vld [vmem:[%s3584_s11 + $0x28] sm:$0xff]  }
 0x3c4   :  { %2873 = vmatpush3.bf16.msra.mxu0 %v3154_v9  ;;  %v3133_v9 = vld [vmem:[#allocation6 + $0x3c4] ss:$8 sps:$4 sm:$0xff]  }
 0x3c6   :  { %2148 = vmatpush1.bf16.msra.mxu1 %v3026_v10  ;;  %v3065_v10 = vld [vmem:[#allocation6 + $0x260] ss:$8 sps:$4 sm:$0xff]  }
 0x3c7   :  { %2149 = vmatprep.subr.bf16.mxu1 %v3031_v11  ;;  %v3070_v11 = vld [vmem:[#allocation6 + $0x274] ss:$8 sps:$4 sm:$0xff]  }
 0x3ca   :  { %2150 = vmatpush1.bf16.msra.mxu1 %v3029_v12  ;;  %v3068_v12 = vld [vmem:[#allocation6 + $0x270] ss:$8 sps:$4 sm:$0xff]  }
 0x3cb   :  { %2151 = vmatprep.subr.bf16.mxu1 %v3034_v13  ;;  %v3073_v13 = vld [vmem:[#allocation6 + $0x284] ss:$8 sps:$4 sm:$0xff]  }
 0x3ce   :  { %2152 = vmatpush1.bf16.msra.mxu1 %v3032_v14  ;;  %v3071_v14 = vld [vmem:[#allocation6 + $0x280] ss:$8 sps:$4 sm:$0xff]  }
 0x3cf   :  { %2153 = vmatprep.subr.bf16.mxu1 %v3037_v15  ;;  %v3076_v15 = vld [vmem:[#allocation6 + $0x294] ss:$8 sps:$4 sm:$0xff]  }
 0x3d2   :  { %2154 = vmatpush1.bf16.msra.mxu1 %v3035_v16  ;;  %v3074_v16 = vld [vmem:[#allocation6 + $0x290] ss:$8 sps:$4 sm:$0xff]  }
 0x3d3   :  { %2155 = vmatprep.subr.bf16.mxu1 %v3040_v17  ;;  %v3079_v17 = vld [vmem:[#allocation6 + $0x2a4] ss:$8 sps:$4 sm:$0xff]  }
 0x3d6   :  { %2156 = vmatpush1.bf16.msra.mxu1 %v3038_v20  ;;  %v3080_v20 = vld [vmem:[#allocation6 + $0x2b0] ss:$8 sps:$4 sm:$0xff]  }
 0x3d7   :  { %2157 = vmatprep.subr.bf16.mxu1 %v3043_v22  ;;  %v3083_v22 = vld [vmem:[#allocation6 + $0x2c0] ss:$8 sps:$4 sm:$0xff]  }
 0x3d8   :  { %v1203_v32 = vpop.f32.mrb[16].mxu0 }
 0x3d9   :  { %v1204_v33 = vadd.f32 %v1203_v32, %v459_v27  ;;  %v1205_v34 = vpop.f32.mrb[17].mxu0  ;;  %v3088_v27 = vld [vmem:[#allocation6 + $0x2d4] ss:$8 sps:$4 sm:$0xff]  }
 0x3da   :  { %v1206_v35 = vadd.f32 %v1205_v34, %v463_v28  ;;  %v1207_v36 = vpop.f32.mrb[18].mxu0  ;;  %2158 = vmatpush1.bf16.msra.mxu1 %v3041_v29  ;;  %v3086_v28 = vld [vmem:[#allocation6 + $0x2d0] ss:$8 sps:$4 sm:$0xff]   ;;  %v478_v29 = vsub.s32 7, %v3421_v42 }
 0x3db   :  { %v1294_v39 = vmax.f32 %v1204_v33, 0.0  ;;  %v1208_v40 = vpop.f32.mrb[19].mxu0  ;;  %2159 = vmatprep.subr.bf16.mxu1 %v3046_v30  ;;  %v467_v30 = vrot.slane %v3449_v37, %v466_v23  ;;  %v3089_v33 = vld [vmem:[#allocation6 + $0x2e0] ss:$8 sps:$4 sm:$0xff]   ;;  %v3157_v23 = vld [vmem:[%s3584_s11 + $0x78] sm:$0xff]  }
 0x3dc   :  { %v1295_v24 = vmax.f32 %v1206_v35, 0.0  ;;  %v479_v32 = vrot.slane %v3449_v37, %v478_v29  ;;  %v3094_v35 = vld [vmem:[#allocation6 + $0x2f4] ss:$8 sps:$4 sm:$0xff]  }
 0x3dd   :  { %v1431_v26 = vpack.c.bf16 %v1294_v39, %v1294_v39  ;;  %v1245_v34 = vadd.f32 %v3455_v44, %v467_v30 }
 0x3de   :  { %v1432_v56 = vpack.c.bf16 %v1295_v24, %v1295_v24  ;;  %2160 = vmatpush1.bf16.msra.mxu1 %v3044_v38 }
 0x3df   :  { %2170 = vmatprep.subr.bf16.mxu1 %v3049_v46  ;;  %v3092_v46 = vld [vmem:[#allocation6 + $0x2f0] ss:$8 sps:$4 sm:$0xff]   ;;  %v1296_v47 = vmax.f32 %v1245_v34, 0.0 }
 0x3e0   :  { %2161 = vmatprep.mubr.bf16.mxu1 %v1432_v56  ;;  %v3097_v56 = vld [vmem:[#allocation6 + $0x304] ss:$8 sps:$4 sm:$0xff]  }
 0x3e1   :  { %2162 = vmatmul.mubr.bf16.vlgmr.msra.gmra.mrb[4].mxu1 %v1431_v26  ;;  %v3095_v26 = vld [vmem:[#allocation6 + $0x300] ss:$8 sps:$4 sm:$0xff]  }
 0x3e2   :  { %2171 = vmatpush1.bf16.msra.mxu1 %v3047_v25  ;;  %2202 = vmatprep.mubr.bf16.mxu1 %v1434_v48  ;;  %v3100_v48 = vld [vmem:[#allocation6 + $0x314] ss:$8 sps:$4 sm:$0xff]  }
 0x3e3   :  { %2172 = vmatprep.subr.bf16.mxu1 %v3052_v55  ;;  %v1433_v55 = vpack.c.bf16 %v1296_v47, %v1296_v47 }
 0x3e6   :  { %2173 = vmatpush1.bf16.msra.mxu1 %v3050_v52  ;;  %v3106_v52 = vld [vmem:[#allocation6 + $0x334] ss:$8 sps:$4 sm:$0xff]  }
 0x3e7   :  { %2174 = vmatprep.subr.bf16.mxu1 %v3055_v53  ;;  %v3104_v53 = vld [vmem:[#allocation6 + $0x330] ss:$8 sps:$4 sm:$0xff]  }
 0x3ea   :  { %2175 = vmatpush1.bf16.msra.mxu1 %v3053_v58  ;;  %v3112_v58 = vld [vmem:[#allocation6 + $0x354] ss:$8 sps:$4 sm:$0xff]  }
 0x3eb   :  { %2176 = vmatprep.subr.bf16.mxu1 %v3058_v59  ;;  %v3110_v59 = vld [vmem:[#allocation6 + $0x350] ss:$8 sps:$4 sm:$0xff]  }
 0x3ee   :  { %2177 = vmatpush1.bf16.msra.mxu1 %v3056_v62  ;;  %v3118_v62 = vld [vmem:[#allocation6 + $0x374] ss:$8 sps:$4 sm:$0xff]  }
 0x3ef   :  { %2178 = vmatprep.subr.bf16.mxu1 %v3061_v63  ;;  %v3116_v63 = vld [vmem:[#allocation6 + $0x370] ss:$8 sps:$4 sm:$0xff]  }
 0x3f2   :  { %2179 = vmatpush1.bf16.msra.mxu1 %v3059_v3  ;;  %v3124_v3 = vld [vmem:[#allocation6 + $0x394] ss:$8 sps:$4 sm:$0xff]  }
 0x3f3   :  { %2180 = vmatprep.subr.bf16.mxu1 %v3064_v4  ;;  %v3122_v4 = vld [vmem:[#allocation6 + $0x390] ss:$8 sps:$4 sm:$0xff]  }
 0x3f6   :  { %2181 = vmatpush1.bf16.msra.mxu1 %v3062_v7  ;;  %v3130_v7 = vld [vmem:[#allocation6 + $0x3b4] ss:$8 sps:$4 sm:$0xff]  }
 0x3f7   :  { %2182 = vmatprep.subr.bf16.mxu1 %v3067_v8  ;;  %v3128_v8 = vld [vmem:[#allocation6 + $0x3b0] ss:$8 sps:$4 sm:$0xff]  }
 0x3fa   :  { %2183 = vmatpush1.bf16.msra.mxu1 %v3065_v10  ;;  %v3131_v10 = vld [vmem:[#allocation6 + $0x3c0] ss:$8 sps:$4 sm:$0xff]  }
 0x3fb   :  { %2184 = vmatprep.subr.bf16.mxu1 %v3070_v11  ;;  %v474_v11 = vsub.s32 6, %v3421_v42 }
 0x3fe   :  { %2185 = vmatpush1.bf16.msra.mxu1 %v3068_v12  ;;  %v3136_v12 = vld [vmem:[#allocation6 + $0x3d4] ss:$8 sps:$4 sm:$0xff]  }
 0x3ff   :  { %2186 = vmatprep.subr.bf16.mxu1 %v3073_v13  ;;  %v3134_v13 = vld [vmem:[#allocation6 + $0x3d0] ss:$8 sps:$4 sm:$0xff]  }
 0x402   :  { %2187 = vmatpush1.bf16.msra.mxu1 %v3071_v14  ;;  %v475_v14 = vrot.slane %v3449_v37, %v474_v11  ;;  %v3156_v37 = vld [vmem:[%s3584_s11 + $0x30] sm:$0xff]  }
 0x403   :  { %2188 = vmatprep.subr.bf16.mxu1 %v3076_v15  ;;  %v3139_v15 = vld [vmem:[#allocation6 + $0x3e4] ss:$8 sps:$4 sm:$0xff]  }
 0x406   :  { %2189 = vmatpush1.bf16.msra.mxu1 %v3074_v16  ;;  %v3137_v16 = vld [vmem:[#allocation6 + $0x3e0] ss:$8 sps:$4 sm:$0xff]  }
 0x407   :  { %2190 = vmatprep.subr.bf16.mxu1 %v3079_v17 }
 0x40a   :  { %2191 = vmatpush1.bf16.msra.mxu1 %v3077_v18  ;;  %v3142_v18 = vld [vmem:[#allocation6 + $0x3f4] ss:$8 sps:$4 sm:$0xff]  }
 0x40b   :  { %2192 = vmatprep.subr.bf16.mxu1 %v3082_v19  ;;  %v3140_v19 = vld [vmem:[#allocation6 + $0x3f0] ss:$8 sps:$4 sm:$0xff]  }
 0x40e   :  { %2193 = vmatpush1.bf16.msra.mxu1 %v3080_v20 }
 0x40f   :  { %2194 = vmatprep.subr.bf16.mxu1 %v3085_v21 }
 0x412   :  { %2195 = vmatpush1.bf16.msra.mxu1 %v3083_v22  ;;  %v3155_v22 = vld [vmem:[%s3584_s11 + $0x70] sm:$0xff]  }
 0x413   :  { %2196 = vmatprep.subr.bf16.mxu1 %v3088_v27  ;;  %2874 = vmatprep.subr.bf16.mxu0 %v3155_v22  ;;  %v3158_v27 = vld [vmem:[%s3584_s11 + $0x38] sm:$0xff]  }
 0x414   :  { %2875 = vmatpush3.bf16.msra.mxu0 %v3156_v37 }
 0x415   :  { %2876 = vmatprep.subr.bf16.mxu0 %v3157_v23 }
 0x416   :  { %2197 = vmatpush1.bf16.msra.mxu1 %v3086_v28  ;;  %v1428_v28 = vld [vmem:[%s3583_s10] sm:$0x3] }
 0x417   :  { %2198 = vmatprep.subr.bf16.mxu1 %v3091_v31  ;;  %v1441_v29 = vrot.slane %v1428_v28, %v3424_v43  ;;  %v1445_v30 = vrot.slane %v1428_v28, %v3430_v45  ;;  %v3160_v45 = vld [vmem:[%s3586_s13 + $0x8] sm:$0xff]  }
 0x418   :  { %v3507_v36 = vpop.f32.mrb[20].mxu0  ;;  %2877 = vmatpush3.bf16.msra.mxu0 %v3158_v27 }
 0x419   :  { %v1287_v38 = vpop.f32.mrb[21].mxu0  ;;  %v1286_v17 = vadd.f32 %v3507_v36, %v475_v14  ;;  %2901 = vmatprep.subr.bf16.mxu0 %v3241_v1 }
 0x41a   :  { %v1288_v39 = vadd.f32 %v1287_v38, %v479_v32  ;;  %v1289_v40 = vpop.f32.mrb[22].mxu0  ;;  %2199 = vmatpush1.bf16.msra.mxu1 %v3089_v33 }
 0x41b   :  { %v1290_v24 = vpop.f32.mrb[23].mxu0  ;;  %2200 = vmatprep.subr.bf16.mxu1 %v3094_v35  ;;  %v1298_v20 = vmax.f32 %v1286_v17, 0.0 }
 0x41c   :  { %v1299_v25 = vmax.f32 %v1288_v39, 0.0  ;;  %v3161_v24 = vld [vmem:[%s3586_s13 + $0x10] sm:$0xff]  }
 0x41d   :  { %v1435_v21 = vpack.c.bf16 %v1298_v20, %v1298_v20 }
 0x41e   :  { %2201 = vmatpush1.bf16.msra.mxu1 %v3092_v46  ;;  %v1436_v44 = vpack.c.bf16 %v1299_v25, %v1299_v25  ;;  %v3159_v46 = vld [vmem:[%s3586_s13] sm:$0xff]  }
 0x41f   :  { %2211 = vmatprep.subr.bf16.mxu1 %v3097_v56  ;;  %v3162_v56 = vld [vmem:[%s3586_s13 + $0x18] sm:$0xff]  }
 0x421   :  { %2203 = vmatmul.mubr.bf16.vlgmr.msra.gmra.mrb[4].mxu1 %v1433_v55 }
 0x422   :  { %2212 = vmatpush1.bf16.msra.mxu1 %v3095_v26  ;;  %2243 = vmatprep.mubr.bf16.mxu1 %v1436_v44  ;;  %v2834_v26 = vld [vmem:[%s3585_s12] ss:$0 sm:$0xff]  ;;  %s3244_s12 = smov [#allocation8]  }
 0x423   :  { %2213 = vmatprep.subr.bf16.mxu1 %v3100_v48 }
 0x426   :  { %2214 = vmatpush1.bf16.msra.mxu1 %v3098_v49 }
 0x427   :  { %2215 = vmatprep.subr.bf16.mxu1 %v3103_v50 }
 0x42a   :  { %2216 = vmatpush1.bf16.msra.mxu1 %v3101_v51 }
 0x42b   :  { %2217 = vmatprep.subr.bf16.mxu1 %v3106_v52 }
 0x42e   :  { %2218 = vmatpush1.bf16.msra.mxu1 %v3104_v53 }
 0x42f   :  { %2219 = vmatprep.subr.bf16.mxu1 %v3109_v54 }
 0x432   :  { %2220 = vmatpush1.bf16.msra.mxu1 %v3107_v57 }
 0x433   :  { %2221 = vmatprep.subr.bf16.mxu1 %v3112_v58 }
 0x436   :  { %2222 = vmatpush1.bf16.msra.mxu1 %v3110_v59  ;;  %v2857_v59 = vld [vmem:[%s3588_s15] ss:$0 sm:$0xff] }
 0x437   :  { %2223 = vmatprep.subr.bf16.mxu1 %v3115_v60 }
 0x43a   :  { %2224 = vmatpush1.bf16.msra.mxu1 %v3113_v61 }
 0x43b   :  { %2225 = vmatprep.subr.bf16.mxu1 %v3118_v62 }
 0x43e   :  { %2226 = vmatpush1.bf16.msra.mxu1 %v3116_v63 }
 0x43f   :  { %2227 = vmatprep.subr.bf16.mxu1 %v3121_v0  ;;  %v2517_v0 = vld [vmem:[#allocation2] sm:$0x1] }
 0x442   :  { %2228 = vmatpush1.bf16.msra.mxu1 %v3119_v2 }
 0x443   :  { %2229 = vmatprep.subr.bf16.mxu1 %v3124_v3  ;;  %v2540_v3 = vand.u32 127, %v219_v41 }
 0x446   :  { %2230 = vmatpush1.bf16.msra.mxu1 %v3122_v4 }
 0x447   :  { %2231 = vmatprep.subr.bf16.mxu1 %v3127_v5  ;;  %v2543_v5 = vsub.s32 %v2540_v3, %v3421_v42 }
 0x44a   :  { %2232 = vmatpush1.bf16.msra.mxu1 %v3125_v6 }
 0x44b   :  { %2233 = vmatprep.subr.bf16.mxu1 %v3130_v7 }
 0x44e   :  { %2234 = vmatpush1.bf16.msra.mxu1 %v3128_v8 }
 0x44f   :  { %2235 = vmatprep.subr.bf16.mxu1 %v3133_v9 }
 0x452   :  { %2236 = vmatpush1.bf16.msra.mxu1 %v3131_v10 }
 0x453   :  { %2237 = vmatprep.subr.bf16.mxu1 %v3136_v12 }
 0x456   :  { %2238 = vmatpush1.bf16.msra.mxu1 %v3134_v13 }
 0x457   :  { %2239 = vmatprep.subr.bf16.mxu1 %v3139_v15 }
 0x45a   :  { %2240 = vmatpush1.bf16.msra.mxu1 %v3137_v16 }
 0x45b   :  { %2241 = vmatprep.subr.bf16.mxu1 %v3142_v18 }
 0x45e   :  { %2242 = vmatpush1.bf16.msra.mxu1 %v3140_v19 }
 0x461   :  { %2244 = vmatmul.mubr.bf16.vlgmr.msra.gmra.mrb[4].mxu1 %v1435_v21 }
 0x534   :  { %v2245_v31 = vpop.f32.mrb[4].mxu1 }
 0x535   :  { %v2913_v32 = vadd.f32 %v2245_v31, %v1441_v29  ;;  %v2247_v33 = vpop.f32.mrb[5].mxu1 }
 0x536   :  { %v2914_v34 = vadd.f32 %v2247_v33, %v1445_v30  ;;  %v2249_v35 = vpop.f32.mrb[6].mxu1 }
 0x537   :  { %v2252_v36 = vmax.f32 %v2913_v32, 0.0  ;;  %v2250_v38 = vpop.f32.mrb[7].mxu1 }
 0x538   :  { %v2253_v39 = vmax.f32 %v2914_v34, 0.0 }
 0x539   :  { %v2287_v47 = vpack.c.bf16 %v2252_v36, %v2252_v36 }
 0x53a   :  { %v2288_v40 = vpack.c.bf16 %v2253_v39, %v2253_v39 }
 0x53c   :  { %2423 = vmatprep.mubr.bf16.mxu0 %v2288_v40 }
 0x53d   :  { %2424 = vmatmul.mubr.bf16.vlgmr.msra.gmra.mrb[24].mxu0 %v2287_v47 }
 0x53e   :  { %2902 = vmatpush3.bf16.msra.mxu0 %v3159_v46  ;;  %2909 = vmatprep.mubr.msk.bf16.mxu0 %vm3242_vm0, %v3241_v1 }
 0x53f   :  { %2903 = vmatprep.subr.bf16.mxu0 %v3241_v1 }
 0x542   :  { %2904 = vmatpush3.bf16.msra.mxu0 %v3160_v45 }
 0x543   :  { %2905 = vmatprep.subr.bf16.mxu0 %v3241_v1 }
 0x546   :  { %2906 = vmatpush3.bf16.msra.mxu0 %v3161_v24 }
 0x547   :  { %2907 = vmatprep.subr.bf16.mxu0 %v3241_v1  ;;  %v2851_v1 = vld [vmem:[%s3587_s14] ss:$0 sm:$0xff]  ;;  %s2554_s14 = sshll.u32 %s3244_s12, 4  ;;  %s2555_s14 = int_to_ptr.vmem [resolvable:$true] %s2554_s14 }
 0x548   :  { %s3207_s15 = scalar_lea.vmem %s2555_s14, 16  ;;  %s3211_s25 = scalar_lea.vmem %s2555_s14, 32 }
 0x549   :  { %p3208_p2 = scmp.ne.s32.totalorder %s2555_s14, %s3207_s15  ;;  %p3212_p3 = scmp.lt.s32.totalorder %s2555_s14, %s2555_s14 }
 0x54a   :  { %2908 = vmatpush3.bf16.msra.mxu0 %v3162_v56  ;;  %p3213_p4 = scmp.lt.s32.totalorder %s3211_s25, %s3207_s15 }
 0x54c   :  { %p3214_p5 = por %p3213_p4, %p3212_p3 }
 0x54e   :  { %p3215_p6 = pnand %p3214_p5, %p3208_p2 }
 0x610   :  { %v2878_v25 = vpop.f32.mrb[24].mxu0 }
 0x611   :  { %v2879_v55 = vpop.f32.mrb[25].mxu0 }
 0x612   :  { %v2880_v48 = vadd.f32 %v2879_v55, %v2878_v25  ;;  %v2881_v44 = vpop.f32.mrb[26].mxu0 }
 0x613   :  { %v2882_v49 = vpop.f32.mrb[27].mxu0 }
 0x614   :  { %v2426_v50 = vadd.f32 %v2880_v48, %v2834_v26 }
 0x616   :  { %v2431_v51 = vmax.f32 %v2426_v50, 0.0 }
 0x618   :  { %v2441_v52 = vpack.c.bf16 %v2431_v51, %v2431_v51 }
 0x61a   :  { %2910 = vmatmul.mubr.msk.bf16.vlgmr.msra.gmra.mrb[28].mxu0 %vm269_vm4, %v2441_v52 }
 0x6ed   :  { %v2509_v53 = vpop.f32.mrb[28].mxu0 }
 0x6ee   :  { %v2510_v54 = vadd.f32 %v2851_v1, %v2509_v53  ;;  %v2911_v57 = vpop.f32.mrb[29].mxu0 }
 0x6ef   :  { %v2512_v58 = vpop.f32.mrb[30].mxu0 }
 0x6f0   :  { %v2515_v60 = vmax.f32 %v2510_v54, 0.0  ;;  %v2912_v61 = vpop.f32.mrb[31].mxu0 }
 0x6f2   :  { %v2524_v62 = vmul.f32 %v2857_v59, %v2515_v60 }
 0x6f4   :  { %v2525_v63 = vsel %vm163_vm3, %v2524_v62, 0.0 }
 0x6f5   :  { %2526 = vadd.xlane.f32.xlu0 %v2525_v63 }
 0x70b   :  { %2530 = vperm.xlu0 %2937, %v2517_v0  }
 0x782   :  { %v2527_v2 = vpop.xlane.xlu0 %2526 }
 0x78a   :  { %v2531_v4 = vpop.permute.xlu0 %2530 }
 0x78b   :  { %v2536_v6 = vrot.slane %v2531_v4, %v3424_v43 }
 0x78d   :  { %v2537_v7 = vadd.f32 %v2536_v6, %v2527_v2 }
 0x78f   :  { %v2544_v8 = vrot.slane %v2537_v7, %v2543_v5 }
 0x791   :  { %2547 = vst.msk [vmem:[#allocation8] sm:$0x1] %vm2546_vm5, %v2544_v8 }
 0x792   :  { %3218 = shalt.err (!%p3215_p6)
}
 0x793   :  { %s3219_s8 = scalar_lea.hbm %s3590_s17, 16 }
 0x794   :  { %p3220_p7 = scmp.ne.s32.totalorder %s3590_s17, %s3219_s8  ;;  %p3223_p8 = scmp.lt.u32.totalorder %s3219_s8, %s3590_s17 }
 0x796   :  { %p3225_p9 = pnand %p3223_p8, %p3220_p7 }
 0x798   :  { %3228 = shalt.err (!%p3225_p9)
}
 0x799   :  { %2557 = dma.vmem_to_hbm [thread:$0]  %s2555_s14, 16, %s3590_s17, [#allocation5]  }
 0x79a   :  { %3233 = dma.done.wait [#allocation5], 16  }
 0x79b   :  { %3234 = vsyncadd [#allocation5], 4294967280 }
 0x79c   :  { %2561 = vsyncpa [#allocation4], 1 }
 0x79d   :  { %2562 = vsyncpa [#allocation7], 1 }
 0x79e   :  { %2563 = vsyncpa [#allocation5], 1 }

</bundles_post_ra>
